<compile_context>
chip_gen: v6e
topology: v6e:2x2x1
jax: 0.10.0
libtpu: 0.0.40
codegen_flags: <defaults>
</compile_context>

<pallas_src>
from functools import partial

import numpy as np
import jax
import jax.numpy as jnp
from jax import lax
from jax.experimental import pallas as pl
from jax.experimental.pallas import tpu as pltpu


# ----------------------------- fused Pallas kernel --------------------------

def _fused_net_kernel(p4_ref, w1_ref, b1_ref, s_ref, w2_ref, b2_ref,
                      w3_ref, b3_ref, o_ref):
    # conv1 + bias + relu at each of the four 2x2 pool offsets; elementwise max
    # of the four results == max_pool2d(relu(conv1(x)), 2).
    w1 = w1_ref[...]                                   # (27, 16)  bf16
    b1 = b1_ref[...]                                   # (1, 16)   f32
    h1 = None
    for a in range(4):                                 # static unroll
        y = jnp.dot(p4_ref[0, a], w1, preferred_element_type=jnp.float32) + b1
        y = jnp.maximum(y, 0.0)
        h1 = y if h1 is None else jnp.maximum(h1, y)
    h1 = h1.astype(jnp.bfloat16)                       # (225, 16) pooled acts

    # conv2 ("fc1" == Conv2d(16->32, 3x3, stride 2)): 9 kernel taps, each done
    # as (constant 0/1 gather matmul) then (weight matmul), all in VMEM.
    z2 = jnp.zeros((49, 32), jnp.float32)
    for k in range(9):                                 # static unroll over taps
        g = jnp.dot(s_ref[k], h1, preferred_element_type=jnp.float32)   # (49,16)
        z2 = z2 + jnp.dot(g.astype(jnp.bfloat16), w2_ref[k],
                          preferred_element_type=jnp.float32)           # (49,32)
    h2 = jnp.maximum(z2 + b2_ref[...], 0.0)            # relu(fc1(x))
    # RandomReLU(h2) == h2 since h2 >= 0; the negative_slope param is dead.

    # fc2(1568 -> 10, zero-padded to 128 output lanes).  The torch channel-major
    # flatten (f = c*49 + p) is pre-folded into w3_ref (49, 32, 128), so fc2 is
    # a sum of per-position (1,32)x(32,128) matmuls -- no in-kernel transpose
    # or sublane->lane reshape needed.
    acc = b3_ref[...]                                  # (1, 128) f32
    for p in range(49):                                # static unroll
        row = h2[p:p + 1, :].astype(jnp.bfloat16)      # (1, 32)
        acc = acc + jnp.dot(row, w3_ref[p], preferred_element_type=jnp.float32)
    o_ref[0] = acc                                     # lane-dense (1,128) store


def _fused_forward(p4, w1m, b1, s_mat, w2k, b2, w3r, b3):
    n = p4.shape[0]
    return pl.pallas_call(
        _fused_net_kernel,
        out_shape=jax.ShapeDtypeStruct((n, 1, 128), jnp.float32),
        grid=(n,),
        in_specs=[
            pl.BlockSpec((1, 4, 225, 27), lambda b: (b, 0, 0, 0)),  # per-image patches
            pl.BlockSpec((27, 16), lambda b: (0, 0)),               # conv1 weight
            pl.BlockSpec((1, 16), lambda b: (0, 0)),                # conv1 bias
            pl.BlockSpec((9, 49, 225), lambda b: (0, 0, 0)),        # conv2 gather mats
            pl.BlockSpec((9, 16, 32), lambda b: (0, 0, 0)),         # conv2 weights
            pl.BlockSpec((1, 32), lambda b: (0, 0)),                # conv2 bias
            pl.BlockSpec((49, 32, 128), lambda b: (0, 0, 0)),       # fc2 weight (permuted+padded)
            pl.BlockSpec((1, 128), lambda b: (0, 0)),               # fc2 bias (padded)
        ],
        out_specs=pl.BlockSpec((1, 1, 128), lambda b: (b, 0, 0)),
        compiler_params=pltpu.CompilerParams(
            dimension_semantics=("parallel",)),       # shard batch across TCs (v7x)
    )(p4, w1m, b1, s_mat, w2k, b2, w3r, b3)


# ------------------------------- JAX glue ------------------------------------

def _im2col(x_nhwc, k, stride):
    """(N,H,W,C) -> (N,Ho,Wo,k*k*C), patch column order (kh, kw, c)."""
    n, h, w, c = x_nhwc.shape
    ho = (h - k) // stride + 1
    wo = (w - k) // stride + 1
    cols = []
    for di in range(k):
        for dj in range(k):
            cols.append(x_nhwc[:, di:di + (ho - 1) * stride + 1:stride,
                                  dj:dj + (wo - 1) * stride + 1:stride, :])
    return jnp.concatenate(cols, axis=-1)


def prepare_params(params):
    """One-time repack of torch-layout params into kernel-ready layouts."""
    e = params["w1"].shape[0]                      # expansion (16)
    assert e == 16 and params["w2"].shape[0] == 2 * e
    # Conv weights (O,C,kh,kw) -> matmul layout matching the im2col patch order.
    w1m = jnp.transpose(params["w1"], (2, 3, 1, 0)).reshape(9 * 3, e)       # (27,16)
    w2k = jnp.transpose(params["w2"], (2, 3, 1, 0)).reshape(9, e, 2 * e)    # (9,16,32)
    # fc2 weight: fold torch's channel-major flatten (f = c*49 + p) into the
    # weight rows and zero-pad the 10 classes to a lane-dense 128.
    w3r = params["w3"].T.reshape(2 * e, 49, -1)        # (32, 49, 10)
    w3r = jnp.transpose(w3r, (1, 0, 2))                # (49, 32, 10)
    w3r = jnp.pad(w3r, ((0, 0), (0, 0), (0, 128 - w3r.shape[-1])))
    b3 = jnp.pad(params["b3"], (0, 128 - params["b3"].shape[0])).reshape(1, 128)
    # Constant 0/1 row-selection matrices implementing conv2's im2col gather:
    # S[k, oi*7+oj, (2*oi+di)*15 + (2*oj+dj)] = 1 with k = di*3 + dj.
    s = np.zeros((9, 49, 225), np.float32)
    for di in range(3):
        for dj in range(3):
            for oi in range(7):
                for oj in range(7):
                    s[di * 3 + dj, oi * 7 + oj,
                      (2 * oi + di) * 15 + 2 * oj + dj] = 1.0
    return dict(
        w1m=w1m.astype(jnp.bfloat16),
        b1=params["b1"].reshape(1, e).astype(jnp.float32),
        w2k=w2k.astype(jnp.bfloat16),
        b2=params["b2"].reshape(1, 2 * e).astype(jnp.float32),
        w3r=w3r.astype(jnp.bfloat16),
        b3=b3.astype(jnp.float32),
        s=jnp.asarray(s, jnp.bfloat16),
    )
    # NOTE: params["slope"] (RandomReLU negative_slope) is intentionally not
    # used: applied after ReLU it is mathematically the identity.


@partial(jax.jit, static_argnames=("num_classes",))
def forward(prepped, x_nchw, num_classes=10):
    n = x_nchw.shape[0]
    x = jnp.transpose(x_nchw, (0, 2, 3, 1))            # NCHW -> NHWC
    # conv1 im2col, grouped by 2x2 pool offset -> (N, 4, 225, 27), bf16.
    # TODO(synk): for large batch, build these patches inside the kernel from a
    # raw-image VMEM tile to avoid the 9x im2col expansion through HBM.
    p = _im2col(x, 3, 1)                               # (N, 30, 30, 27)
    p4 = jnp.stack([p[:, a::2, b::2, :] for a in (0, 1) for b in (0, 1)],
                   axis=1).reshape(n, 4, 225, 27).astype(jnp.bfloat16)
    out = _fused_forward(p4, prepped["w1m"], prepped["b1"], prepped["s"],
                         prepped["w2k"], prepped["b2"], prepped["w3r"],
                         prepped["b3"])
    return out[:, 0, :num_classes]


# --------------------------- params & f32 reference --------------------------

def init_params(key, expansion=16, out_classes=10):
    assert 2 * expansion == 32, "RandomReLU(32) requires 2*expansion == 32"
    e = expansion
    ks = jax.random.split(key, 7)

    def u(k, shape, bound):
        return jax.random.uniform(k, shape, jnp.float32, -bound, bound)

    # Deterministic kaiming-uniform-style init; shapes match the torch module.
    w1 = u(ks[0], (e, 3, 3, 3), (1.0 / (3 * 9)) ** 0.5)
    b1 = u(ks[1], (e,), (1.0 / (3 * 9)) ** 0.5)
    w2 = u(ks[2], (2 * e, e, 3, 3), (1.0 / (e * 9)) ** 0.5)
    b2 = u(ks[3], (2 * e,), (1.0 / (e * 9)) ** 0.5)
    w3 = u(ks[4], (out_classes, 98 * e), (1.0 / (98 * e)) ** 0.5)
    b3 = u(ks[5], (out_classes,), (1.0 / (98 * e)) ** 0.5)
    # nn.init.uniform_(negative_slope, 0.125, 0.333), shape (1, 32, 1, 1).
    slope = jax.random.uniform(ks[6], (1, 32, 1, 1), jnp.float32, 0.125, 0.333)
    return dict(w1=w1, b1=b1, w2=w2, b2=b2, w3=w3, b3=b3, slope=slope)


def reference_forward(params, x_nchw):
    """Pure-JAX f32 reference of the intended net (no Pallas)."""
    n = x_nchw.shape[0]
    x = jnp.transpose(x_nchw, (0, 2, 3, 1))
    w1 = jnp.transpose(params["w1"], (2, 3, 1, 0))     # HWIO
    y = lax.conv_general_dilated(x, w1, (1, 1), "VALID",
                                 dimension_numbers=("NHWC", "HWIO", "NHWC"))
    y = jax.nn.relu(y + params["b1"])
    y = lax.reduce_window(y, -jnp.inf, lax.max, (1, 2, 2, 1), (1, 2, 2, 1),
                          "VALID")                     # maxpool 2x2
    w2 = jnp.transpose(params["w2"], (2, 3, 1, 0))
    z = lax.conv_general_dilated(y, w2, (2, 2), "VALID",
                                 dimension_numbers=("NHWC", "HWIO", "NHWC"))
    h = jax.nn.relu(z + params["b2"])
    slope = params["slope"].reshape(1, 1, 1, 32)
    h = jax.nn.relu(h) - slope * jax.nn.relu(-h)       # RandomReLU (identity here)
    h = jnp.transpose(h, (0, 3, 1, 2)).reshape(n, -1)  # torch channel-major flatten
    return h @ params["w3"].T + params["b3"]


if __name__ == "__main__":
    key = jax.random.PRNGKey(0)
    kx, kp = jax.random.split(key)
    batch = 2
    x = jax.random.normal(kx, (batch, 3, 32, 32), jnp.float32)  # CIFAR-10 sized
    params = init_params(kp, expansion=16, out_classes=10)
    prepped = prepare_params(params)

    out = forward(prepped, x)
    out = jax.block_until_ready(out)
    assert out.shape == (batch, 10) and out.dtype == jnp.float32
    assert bool(jnp.all(jnp.isfinite(out)))

    # Validate against the pure-JAX f32 reference (bf16 kernel -> loose tol).
    ref = reference_forward(params, x)
    max_err = float(jnp.max(jnp.abs(out - ref)))
    assert max_err < 5e-2, f"mismatch vs f32 reference: {max_err}"
    print("KERNEL_OK")
</pallas_src>

<mosaic_0001>
module attributes {stable_mosaic.version = 11 : i64} {
  func.func @_fused_net_kernel(%arg0: i32, %arg1: memref<1x4x225x27xbf16, #tpu.memory_space<vmem>>, %arg2: memref<27x16xbf16, #tpu.memory_space<vmem>>, %arg3: memref<1x16xf32, #tpu.memory_space<vmem>>, %arg4: memref<9x49x225xbf16, #tpu.memory_space<vmem>>, %arg5: memref<9x16x32xbf16, #tpu.memory_space<vmem>>, %arg6: memref<1x32xf32, #tpu.memory_space<vmem>>, %arg7: memref<49x32x128xbf16, #tpu.memory_space<vmem>>, %arg8: memref<1x128xf32, #tpu.memory_space<vmem>>, %arg9: memref<1x1x128xf32, #tpu.memory_space<vmem>>) attributes {dimension_semantics = [#tpu.dimension_semantics<parallel>], iteration_bounds = array<i64: 2>, scalar_prefetch = 0 : i64, scratch_operands = 0 : i64, tpu.core_type = #tpu.core_type<tc>, window_params = [{transform_indices = @transform_0, window_bounds = array<i64: 1, 4, 225, 27>}, {pipeline_mode = #tpu.pipeline_mode<synchronous>, transform_indices = @transform_1, window_bounds = array<i64: 27, 16>}, {pipeline_mode = #tpu.pipeline_mode<synchronous>, transform_indices = @transform_2, window_bounds = array<i64: 1, 16>}, {pipeline_mode = #tpu.pipeline_mode<synchronous>, transform_indices = @transform_3, window_bounds = array<i64: 9, 49, 225>}, {pipeline_mode = #tpu.pipeline_mode<synchronous>, transform_indices = @transform_4, window_bounds = array<i64: 9, 16, 32>}, {pipeline_mode = #tpu.pipeline_mode<synchronous>, transform_indices = @transform_5, window_bounds = array<i64: 1, 32>}, {pipeline_mode = #tpu.pipeline_mode<synchronous>, transform_indices = @transform_6, window_bounds = array<i64: 49, 32, 128>}, {pipeline_mode = #tpu.pipeline_mode<synchronous>, transform_indices = @transform_7, window_bounds = array<i64: 1, 128>}, {transform_indices = @transform_8, window_bounds = array<i64: 1, 1, 128>}]} {
    %c0 = arith.constant 0 : index
    %c0_0 = arith.constant 0 : index
    %0 = vector.load %arg2[%c0, %c0_0] : memref<27x16xbf16, #tpu.memory_space<vmem>>, vector<27x16xbf16>
    %c0_1 = arith.constant 0 : index
    %c0_2 = arith.constant 0 : index
    %1 = vector.load %arg3[%c0_1, %c0_2] : memref<1x16xf32, #tpu.memory_space<vmem>>, vector<1x16xf32>
    %c0_3 = arith.constant 0 : index
    %c0_4 = arith.constant 0 : index
    %c0_5 = arith.constant 0 : index
    %c0_6 = arith.constant 0 : index
    %2 = vector.load %arg1[%c0_3, %c0_4, %c0_5, %c0_6] : memref<1x4x225x27xbf16, #tpu.memory_space<vmem>>, vector<1x1x225x27xbf16>
    %3 = vector.shape_cast %2 : vector<1x1x225x27xbf16> to vector<225x27xbf16>
    %cst = arith.constant dense<0.000000e+00> : vector<225x16xf32>
    %4 = tpu.matmul %3, %0, %cst {dimension_numbers = #tpu.dot_dimension_numbers<[1], [0], [0], [1], [0, 0, 1, 1], [], []>} : vector<225x27xbf16>, vector<27x16xbf16>, vector<225x16xf32> -> vector<225x16xf32>
    %5 = vector.broadcast %1 : vector<1x16xf32> to vector<225x16xf32>
    %6 = arith.addf %4, %5 : vector<225x16xf32>
    %cst_7 = arith.constant 0.000000e+00 : f32
    %7 = vector.broadcast %cst_7 : f32 to vector<225x16xf32>
    %8 = arith.maximumf %6, %7 : vector<225x16xf32>
    %c0_8 = arith.constant 0 : index
    %c1 = arith.constant 1 : index
    %c0_9 = arith.constant 0 : index
    %c0_10 = arith.constant 0 : index
    %9 = vector.load %arg1[%c0_8, %c1, %c0_9, %c0_10] : memref<1x4x225x27xbf16, #tpu.memory_space<vmem>>, vector<1x1x225x27xbf16>
    %10 = vector.shape_cast %9 : vector<1x1x225x27xbf16> to vector<225x27xbf16>
    %cst_11 = arith.constant dense<0.000000e+00> : vector<225x16xf32>
    %11 = tpu.matmul %10, %0, %cst_11 {dimension_numbers = #tpu.dot_dimension_numbers<[1], [0], [0], [1], [0, 0, 1, 1], [], []>} : vector<225x27xbf16>, vector<27x16xbf16>, vector<225x16xf32> -> vector<225x16xf32>
    %12 = vector.broadcast %1 : vector<1x16xf32> to vector<225x16xf32>
    %13 = arith.addf %11, %12 : vector<225x16xf32>
    %cst_12 = arith.constant 0.000000e+00 : f32
    %14 = vector.broadcast %cst_12 : f32 to vector<225x16xf32>
    %15 = arith.maximumf %13, %14 : vector<225x16xf32>
    %16 = arith.maximumf %8, %15 : vector<225x16xf32>
    %c0_13 = arith.constant 0 : index
    %c2 = arith.constant 2 : index
    %c0_14 = arith.constant 0 : index
    %c0_15 = arith.constant 0 : index
    %17 = vector.load %arg1[%c0_13, %c2, %c0_14, %c0_15] : memref<1x4x225x27xbf16, #tpu.memory_space<vmem>>, vector<1x1x225x27xbf16>
    %18 = vector.shape_cast %17 : vector<1x1x225x27xbf16> to vector<225x27xbf16>
    %cst_16 = arith.constant dense<0.000000e+00> : vector<225x16xf32>
    %19 = tpu.matmul %18, %0, %cst_16 {dimension_numbers = #tpu.dot_dimension_numbers<[1], [0], [0], [1], [0, 0, 1, 1], [], []>} : vector<225x27xbf16>, vector<27x16xbf16>, vector<225x16xf32> -> vector<225x16xf32>
    %20 = vector.broadcast %1 : vector<1x16xf32> to vector<225x16xf32>
    %21 = arith.addf %19, %20 : vector<225x16xf32>
    %cst_17 = arith.constant 0.000000e+00 : f32
    %22 = vector.broadcast %cst_17 : f32 to vector<225x16xf32>
    %23 = arith.maximumf %21, %22 : vector<225x16xf32>
    %24 = arith.maximumf %16, %23 : vector<225x16xf32>
    %c0_18 = arith.constant 0 : index
    %c3 = arith.constant 3 : index
    %c0_19 = arith.constant 0 : index
    %c0_20 = arith.constant 0 : index
    %25 = vector.load %arg1[%c0_18, %c3, %c0_19, %c0_20] : memref<1x4x225x27xbf16, #tpu.memory_space<vmem>>, vector<1x1x225x27xbf16>
    %26 = vector.shape_cast %25 : vector<1x1x225x27xbf16> to vector<225x27xbf16>
    %cst_21 = arith.constant dense<0.000000e+00> : vector<225x16xf32>
    %27 = tpu.matmul %26, %0, %cst_21 {dimension_numbers = #tpu.dot_dimension_numbers<[1], [0], [0], [1], [0, 0, 1, 1], [], []>} : vector<225x27xbf16>, vector<27x16xbf16>, vector<225x16xf32> -> vector<225x16xf32>
    %28 = vector.broadcast %1 : vector<1x16xf32> to vector<225x16xf32>
    %29 = arith.addf %27, %28 : vector<225x16xf32>
    %cst_22 = arith.constant 0.000000e+00 : f32
    %30 = vector.broadcast %cst_22 : f32 to vector<225x16xf32>
    %31 = arith.maximumf %29, %30 : vector<225x16xf32>
    %32 = arith.maximumf %24, %31 : vector<225x16xf32>
    %33 = arith.truncf %32 : vector<225x16xf32> to vector<225x16xbf16>
    %cst_23 = arith.constant 0.000000e+00 : f32
    %34 = vector.broadcast %cst_23 : f32 to vector<49x32xf32>
    %c0_24 = arith.constant 0 : index
    %c0_25 = arith.constant 0 : index
    %c0_26 = arith.constant 0 : index
    %35 = vector.load %arg4[%c0_24, %c0_25, %c0_26] : memref<9x49x225xbf16, #tpu.memory_space<vmem>>, vector<1x49x225xbf16>
    %36 = vector.shape_cast %35 : vector<1x49x225xbf16> to vector<49x225xbf16>
    %cst_27 = arith.constant dense<0.000000e+00> : vector<49x16xf32>
    %37 = tpu.matmul %36, %33, %cst_27 {dimension_numbers = #tpu.dot_dimension_numbers<[1], [0], [0], [1], [0, 0, 1, 1], [], []>} : vector<49x225xbf16>, vector<225x16xbf16>, vector<49x16xf32> -> vector<49x16xf32>
    %38 = arith.truncf %37 : vector<49x16xf32> to vector<49x16xbf16>
    %c0_28 = arith.constant 0 : index
    %c0_29 = arith.constant 0 : index
    %c0_30 = arith.constant 0 : index
    %39 = vector.load %arg5[%c0_28, %c0_29, %c0_30] : memref<9x16x32xbf16, #tpu.memory_space<vmem>>, vector<1x16x32xbf16>
    %40 = vector.shape_cast %39 : vector<1x16x32xbf16> to vector<16x32xbf16>
    %cst_31 = arith.constant dense<0.000000e+00> : vector<49x32xf32>
    %41 = tpu.matmul %38, %40, %cst_31 {dimension_numbers = #tpu.dot_dimension_numbers<[1], [0], [0], [1], [0, 0, 1, 1], [], []>} : vector<49x16xbf16>, vector<16x32xbf16>, vector<49x32xf32> -> vector<49x32xf32>
    %42 = arith.addf %34, %41 : vector<49x32xf32>
    %c1_32 = arith.constant 1 : index
    %c0_33 = arith.constant 0 : index
    %c0_34 = arith.constant 0 : index
    %43 = vector.load %arg4[%c1_32, %c0_33, %c0_34] : memref<9x49x225xbf16, #tpu.memory_space<vmem>>, vector<1x49x225xbf16>
    %44 = vector.shape_cast %43 : vector<1x49x225xbf16> to vector<49x225xbf16>
    %cst_35 = arith.constant dense<0.000000e+00> : vector<49x16xf32>
    %45 = tpu.matmul %44, %33, %cst_35 {dimension_numbers = #tpu.dot_dimension_numbers<[1], [0], [0], [1], [0, 0, 1, 1], [], []>} : vector<49x225xbf16>, vector<225x16xbf16>, vector<49x16xf32> -> vector<49x16xf32>
    %46 = arith.truncf %45 : vector<49x16xf32> to vector<49x16xbf16>
    %c1_36 = arith.constant 1 : index
    %c0_37 = arith.constant 0 : index
    %c0_38 = arith.constant 0 : index
    %47 = vector.load %arg5[%c1_36, %c0_37, %c0_38] : memref<9x16x32xbf16, #tpu.memory_space<vmem>>, vector<1x16x32xbf16>
    %48 = vector.shape_cast %47 : vector<1x16x32xbf16> to vector<16x32xbf16>
    %cst_39 = arith.constant dense<0.000000e+00> : vector<49x32xf32>
    %49 = tpu.matmul %46, %48, %cst_39 {dimension_numbers = #tpu.dot_dimension_numbers<[1], [0], [0], [1], [0, 0, 1, 1], [], []>} : vector<49x16xbf16>, vector<16x32xbf16>, vector<49x32xf32> -> vector<49x32xf32>
    %50 = arith.addf %42, %49 : vector<49x32xf32>
    %c2_40 = arith.constant 2 : index
    %c0_41 = arith.constant 0 : index
    %c0_42 = arith.constant 0 : index
    %51 = vector.load %arg4[%c2_40, %c0_41, %c0_42] : memref<9x49x225xbf16, #tpu.memory_space<vmem>>, vector<1x49x225xbf16>
    %52 = vector.shape_cast %51 : vector<1x49x225xbf16> to vector<49x225xbf16>
    %cst_43 = arith.constant dense<0.000000e+00> : vector<49x16xf32>
    %53 = tpu.matmul %52, %33, %cst_43 {dimension_numbers = #tpu.dot_dimension_numbers<[1], [0], [0], [1], [0, 0, 1, 1], [], []>} : vector<49x225xbf16>, vector<225x16xbf16>, vector<49x16xf32> -> vector<49x16xf32>
    %54 = arith.truncf %53 : vector<49x16xf32> to vector<49x16xbf16>
    %c2_44 = arith.constant 2 : index
    %c0_45 = arith.constant 0 : index
    %c0_46 = arith.constant 0 : index
    %55 = vector.load %arg5[%c2_44, %c0_45, %c0_46] : memref<9x16x32xbf16, #tpu.memory_space<vmem>>, vector<1x16x32xbf16>
    %56 = vector.shape_cast %55 : vector<1x16x32xbf16> to vector<16x32xbf16>
    %cst_47 = arith.constant dense<0.000000e+00> : vector<49x32xf32>
    %57 = tpu.matmul %54, %56, %cst_47 {dimension_numbers = #tpu.dot_dimension_numbers<[1], [0], [0], [1], [0, 0, 1, 1], [], []>} : vector<49x16xbf16>, vector<16x32xbf16>, vector<49x32xf32> -> vector<49x32xf32>
    %58 = arith.addf %50, %57 : vector<49x32xf32>
    %c3_48 = arith.constant 3 : index
    %c0_49 = arith.constant 0 : index
    %c0_50 = arith.constant 0 : index
    %59 = vector.load %arg4[%c3_48, %c0_49, %c0_50] : memref<9x49x225xbf16, #tpu.memory_space<vmem>>, vector<1x49x225xbf16>
    %60 = vector.shape_cast %59 : vector<1x49x225xbf16> to vector<49x225xbf16>
    %cst_51 = arith.constant dense<0.000000e+00> : vector<49x16xf32>
    %61 = tpu.matmul %60, %33, %cst_51 {dimension_numbers = #tpu.dot_dimension_numbers<[1], [0], [0], [1], [0, 0, 1, 1], [], []>} : vector<49x225xbf16>, vector<225x16xbf16>, vector<49x16xf32> -> vector<49x16xf32>
    %62 = arith.truncf %61 : vector<49x16xf32> to vector<49x16xbf16>
    %c3_52 = arith.constant 3 : index
    %c0_53 = arith.constant 0 : index
    %c0_54 = arith.constant 0 : index
    %63 = vector.load %arg5[%c3_52, %c0_53, %c0_54] : memref<9x16x32xbf16, #tpu.memory_space<vmem>>, vector<1x16x32xbf16>
    %64 = vector.shape_cast %63 : vector<1x16x32xbf16> to vector<16x32xbf16>
    %cst_55 = arith.constant dense<0.000000e+00> : vector<49x32xf32>
    %65 = tpu.matmul %62, %64, %cst_55 {dimension_numbers = #tpu.dot_dimension_numbers<[1], [0], [0], [1], [0, 0, 1, 1], [], []>} : vector<49x16xbf16>, vector<16x32xbf16>, vector<49x32xf32> -> vector<49x32xf32>
    %66 = arith.addf %58, %65 : vector<49x32xf32>
    %c4 = arith.constant 4 : index
    %c0_56 = arith.constant 0 : index
    %c0_57 = arith.constant 0 : index
    %67 = vector.load %arg4[%c4, %c0_56, %c0_57] : memref<9x49x225xbf16, #tpu.memory_space<vmem>>, vector<1x49x225xbf16>
    %68 = vector.shape_cast %67 : vector<1x49x225xbf16> to vector<49x225xbf16>
    %cst_58 = arith.constant dense<0.000000e+00> : vector<49x16xf32>
    %69 = tpu.matmul %68, %33, %cst_58 {dimension_numbers = #tpu.dot_dimension_numbers<[1], [0], [0], [1], [0, 0, 1, 1], [], []>} : vector<49x225xbf16>, vector<225x16xbf16>, vector<49x16xf32> -> vector<49x16xf32>
    %70 = arith.truncf %69 : vector<49x16xf32> to vector<49x16xbf16>
    %c4_59 = arith.constant 4 : index
    %c0_60 = arith.constant 0 : index
    %c0_61 = arith.constant 0 : index
    %71 = vector.load %arg5[%c4_59, %c0_60, %c0_61] : memref<9x16x32xbf16, #tpu.memory_space<vmem>>, vector<1x16x32xbf16>
    %72 = vector.shape_cast %71 : vector<1x16x32xbf16> to vector<16x32xbf16>
    %cst_62 = arith.constant dense<0.000000e+00> : vector<49x32xf32>
    %73 = tpu.matmul %70, %72, %cst_62 {dimension_numbers = #tpu.dot_dimension_numbers<[1], [0], [0], [1], [0, 0, 1, 1], [], []>} : vector<49x16xbf16>, vector<16x32xbf16>, vector<49x32xf32> -> vector<49x32xf32>
    %74 = arith.addf %66, %73 : vector<49x32xf32>
    %c5 = arith.constant 5 : index
    %c0_63 = arith.constant 0 : index
    %c0_64 = arith.constant 0 : index
    %75 = vector.load %arg4[%c5, %c0_63, %c0_64] : memref<9x49x225xbf16, #tpu.memory_space<vmem>>, vector<1x49x225xbf16>
    %76 = vector.shape_cast %75 : vector<1x49x225xbf16> to vector<49x225xbf16>
    %cst_65 = arith.constant dense<0.000000e+00> : vector<49x16xf32>
    %77 = tpu.matmul %76, %33, %cst_65 {dimension_numbers = #tpu.dot_dimension_numbers<[1], [0], [0], [1], [0, 0, 1, 1], [], []>} : vector<49x225xbf16>, vector<225x16xbf16>, vector<49x16xf32> -> vector<49x16xf32>
    %78 = arith.truncf %77 : vector<49x16xf32> to vector<49x16xbf16>
    %c5_66 = arith.constant 5 : index
    %c0_67 = arith.constant 0 : index
    %c0_68 = arith.constant 0 : index
    %79 = vector.load %arg5[%c5_66, %c0_67, %c0_68] : memref<9x16x32xbf16, #tpu.memory_space<vmem>>, vector<1x16x32xbf16>
    %80 = vector.shape_cast %79 : vector<1x16x32xbf16> to vector<16x32xbf16>
    %cst_69 = arith.constant dense<0.000000e+00> : vector<49x32xf32>
    %81 = tpu.matmul %78, %80, %cst_69 {dimension_numbers = #tpu.dot_dimension_numbers<[1], [0], [0], [1], [0, 0, 1, 1], [], []>} : vector<49x16xbf16>, vector<16x32xbf16>, vector<49x32xf32> -> vector<49x32xf32>
    %82 = arith.addf %74, %81 : vector<49x32xf32>
    %c6 = arith.constant 6 : index
    %c0_70 = arith.constant 0 : index
    %c0_71 = arith.constant 0 : index
    %83 = vector.load %arg4[%c6, %c0_70, %c0_71] : memref<9x49x225xbf16, #tpu.memory_space<vmem>>, vector<1x49x225xbf16>
    %84 = vector.shape_cast %83 : vector<1x49x225xbf16> to vector<49x225xbf16>
    %cst_72 = arith.constant dense<0.000000e+00> : vector<49x16xf32>
    %85 = tpu.matmul %84, %33, %cst_72 {dimension_numbers = #tpu.dot_dimension_numbers<[1], [0], [0], [1], [0, 0, 1, 1], [], []>} : vector<49x225xbf16>, vector<225x16xbf16>, vector<49x16xf32> -> vector<49x16xf32>
    %86 = arith.truncf %85 : vector<49x16xf32> to vector<49x16xbf16>
    %c6_73 = arith.constant 6 : index
    %c0_74 = arith.constant 0 : index
    %c0_75 = arith.constant 0 : index
    %87 = vector.load %arg5[%c6_73, %c0_74, %c0_75] : memref<9x16x32xbf16, #tpu.memory_space<vmem>>, vector<1x16x32xbf16>
    %88 = vector.shape_cast %87 : vector<1x16x32xbf16> to vector<16x32xbf16>
    %cst_76 = arith.constant dense<0.000000e+00> : vector<49x32xf32>
    %89 = tpu.matmul %86, %88, %cst_76 {dimension_numbers = #tpu.dot_dimension_numbers<[1], [0], [0], [1], [0, 0, 1, 1], [], []>} : vector<49x16xbf16>, vector<16x32xbf16>, vector<49x32xf32> -> vector<49x32xf32>
    %90 = arith.addf %82, %89 : vector<49x32xf32>
    %c7 = arith.constant 7 : index
    %c0_77 = arith.constant 0 : index
    %c0_78 = arith.constant 0 : index
    %91 = vector.load %arg4[%c7, %c0_77, %c0_78] : memref<9x49x225xbf16, #tpu.memory_space<vmem>>, vector<1x49x225xbf16>
    %92 = vector.shape_cast %91 : vector<1x49x225xbf16> to vector<49x225xbf16>
    %cst_79 = arith.constant dense<0.000000e+00> : vector<49x16xf32>
    %93 = tpu.matmul %92, %33, %cst_79 {dimension_numbers = #tpu.dot_dimension_numbers<[1], [0], [0], [1], [0, 0, 1, 1], [], []>} : vector<49x225xbf16>, vector<225x16xbf16>, vector<49x16xf32> -> vector<49x16xf32>
    %94 = arith.truncf %93 : vector<49x16xf32> to vector<49x16xbf16>
    %c7_80 = arith.constant 7 : index
    %c0_81 = arith.constant 0 : index
    %c0_82 = arith.constant 0 : index
    %95 = vector.load %arg5[%c7_80, %c0_81, %c0_82] : memref<9x16x32xbf16, #tpu.memory_space<vmem>>, vector<1x16x32xbf16>
    %96 = vector.shape_cast %95 : vector<1x16x32xbf16> to vector<16x32xbf16>
    %cst_83 = arith.constant dense<0.000000e+00> : vector<49x32xf32>
    %97 = tpu.matmul %94, %96, %cst_83 {dimension_numbers = #tpu.dot_dimension_numbers<[1], [0], [0], [1], [0, 0, 1, 1], [], []>} : vector<49x16xbf16>, vector<16x32xbf16>, vector<49x32xf32> -> vector<49x32xf32>
    %98 = arith.addf %90, %97 : vector<49x32xf32>
    %c8 = arith.constant 8 : index
    %c0_84 = arith.constant 0 : index
    %c0_85 = arith.constant 0 : index
    %99 = vector.load %arg4[%c8, %c0_84, %c0_85] : memref<9x49x225xbf16, #tpu.memory_space<vmem>>, vector<1x49x225xbf16>
    %100 = vector.shape_cast %99 : vector<1x49x225xbf16> to vector<49x225xbf16>
    %cst_86 = arith.constant dense<0.000000e+00> : vector<49x16xf32>
    %101 = tpu.matmul %100, %33, %cst_86 {dimension_numbers = #tpu.dot_dimension_numbers<[1], [0], [0], [1], [0, 0, 1, 1], [], []>} : vector<49x225xbf16>, vector<225x16xbf16>, vector<49x16xf32> -> vector<49x16xf32>
    %102 = arith.truncf %101 : vector<49x16xf32> to vector<49x16xbf16>
    %c8_87 = arith.constant 8 : index
    %c0_88 = arith.constant 0 : index
    %c0_89 = arith.constant 0 : index
    %103 = vector.load %arg5[%c8_87, %c0_88, %c0_89] : memref<9x16x32xbf16, #tpu.memory_space<vmem>>, vector<1x16x32xbf16>
    %104 = vector.shape_cast %103 : vector<1x16x32xbf16> to vector<16x32xbf16>
    %cst_90 = arith.constant dense<0.000000e+00> : vector<49x32xf32>
    %105 = tpu.matmul %102, %104, %cst_90 {dimension_numbers = #tpu.dot_dimension_numbers<[1], [0], [0], [1], [0, 0, 1, 1], [], []>} : vector<49x16xbf16>, vector<16x32xbf16>, vector<49x32xf32> -> vector<49x32xf32>
    %106 = arith.addf %98, %105 : vector<49x32xf32>
    %c0_91 = arith.constant 0 : index
    %c0_92 = arith.constant 0 : index
    %107 = vector.load %arg6[%c0_91, %c0_92] : memref<1x32xf32, #tpu.memory_space<vmem>>, vector<1x32xf32>
    %108 = vector.broadcast %107 : vector<1x32xf32> to vector<49x32xf32>
    %109 = arith.addf %106, %108 : vector<49x32xf32>
    %cst_93 = arith.constant 0.000000e+00 : f32
    %110 = vector.broadcast %cst_93 : f32 to vector<49x32xf32>
    %111 = arith.maximumf %109, %110 : vector<49x32xf32>
    %c0_94 = arith.constant 0 : index
    %c0_95 = arith.constant 0 : index
    %112 = vector.load %arg8[%c0_94, %c0_95] : memref<1x128xf32, #tpu.memory_space<vmem>>, vector<1x128xf32>
    %113 = vector.extract_strided_slice %111 {offsets = [0, 0], sizes = [1, 32], strides = [1, 1]} : vector<49x32xf32> to vector<1x32xf32>
    %114 = arith.truncf %113 : vector<1x32xf32> to vector<1x32xbf16>
    %c0_96 = arith.constant 0 : index
    %c0_97 = arith.constant 0 : index
    %c0_98 = arith.constant 0 : index
    %115 = vector.load %arg7[%c0_96, %c0_97, %c0_98] : memref<49x32x128xbf16, #tpu.memory_space<vmem>>, vector<1x32x128xbf16>
    %116 = vector.shape_cast %115 : vector<1x32x128xbf16> to vector<32x128xbf16>
    %cst_99 = arith.constant dense<0.000000e+00> : vector<1x128xf32>
    %117 = tpu.matmul %114, %116, %cst_99 {dimension_numbers = #tpu.dot_dimension_numbers<[1], [0], [0], [1], [0, 0, 1, 1], [], []>} : vector<1x32xbf16>, vector<32x128xbf16>, vector<1x128xf32> -> vector<1x128xf32>
    %118 = arith.addf %112, %117 : vector<1x128xf32>
    %119 = vector.extract_strided_slice %111 {offsets = [1, 0], sizes = [1, 32], strides = [1, 1]} : vector<49x32xf32> to vector<1x32xf32>
    %120 = arith.truncf %119 : vector<1x32xf32> to vector<1x32xbf16>
    %c1_100 = arith.constant 1 : index
    %c0_101 = arith.constant 0 : index
    %c0_102 = arith.constant 0 : index
    %121 = vector.load %arg7[%c1_100, %c0_101, %c0_102] : memref<49x32x128xbf16, #tpu.memory_space<vmem>>, vector<1x32x128xbf16>
    %122 = vector.shape_cast %121 : vector<1x32x128xbf16> to vector<32x128xbf16>
    %cst_103 = arith.constant dense<0.000000e+00> : vector<1x128xf32>
    %123 = tpu.matmul %120, %122, %cst_103 {dimension_numbers = #tpu.dot_dimension_numbers<[1], [0], [0], [1], [0, 0, 1, 1], [], []>} : vector<1x32xbf16>, vector<32x128xbf16>, vector<1x128xf32> -> vector<1x128xf32>
    %124 = arith.addf %118, %123 : vector<1x128xf32>
    %125 = vector.extract_strided_slice %111 {offsets = [2, 0], sizes = [1, 32], strides = [1, 1]} : vector<49x32xf32> to vector<1x32xf32>
    %126 = arith.truncf %125 : vector<1x32xf32> to vector<1x32xbf16>
    %c2_104 = arith.constant 2 : index
    %c0_105 = arith.constant 0 : index
    %c0_106 = arith.constant 0 : index
    %127 = vector.load %arg7[%c2_104, %c0_105, %c0_106] : memref<49x32x128xbf16, #tpu.memory_space<vmem>>, vector<1x32x128xbf16>
    %128 = vector.shape_cast %127 : vector<1x32x128xbf16> to vector<32x128xbf16>
    %cst_107 = arith.constant dense<0.000000e+00> : vector<1x128xf32>
    %129 = tpu.matmul %126, %128, %cst_107 {dimension_numbers = #tpu.dot_dimension_numbers<[1], [0], [0], [1], [0, 0, 1, 1], [], []>} : vector<1x32xbf16>, vector<32x128xbf16>, vector<1x128xf32> -> vector<1x128xf32>
    %130 = arith.addf %124, %129 : vector<1x128xf32>
    %131 = vector.extract_strided_slice %111 {offsets = [3, 0], sizes = [1, 32], strides = [1, 1]} : vector<49x32xf32> to vector<1x32xf32>
    %132 = arith.truncf %131 : vector<1x32xf32> to vector<1x32xbf16>
    %c3_108 = arith.constant 3 : index
    %c0_109 = arith.constant 0 : index
    %c0_110 = arith.constant 0 : index
    %133 = vector.load %arg7[%c3_108, %c0_109, %c0_110] : memref<49x32x128xbf16, #tpu.memory_space<vmem>>, vector<1x32x128xbf16>
    %134 = vector.shape_cast %133 : vector<1x32x128xbf16> to vector<32x128xbf16>
    %cst_111 = arith.constant dense<0.000000e+00> : vector<1x128xf32>
    %135 = tpu.matmul %132, %134, %cst_111 {dimension_numbers = #tpu.dot_dimension_numbers<[1], [0], [0], [1], [0, 0, 1, 1], [], []>} : vector<1x32xbf16>, vector<32x128xbf16>, vector<1x128xf32> -> vector<1x128xf32>
    %136 = arith.addf %130, %135 : vector<1x128xf32>
    %137 = vector.extract_strided_slice %111 {offsets = [4, 0], sizes = [1, 32], strides = [1, 1]} : vector<49x32xf32> to vector<1x32xf32>
    %138 = arith.truncf %137 : vector<1x32xf32> to vector<1x32xbf16>
    %c4_112 = arith.constant 4 : index
    %c0_113 = arith.constant 0 : index
    %c0_114 = arith.constant 0 : index
    %139 = vector.load %arg7[%c4_112, %c0_113, %c0_114] : memref<49x32x128xbf16, #tpu.memory_space<vmem>>, vector<1x32x128xbf16>
    %140 = vector.shape_cast %139 : vector<1x32x128xbf16> to vector<32x128xbf16>
    %cst_115 = arith.constant dense<0.000000e+00> : vector<1x128xf32>
    %141 = tpu.matmul %138, %140, %cst_115 {dimension_numbers = #tpu.dot_dimension_numbers<[1], [0], [0], [1], [0, 0, 1, 1], [], []>} : vector<1x32xbf16>, vector<32x128xbf16>, vector<1x128xf32> -> vector<1x128xf32>
    %142 = arith.addf %136, %141 : vector<1x128xf32>
    %143 = vector.extract_strided_slice %111 {offsets = [5, 0], sizes = [1, 32], strides = [1, 1]} : vector<49x32xf32> to vector<1x32xf32>
    %144 = arith.truncf %143 : vector<1x32xf32> to vector<1x32xbf16>
    %c5_116 = arith.constant 5 : index
    %c0_117 = arith.constant 0 : index
    %c0_118 = arith.constant 0 : index
    %145 = vector.load %arg7[%c5_116, %c0_117, %c0_118] : memref<49x32x128xbf16, #tpu.memory_space<vmem>>, vector<1x32x128xbf16>
    %146 = vector.shape_cast %145 : vector<1x32x128xbf16> to vector<32x128xbf16>
    %cst_119 = arith.constant dense<0.000000e+00> : vector<1x128xf32>
    %147 = tpu.matmul %144, %146, %cst_119 {dimension_numbers = #tpu.dot_dimension_numbers<[1], [0], [0], [1], [0, 0, 1, 1], [], []>} : vector<1x32xbf16>, vector<32x128xbf16>, vector<1x128xf32> -> vector<1x128xf32>
    %148 = arith.addf %142, %147 : vector<1x128xf32>
    %149 = vector.extract_strided_slice %111 {offsets = [6, 0], sizes = [1, 32], strides = [1, 1]} : vector<49x32xf32> to vector<1x32xf32>
    %150 = arith.truncf %149 : vector<1x32xf32> to vector<1x32xbf16>
    %c6_120 = arith.constant 6 : index
    %c0_121 = arith.constant 0 : index
    %c0_122 = arith.constant 0 : index
    %151 = vector.load %arg7[%c6_120, %c0_121, %c0_122] : memref<49x32x128xbf16, #tpu.memory_space<vmem>>, vector<1x32x128xbf16>
    %152 = vector.shape_cast %151 : vector<1x32x128xbf16> to vector<32x128xbf16>
    %cst_123 = arith.constant dense<0.000000e+00> : vector<1x128xf32>
    %153 = tpu.matmul %150, %152, %cst_123 {dimension_numbers = #tpu.dot_dimension_numbers<[1], [0], [0], [1], [0, 0, 1, 1], [], []>} : vector<1x32xbf16>, vector<32x128xbf16>, vector<1x128xf32> -> vector<1x128xf32>
    %154 = arith.addf %148, %153 : vector<1x128xf32>
    %155 = vector.extract_strided_slice %111 {offsets = [7, 0], sizes = [1, 32], strides = [1, 1]} : vector<49x32xf32> to vector<1x32xf32>
    %156 = arith.truncf %155 : vector<1x32xf32> to vector<1x32xbf16>
    %c7_124 = arith.constant 7 : index
    %c0_125 = arith.constant 0 : index
    %c0_126 = arith.constant 0 : index
    %157 = vector.load %arg7[%c7_124, %c0_125, %c0_126] : memref<49x32x128xbf16, #tpu.memory_space<vmem>>, vector<1x32x128xbf16>
    %158 = vector.shape_cast %157 : vector<1x32x128xbf16> to vector<32x128xbf16>
    %cst_127 = arith.constant dense<0.000000e+00> : vector<1x128xf32>
    %159 = tpu.matmul %156, %158, %cst_127 {dimension_numbers = #tpu.dot_dimension_numbers<[1], [0], [0], [1], [0, 0, 1, 1], [], []>} : vector<1x32xbf16>, vector<32x128xbf16>, vector<1x128xf32> -> vector<1x128xf32>
    %160 = arith.addf %154, %159 : vector<1x128xf32>
    %161 = vector.extract_strided_slice %111 {offsets = [8, 0], sizes = [1, 32], strides = [1, 1]} : vector<49x32xf32> to vector<1x32xf32>
    %162 = arith.truncf %161 : vector<1x32xf32> to vector<1x32xbf16>
    %c8_128 = arith.constant 8 : index
    %c0_129 = arith.constant 0 : index
    %c0_130 = arith.constant 0 : index
    %163 = vector.load %arg7[%c8_128, %c0_129, %c0_130] : memref<49x32x128xbf16, #tpu.memory_space<vmem>>, vector<1x32x128xbf16>
    %164 = vector.shape_cast %163 : vector<1x32x128xbf16> to vector<32x128xbf16>
    %cst_131 = arith.constant dense<0.000000e+00> : vector<1x128xf32>
    %165 = tpu.matmul %162, %164, %cst_131 {dimension_numbers = #tpu.dot_dimension_numbers<[1], [0], [0], [1], [0, 0, 1, 1], [], []>} : vector<1x32xbf16>, vector<32x128xbf16>, vector<1x128xf32> -> vector<1x128xf32>
    %166 = arith.addf %160, %165 : vector<1x128xf32>
    %167 = vector.extract_strided_slice %111 {offsets = [9, 0], sizes = [1, 32], strides = [1, 1]} : vector<49x32xf32> to vector<1x32xf32>
    %168 = arith.truncf %167 : vector<1x32xf32> to vector<1x32xbf16>
    %c9 = arith.constant 9 : index
    %c0_132 = arith.constant 0 : index
    %c0_133 = arith.constant 0 : index
    %169 = vector.load %arg7[%c9, %c0_132, %c0_133] : memref<49x32x128xbf16, #tpu.memory_space<vmem>>, vector<1x32x128xbf16>
    %170 = vector.shape_cast %169 : vector<1x32x128xbf16> to vector<32x128xbf16>
    %cst_134 = arith.constant dense<0.000000e+00> : vector<1x128xf32>
    %171 = tpu.matmul %168, %170, %cst_134 {dimension_numbers = #tpu.dot_dimension_numbers<[1], [0], [0], [1], [0, 0, 1, 1], [], []>} : vector<1x32xbf16>, vector<32x128xbf16>, vector<1x128xf32> -> vector<1x128xf32>
    %172 = arith.addf %166, %171 : vector<1x128xf32>
    %173 = vector.extract_strided_slice %111 {offsets = [10, 0], sizes = [1, 32], strides = [1, 1]} : vector<49x32xf32> to vector<1x32xf32>
    %174 = arith.truncf %173 : vector<1x32xf32> to vector<1x32xbf16>
    %c10 = arith.constant 10 : index
    %c0_135 = arith.constant 0 : index
    %c0_136 = arith.constant 0 : index
    %175 = vector.load %arg7[%c10, %c0_135, %c0_136] : memref<49x32x128xbf16, #tpu.memory_space<vmem>>, vector<1x32x128xbf16>
    %176 = vector.shape_cast %175 : vector<1x32x128xbf16> to vector<32x128xbf16>
    %cst_137 = arith.constant dense<0.000000e+00> : vector<1x128xf32>
    %177 = tpu.matmul %174, %176, %cst_137 {dimension_numbers = #tpu.dot_dimension_numbers<[1], [0], [0], [1], [0, 0, 1, 1], [], []>} : vector<1x32xbf16>, vector<32x128xbf16>, vector<1x128xf32> -> vector<1x128xf32>
    %178 = arith.addf %172, %177 : vector<1x128xf32>
    %179 = vector.extract_strided_slice %111 {offsets = [11, 0], sizes = [1, 32], strides = [1, 1]} : vector<49x32xf32> to vector<1x32xf32>
    %180 = arith.truncf %179 : vector<1x32xf32> to vector<1x32xbf16>
    %c11 = arith.constant 11 : index
    %c0_138 = arith.constant 0 : index
    %c0_139 = arith.constant 0 : index
    %181 = vector.load %arg7[%c11, %c0_138, %c0_139] : memref<49x32x128xbf16, #tpu.memory_space<vmem>>, vector<1x32x128xbf16>
    %182 = vector.shape_cast %181 : vector<1x32x128xbf16> to vector<32x128xbf16>
    %cst_140 = arith.constant dense<0.000000e+00> : vector<1x128xf32>
    %183 = tpu.matmul %180, %182, %cst_140 {dimension_numbers = #tpu.dot_dimension_numbers<[1], [0], [0], [1], [0, 0, 1, 1], [], []>} : vector<1x32xbf16>, vector<32x128xbf16>, vector<1x128xf32> -> vector<1x128xf32>
    %184 = arith.addf %178, %183 : vector<1x128xf32>
    %185 = vector.extract_strided_slice %111 {offsets = [12, 0], sizes = [1, 32], strides = [1, 1]} : vector<49x32xf32> to vector<1x32xf32>
    %186 = arith.truncf %185 : vector<1x32xf32> to vector<1x32xbf16>
    %c12 = arith.constant 12 : index
    %c0_141 = arith.constant 0 : index
    %c0_142 = arith.constant 0 : index
    %187 = vector.load %arg7[%c12, %c0_141, %c0_142] : memref<49x32x128xbf16, #tpu.memory_space<vmem>>, vector<1x32x128xbf16>
    %188 = vector.shape_cast %187 : vector<1x32x128xbf16> to vector<32x128xbf16>
    %cst_143 = arith.constant dense<0.000000e+00> : vector<1x128xf32>
    %189 = tpu.matmul %186, %188, %cst_143 {dimension_numbers = #tpu.dot_dimension_numbers<[1], [0], [0], [1], [0, 0, 1, 1], [], []>} : vector<1x32xbf16>, vector<32x128xbf16>, vector<1x128xf32> -> vector<1x128xf32>
    %190 = arith.addf %184, %189 : vector<1x128xf32>
    %191 = vector.extract_strided_slice %111 {offsets = [13, 0], sizes = [1, 32], strides = [1, 1]} : vector<49x32xf32> to vector<1x32xf32>
    %192 = arith.truncf %191 : vector<1x32xf32> to vector<1x32xbf16>
    %c13 = arith.constant 13 : index
    %c0_144 = arith.constant 0 : index
    %c0_145 = arith.constant 0 : index
    %193 = vector.load %arg7[%c13, %c0_144, %c0_145] : memref<49x32x128xbf16, #tpu.memory_space<vmem>>, vector<1x32x128xbf16>
    %194 = vector.shape_cast %193 : vector<1x32x128xbf16> to vector<32x128xbf16>
    %cst_146 = arith.constant dense<0.000000e+00> : vector<1x128xf32>
    %195 = tpu.matmul %192, %194, %cst_146 {dimension_numbers = #tpu.dot_dimension_numbers<[1], [0], [0], [1], [0, 0, 1, 1], [], []>} : vector<1x32xbf16>, vector<32x128xbf16>, vector<1x128xf32> -> vector<1x128xf32>
    %196 = arith.addf %190, %195 : vector<1x128xf32>
    %197 = vector.extract_strided_slice %111 {offsets = [14, 0], sizes = [1, 32], strides = [1, 1]} : vector<49x32xf32> to vector<1x32xf32>
    %198 = arith.truncf %197 : vector<1x32xf32> to vector<1x32xbf16>
    %c14 = arith.constant 14 : index
    %c0_147 = arith.constant 0 : index
    %c0_148 = arith.constant 0 : index
    %199 = vector.load %arg7[%c14, %c0_147, %c0_148] : memref<49x32x128xbf16, #tpu.memory_space<vmem>>, vector<1x32x128xbf16>
    %200 = vector.shape_cast %199 : vector<1x32x128xbf16> to vector<32x128xbf16>
    %cst_149 = arith.constant dense<0.000000e+00> : vector<1x128xf32>
    %201 = tpu.matmul %198, %200, %cst_149 {dimension_numbers = #tpu.dot_dimension_numbers<[1], [0], [0], [1], [0, 0, 1, 1], [], []>} : vector<1x32xbf16>, vector<32x128xbf16>, vector<1x128xf32> -> vector<1x128xf32>
    %202 = arith.addf %196, %201 : vector<1x128xf32>
    %203 = vector.extract_strided_slice %111 {offsets = [15, 0], sizes = [1, 32], strides = [1, 1]} : vector<49x32xf32> to vector<1x32xf32>
    %204 = arith.truncf %203 : vector<1x32xf32> to vector<1x32xbf16>
    %c15 = arith.constant 15 : index
    %c0_150 = arith.constant 0 : index
    %c0_151 = arith.constant 0 : index
    %205 = vector.load %arg7[%c15, %c0_150, %c0_151] : memref<49x32x128xbf16, #tpu.memory_space<vmem>>, vector<1x32x128xbf16>
    %206 = vector.shape_cast %205 : vector<1x32x128xbf16> to vector<32x128xbf16>
    %cst_152 = arith.constant dense<0.000000e+00> : vector<1x128xf32>
    %207 = tpu.matmul %204, %206, %cst_152 {dimension_numbers = #tpu.dot_dimension_numbers<[1], [0], [0], [1], [0, 0, 1, 1], [], []>} : vector<1x32xbf16>, vector<32x128xbf16>, vector<1x128xf32> -> vector<1x128xf32>
    %208 = arith.addf %202, %207 : vector<1x128xf32>
    %209 = vector.extract_strided_slice %111 {offsets = [16, 0], sizes = [1, 32], strides = [1, 1]} : vector<49x32xf32> to vector<1x32xf32>
    %210 = arith.truncf %209 : vector<1x32xf32> to vector<1x32xbf16>
    %c16 = arith.constant 16 : index
    %c0_153 = arith.constant 0 : index
    %c0_154 = arith.constant 0 : index
    %211 = vector.load %arg7[%c16, %c0_153, %c0_154] : memref<49x32x128xbf16, #tpu.memory_space<vmem>>, vector<1x32x128xbf16>
    %212 = vector.shape_cast %211 : vector<1x32x128xbf16> to vector<32x128xbf16>
    %cst_155 = arith.constant dense<0.000000e+00> : vector<1x128xf32>
    %213 = tpu.matmul %210, %212, %cst_155 {dimension_numbers = #tpu.dot_dimension_numbers<[1], [0], [0], [1], [0, 0, 1, 1], [], []>} : vector<1x32xbf16>, vector<32x128xbf16>, vector<1x128xf32> -> vector<1x128xf32>
    %214 = arith.addf %208, %213 : vector<1x128xf32>
    %215 = vector.extract_strided_slice %111 {offsets = [17, 0], sizes = [1, 32], strides = [1, 1]} : vector<49x32xf32> to vector<1x32xf32>
    %216 = arith.truncf %215 : vector<1x32xf32> to vector<1x32xbf16>
    %c17 = arith.constant 17 : index
    %c0_156 = arith.constant 0 : index
    %c0_157 = arith.constant 0 : index
    %217 = vector.load %arg7[%c17, %c0_156, %c0_157] : memref<49x32x128xbf16, #tpu.memory_space<vmem>>, vector<1x32x128xbf16>
    %218 = vector.shape_cast %217 : vector<1x32x128xbf16> to vector<32x128xbf16>
    %cst_158 = arith.constant dense<0.000000e+00> : vector<1x128xf32>
    %219 = tpu.matmul %216, %218, %cst_158 {dimension_numbers = #tpu.dot_dimension_numbers<[1], [0], [0], [1], [0, 0, 1, 1], [], []>} : vector<1x32xbf16>, vector<32x128xbf16>, vector<1x128xf32> -> vector<1x128xf32>
    %220 = arith.addf %214, %219 : vector<1x128xf32>
    %221 = vector.extract_strided_slice %111 {offsets = [18, 0], sizes = [1, 32], strides = [1, 1]} : vector<49x32xf32> to vector<1x32xf32>
    %222 = arith.truncf %221 : vector<1x32xf32> to vector<1x32xbf16>
    %c18 = arith.constant 18 : index
    %c0_159 = arith.constant 0 : index
    %c0_160 = arith.constant 0 : index
    %223 = vector.load %arg7[%c18, %c0_159, %c0_160] : memref<49x32x128xbf16, #tpu.memory_space<vmem>>, vector<1x32x128xbf16>
    %224 = vector.shape_cast %223 : vector<1x32x128xbf16> to vector<32x128xbf16>
    %cst_161 = arith.constant dense<0.000000e+00> : vector<1x128xf32>
    %225 = tpu.matmul %222, %224, %cst_161 {dimension_numbers = #tpu.dot_dimension_numbers<[1], [0], [0], [1], [0, 0, 1, 1], [], []>} : vector<1x32xbf16>, vector<32x128xbf16>, vector<1x128xf32> -> vector<1x128xf32>
    %226 = arith.addf %220, %225 : vector<1x128xf32>
    %227 = vector.extract_strided_slice %111 {offsets = [19, 0], sizes = [1, 32], strides = [1, 1]} : vector<49x32xf32> to vector<1x32xf32>
    %228 = arith.truncf %227 : vector<1x32xf32> to vector<1x32xbf16>
    %c19 = arith.constant 19 : index
    %c0_162 = arith.constant 0 : index
    %c0_163 = arith.constant 0 : index
    %229 = vector.load %arg7[%c19, %c0_162, %c0_163] : memref<49x32x128xbf16, #tpu.memory_space<vmem>>, vector<1x32x128xbf16>
    %230 = vector.shape_cast %229 : vector<1x32x128xbf16> to vector<32x128xbf16>
    %cst_164 = arith.constant dense<0.000000e+00> : vector<1x128xf32>
    %231 = tpu.matmul %228, %230, %cst_164 {dimension_numbers = #tpu.dot_dimension_numbers<[1], [0], [0], [1], [0, 0, 1, 1], [], []>} : vector<1x32xbf16>, vector<32x128xbf16>, vector<1x128xf32> -> vector<1x128xf32>
    %232 = arith.addf %226, %231 : vector<1x128xf32>
    %233 = vector.extract_strided_slice %111 {offsets = [20, 0], sizes = [1, 32], strides = [1, 1]} : vector<49x32xf32> to vector<1x32xf32>
    %234 = arith.truncf %233 : vector<1x32xf32> to vector<1x32xbf16>
    %c20 = arith.constant 20 : index
    %c0_165 = arith.constant 0 : index
    %c0_166 = arith.constant 0 : index
    %235 = vector.load %arg7[%c20, %c0_165, %c0_166] : memref<49x32x128xbf16, #tpu.memory_space<vmem>>, vector<1x32x128xbf16>
    %236 = vector.shape_cast %235 : vector<1x32x128xbf16> to vector<32x128xbf16>
    %cst_167 = arith.constant dense<0.000000e+00> : vector<1x128xf32>
    %237 = tpu.matmul %234, %236, %cst_167 {dimension_numbers = #tpu.dot_dimension_numbers<[1], [0], [0], [1], [0, 0, 1, 1], [], []>} : vector<1x32xbf16>, vector<32x128xbf16>, vector<1x128xf32> -> vector<1x128xf32>
    %238 = arith.addf %232, %237 : vector<1x128xf32>
    %239 = vector.extract_strided_slice %111 {offsets = [21, 0], sizes = [1, 32], strides = [1, 1]} : vector<49x32xf32> to vector<1x32xf32>
    %240 = arith.truncf %239 : vector<1x32xf32> to vector<1x32xbf16>
    %c21 = arith.constant 21 : index
    %c0_168 = arith.constant 0 : index
    %c0_169 = arith.constant 0 : index
    %241 = vector.load %arg7[%c21, %c0_168, %c0_169] : memref<49x32x128xbf16, #tpu.memory_space<vmem>>, vector<1x32x128xbf16>
    %242 = vector.shape_cast %241 : vector<1x32x128xbf16> to vector<32x128xbf16>
    %cst_170 = arith.constant dense<0.000000e+00> : vector<1x128xf32>
    %243 = tpu.matmul %240, %242, %cst_170 {dimension_numbers = #tpu.dot_dimension_numbers<[1], [0], [0], [1], [0, 0, 1, 1], [], []>} : vector<1x32xbf16>, vector<32x128xbf16>, vector<1x128xf32> -> vector<1x128xf32>
    %244 = arith.addf %238, %243 : vector<1x128xf32>
    %245 = vector.extract_strided_slice %111 {offsets = [22, 0], sizes = [1, 32], strides = [1, 1]} : vector<49x32xf32> to vector<1x32xf32>
    %246 = arith.truncf %245 : vector<1x32xf32> to vector<1x32xbf16>
    %c22 = arith.constant 22 : index
    %c0_171 = arith.constant 0 : index
    %c0_172 = arith.constant 0 : index
    %247 = vector.load %arg7[%c22, %c0_171, %c0_172] : memref<49x32x128xbf16, #tpu.memory_space<vmem>>, vector<1x32x128xbf16>
    %248 = vector.shape_cast %247 : vector<1x32x128xbf16> to vector<32x128xbf16>
    %cst_173 = arith.constant dense<0.000000e+00> : vector<1x128xf32>
    %249 = tpu.matmul %246, %248, %cst_173 {dimension_numbers = #tpu.dot_dimension_numbers<[1], [0], [0], [1], [0, 0, 1, 1], [], []>} : vector<1x32xbf16>, vector<32x128xbf16>, vector<1x128xf32> -> vector<1x128xf32>
    %250 = arith.addf %244, %249 : vector<1x128xf32>
    %251 = vector.extract_strided_slice %111 {offsets = [23, 0], sizes = [1, 32], strides = [1, 1]} : vector<49x32xf32> to vector<1x32xf32>
    %252 = arith.truncf %251 : vector<1x32xf32> to vector<1x32xbf16>
    %c23 = arith.constant 23 : index
    %c0_174 = arith.constant 0 : index
    %c0_175 = arith.constant 0 : index
    %253 = vector.load %arg7[%c23, %c0_174, %c0_175] : memref<49x32x128xbf16, #tpu.memory_space<vmem>>, vector<1x32x128xbf16>
    %254 = vector.shape_cast %253 : vector<1x32x128xbf16> to vector<32x128xbf16>
    %cst_176 = arith.constant dense<0.000000e+00> : vector<1x128xf32>
    %255 = tpu.matmul %252, %254, %cst_176 {dimension_numbers = #tpu.dot_dimension_numbers<[1], [0], [0], [1], [0, 0, 1, 1], [], []>} : vector<1x32xbf16>, vector<32x128xbf16>, vector<1x128xf32> -> vector<1x128xf32>
    %256 = arith.addf %250, %255 : vector<1x128xf32>
    %257 = vector.extract_strided_slice %111 {offsets = [24, 0], sizes = [1, 32], strides = [1, 1]} : vector<49x32xf32> to vector<1x32xf32>
    %258 = arith.truncf %257 : vector<1x32xf32> to vector<1x32xbf16>
    %c24 = arith.constant 24 : index
    %c0_177 = arith.constant 0 : index
    %c0_178 = arith.constant 0 : index
    %259 = vector.load %arg7[%c24, %c0_177, %c0_178] : memref<49x32x128xbf16, #tpu.memory_space<vmem>>, vector<1x32x128xbf16>
    %260 = vector.shape_cast %259 : vector<1x32x128xbf16> to vector<32x128xbf16>
    %cst_179 = arith.constant dense<0.000000e+00> : vector<1x128xf32>
    %261 = tpu.matmul %258, %260, %cst_179 {dimension_numbers = #tpu.dot_dimension_numbers<[1], [0], [0], [1], [0, 0, 1, 1], [], []>} : vector<1x32xbf16>, vector<32x128xbf16>, vector<1x128xf32> -> vector<1x128xf32>
    %262 = arith.addf %256, %261 : vector<1x128xf32>
    %263 = vector.extract_strided_slice %111 {offsets = [25, 0], sizes = [1, 32], strides = [1, 1]} : vector<49x32xf32> to vector<1x32xf32>
    %264 = arith.truncf %263 : vector<1x32xf32> to vector<1x32xbf16>
    %c25 = arith.constant 25 : index
    %c0_180 = arith.constant 0 : index
    %c0_181 = arith.constant 0 : index
    %265 = vector.load %arg7[%c25, %c0_180, %c0_181] : memref<49x32x128xbf16, #tpu.memory_space<vmem>>, vector<1x32x128xbf16>
    %266 = vector.shape_cast %265 : vector<1x32x128xbf16> to vector<32x128xbf16>
    %cst_182 = arith.constant dense<0.000000e+00> : vector<1x128xf32>
    %267 = tpu.matmul %264, %266, %cst_182 {dimension_numbers = #tpu.dot_dimension_numbers<[1], [0], [0], [1], [0, 0, 1, 1], [], []>} : vector<1x32xbf16>, vector<32x128xbf16>, vector<1x128xf32> -> vector<1x128xf32>
    %268 = arith.addf %262, %267 : vector<1x128xf32>
    %269 = vector.extract_strided_slice %111 {offsets = [26, 0], sizes = [1, 32], strides = [1, 1]} : vector<49x32xf32> to vector<1x32xf32>
    %270 = arith.truncf %269 : vector<1x32xf32> to vector<1x32xbf16>
    %c26 = arith.constant 26 : index
    %c0_183 = arith.constant 0 : index
    %c0_184 = arith.constant 0 : index
    %271 = vector.load %arg7[%c26, %c0_183, %c0_184] : memref<49x32x128xbf16, #tpu.memory_space<vmem>>, vector<1x32x128xbf16>
    %272 = vector.shape_cast %271 : vector<1x32x128xbf16> to vector<32x128xbf16>
    %cst_185 = arith.constant dense<0.000000e+00> : vector<1x128xf32>
    %273 = tpu.matmul %270, %272, %cst_185 {dimension_numbers = #tpu.dot_dimension_numbers<[1], [0], [0], [1], [0, 0, 1, 1], [], []>} : vector<1x32xbf16>, vector<32x128xbf16>, vector<1x128xf32> -> vector<1x128xf32>
    %274 = arith.addf %268, %273 : vector<1x128xf32>
    %275 = vector.extract_strided_slice %111 {offsets = [27, 0], sizes = [1, 32], strides = [1, 1]} : vector<49x32xf32> to vector<1x32xf32>
    %276 = arith.truncf %275 : vector<1x32xf32> to vector<1x32xbf16>
    %c27 = arith.constant 27 : index
    %c0_186 = arith.constant 0 : index
    %c0_187 = arith.constant 0 : index
    %277 = vector.load %arg7[%c27, %c0_186, %c0_187] : memref<49x32x128xbf16, #tpu.memory_space<vmem>>, vector<1x32x128xbf16>
    %278 = vector.shape_cast %277 : vector<1x32x128xbf16> to vector<32x128xbf16>
    %cst_188 = arith.constant dense<0.000000e+00> : vector<1x128xf32>
    %279 = tpu.matmul %276, %278, %cst_188 {dimension_numbers = #tpu.dot_dimension_numbers<[1], [0], [0], [1], [0, 0, 1, 1], [], []>} : vector<1x32xbf16>, vector<32x128xbf16>, vector<1x128xf32> -> vector<1x128xf32>
    %280 = arith.addf %274, %279 : vector<1x128xf32>
    %281 = vector.extract_strided_slice %111 {offsets = [28, 0], sizes = [1, 32], strides = [1, 1]} : vector<49x32xf32> to vector<1x32xf32>
    %282 = arith.truncf %281 : vector<1x32xf32> to vector<1x32xbf16>
    %c28 = arith.constant 28 : index
    %c0_189 = arith.constant 0 : index
    %c0_190 = arith.constant 0 : index
    %283 = vector.load %arg7[%c28, %c0_189, %c0_190] : memref<49x32x128xbf16, #tpu.memory_space<vmem>>, vector<1x32x128xbf16>
    %284 = vector.shape_cast %283 : vector<1x32x128xbf16> to vector<32x128xbf16>
    %cst_191 = arith.constant dense<0.000000e+00> : vector<1x128xf32>
    %285 = tpu.matmul %282, %284, %cst_191 {dimension_numbers = #tpu.dot_dimension_numbers<[1], [0], [0], [1], [0, 0, 1, 1], [], []>} : vector<1x32xbf16>, vector<32x128xbf16>, vector<1x128xf32> -> vector<1x128xf32>
    %286 = arith.addf %280, %285 : vector<1x128xf32>
    %287 = vector.extract_strided_slice %111 {offsets = [29, 0], sizes = [1, 32], strides = [1, 1]} : vector<49x32xf32> to vector<1x32xf32>
    %288 = arith.truncf %287 : vector<1x32xf32> to vector<1x32xbf16>
    %c29 = arith.constant 29 : index
    %c0_192 = arith.constant 0 : index
    %c0_193 = arith.constant 0 : index
    %289 = vector.load %arg7[%c29, %c0_192, %c0_193] : memref<49x32x128xbf16, #tpu.memory_space<vmem>>, vector<1x32x128xbf16>
    %290 = vector.shape_cast %289 : vector<1x32x128xbf16> to vector<32x128xbf16>
    %cst_194 = arith.constant dense<0.000000e+00> : vector<1x128xf32>
    %291 = tpu.matmul %288, %290, %cst_194 {dimension_numbers = #tpu.dot_dimension_numbers<[1], [0], [0], [1], [0, 0, 1, 1], [], []>} : vector<1x32xbf16>, vector<32x128xbf16>, vector<1x128xf32> -> vector<1x128xf32>
    %292 = arith.addf %286, %291 : vector<1x128xf32>
    %293 = vector.extract_strided_slice %111 {offsets = [30, 0], sizes = [1, 32], strides = [1, 1]} : vector<49x32xf32> to vector<1x32xf32>
    %294 = arith.truncf %293 : vector<1x32xf32> to vector<1x32xbf16>
    %c30 = arith.constant 30 : index
    %c0_195 = arith.constant 0 : index
    %c0_196 = arith.constant 0 : index
    %295 = vector.load %arg7[%c30, %c0_195, %c0_196] : memref<49x32x128xbf16, #tpu.memory_space<vmem>>, vector<1x32x128xbf16>
    %296 = vector.shape_cast %295 : vector<1x32x128xbf16> to vector<32x128xbf16>
    %cst_197 = arith.constant dense<0.000000e+00> : vector<1x128xf32>
    %297 = tpu.matmul %294, %296, %cst_197 {dimension_numbers = #tpu.dot_dimension_numbers<[1], [0], [0], [1], [0, 0, 1, 1], [], []>} : vector<1x32xbf16>, vector<32x128xbf16>, vector<1x128xf32> -> vector<1x128xf32>
    %298 = arith.addf %292, %297 : vector<1x128xf32>
    %299 = vector.extract_strided_slice %111 {offsets = [31, 0], sizes = [1, 32], strides = [1, 1]} : vector<49x32xf32> to vector<1x32xf32>
    %300 = arith.truncf %299 : vector<1x32xf32> to vector<1x32xbf16>
    %c31 = arith.constant 31 : index
    %c0_198 = arith.constant 0 : index
    %c0_199 = arith.constant 0 : index
    %301 = vector.load %arg7[%c31, %c0_198, %c0_199] : memref<49x32x128xbf16, #tpu.memory_space<vmem>>, vector<1x32x128xbf16>
    %302 = vector.shape_cast %301 : vector<1x32x128xbf16> to vector<32x128xbf16>
    %cst_200 = arith.constant dense<0.000000e+00> : vector<1x128xf32>
    %303 = tpu.matmul %300, %302, %cst_200 {dimension_numbers = #tpu.dot_dimension_numbers<[1], [0], [0], [1], [0, 0, 1, 1], [], []>} : vector<1x32xbf16>, vector<32x128xbf16>, vector<1x128xf32> -> vector<1x128xf32>
    %304 = arith.addf %298, %303 : vector<1x128xf32>
    %305 = vector.extract_strided_slice %111 {offsets = [32, 0], sizes = [1, 32], strides = [1, 1]} : vector<49x32xf32> to vector<1x32xf32>
    %306 = arith.truncf %305 : vector<1x32xf32> to vector<1x32xbf16>
    %c32 = arith.constant 32 : index
    %c0_201 = arith.constant 0 : index
    %c0_202 = arith.constant 0 : index
    %307 = vector.load %arg7[%c32, %c0_201, %c0_202] : memref<49x32x128xbf16, #tpu.memory_space<vmem>>, vector<1x32x128xbf16>
    %308 = vector.shape_cast %307 : vector<1x32x128xbf16> to vector<32x128xbf16>
    %cst_203 = arith.constant dense<0.000000e+00> : vector<1x128xf32>
    %309 = tpu.matmul %306, %308, %cst_203 {dimension_numbers = #tpu.dot_dimension_numbers<[1], [0], [0], [1], [0, 0, 1, 1], [], []>} : vector<1x32xbf16>, vector<32x128xbf16>, vector<1x128xf32> -> vector<1x128xf32>
    %310 = arith.addf %304, %309 : vector<1x128xf32>
    %311 = vector.extract_strided_slice %111 {offsets = [33, 0], sizes = [1, 32], strides = [1, 1]} : vector<49x32xf32> to vector<1x32xf32>
    %312 = arith.truncf %311 : vector<1x32xf32> to vector<1x32xbf16>
    %c33 = arith.constant 33 : index
    %c0_204 = arith.constant 0 : index
    %c0_205 = arith.constant 0 : index
    %313 = vector.load %arg7[%c33, %c0_204, %c0_205] : memref<49x32x128xbf16, #tpu.memory_space<vmem>>, vector<1x32x128xbf16>
    %314 = vector.shape_cast %313 : vector<1x32x128xbf16> to vector<32x128xbf16>
    %cst_206 = arith.constant dense<0.000000e+00> : vector<1x128xf32>
    %315 = tpu.matmul %312, %314, %cst_206 {dimension_numbers = #tpu.dot_dimension_numbers<[1], [0], [0], [1], [0, 0, 1, 1], [], []>} : vector<1x32xbf16>, vector<32x128xbf16>, vector<1x128xf32> -> vector<1x128xf32>
    %316 = arith.addf %310, %315 : vector<1x128xf32>
    %317 = vector.extract_strided_slice %111 {offsets = [34, 0], sizes = [1, 32], strides = [1, 1]} : vector<49x32xf32> to vector<1x32xf32>
    %318 = arith.truncf %317 : vector<1x32xf32> to vector<1x32xbf16>
    %c34 = arith.constant 34 : index
    %c0_207 = arith.constant 0 : index
    %c0_208 = arith.constant 0 : index
    %319 = vector.load %arg7[%c34, %c0_207, %c0_208] : memref<49x32x128xbf16, #tpu.memory_space<vmem>>, vector<1x32x128xbf16>
    %320 = vector.shape_cast %319 : vector<1x32x128xbf16> to vector<32x128xbf16>
    %cst_209 = arith.constant dense<0.000000e+00> : vector<1x128xf32>
    %321 = tpu.matmul %318, %320, %cst_209 {dimension_numbers = #tpu.dot_dimension_numbers<[1], [0], [0], [1], [0, 0, 1, 1], [], []>} : vector<1x32xbf16>, vector<32x128xbf16>, vector<1x128xf32> -> vector<1x128xf32>
    %322 = arith.addf %316, %321 : vector<1x128xf32>
    %323 = vector.extract_strided_slice %111 {offsets = [35, 0], sizes = [1, 32], strides = [1, 1]} : vector<49x32xf32> to vector<1x32xf32>
    %324 = arith.truncf %323 : vector<1x32xf32> to vector<1x32xbf16>
    %c35 = arith.constant 35 : index
    %c0_210 = arith.constant 0 : index
    %c0_211 = arith.constant 0 : index
    %325 = vector.load %arg7[%c35, %c0_210, %c0_211] : memref<49x32x128xbf16, #tpu.memory_space<vmem>>, vector<1x32x128xbf16>
    %326 = vector.shape_cast %325 : vector<1x32x128xbf16> to vector<32x128xbf16>
    %cst_212 = arith.constant dense<0.000000e+00> : vector<1x128xf32>
    %327 = tpu.matmul %324, %326, %cst_212 {dimension_numbers = #tpu.dot_dimension_numbers<[1], [0], [0], [1], [0, 0, 1, 1], [], []>} : vector<1x32xbf16>, vector<32x128xbf16>, vector<1x128xf32> -> vector<1x128xf32>
    %328 = arith.addf %322, %327 : vector<1x128xf32>
    %329 = vector.extract_strided_slice %111 {offsets = [36, 0], sizes = [1, 32], strides = [1, 1]} : vector<49x32xf32> to vector<1x32xf32>
    %330 = arith.truncf %329 : vector<1x32xf32> to vector<1x32xbf16>
    %c36 = arith.constant 36 : index
    %c0_213 = arith.constant 0 : index
    %c0_214 = arith.constant 0 : index
    %331 = vector.load %arg7[%c36, %c0_213, %c0_214] : memref<49x32x128xbf16, #tpu.memory_space<vmem>>, vector<1x32x128xbf16>
    %332 = vector.shape_cast %331 : vector<1x32x128xbf16> to vector<32x128xbf16>
    %cst_215 = arith.constant dense<0.000000e+00> : vector<1x128xf32>
    %333 = tpu.matmul %330, %332, %cst_215 {dimension_numbers = #tpu.dot_dimension_numbers<[1], [0], [0], [1], [0, 0, 1, 1], [], []>} : vector<1x32xbf16>, vector<32x128xbf16>, vector<1x128xf32> -> vector<1x128xf32>
    %334 = arith.addf %328, %333 : vector<1x128xf32>
    %335 = vector.extract_strided_slice %111 {offsets = [37, 0], sizes = [1, 32], strides = [1, 1]} : vector<49x32xf32> to vector<1x32xf32>
    %336 = arith.truncf %335 : vector<1x32xf32> to vector<1x32xbf16>
    %c37 = arith.constant 37 : index
    %c0_216 = arith.constant 0 : index
    %c0_217 = arith.constant 0 : index
    %337 = vector.load %arg7[%c37, %c0_216, %c0_217] : memref<49x32x128xbf16, #tpu.memory_space<vmem>>, vector<1x32x128xbf16>
    %338 = vector.shape_cast %337 : vector<1x32x128xbf16> to vector<32x128xbf16>
    %cst_218 = arith.constant dense<0.000000e+00> : vector<1x128xf32>
    %339 = tpu.matmul %336, %338, %cst_218 {dimension_numbers = #tpu.dot_dimension_numbers<[1], [0], [0], [1], [0, 0, 1, 1], [], []>} : vector<1x32xbf16>, vector<32x128xbf16>, vector<1x128xf32> -> vector<1x128xf32>
    %340 = arith.addf %334, %339 : vector<1x128xf32>
    %341 = vector.extract_strided_slice %111 {offsets = [38, 0], sizes = [1, 32], strides = [1, 1]} : vector<49x32xf32> to vector<1x32xf32>
    %342 = arith.truncf %341 : vector<1x32xf32> to vector<1x32xbf16>
    %c38 = arith.constant 38 : index
    %c0_219 = arith.constant 0 : index
    %c0_220 = arith.constant 0 : index
    %343 = vector.load %arg7[%c38, %c0_219, %c0_220] : memref<49x32x128xbf16, #tpu.memory_space<vmem>>, vector<1x32x128xbf16>
    %344 = vector.shape_cast %343 : vector<1x32x128xbf16> to vector<32x128xbf16>
    %cst_221 = arith.constant dense<0.000000e+00> : vector<1x128xf32>
    %345 = tpu.matmul %342, %344, %cst_221 {dimension_numbers = #tpu.dot_dimension_numbers<[1], [0], [0], [1], [0, 0, 1, 1], [], []>} : vector<1x32xbf16>, vector<32x128xbf16>, vector<1x128xf32> -> vector<1x128xf32>
    %346 = arith.addf %340, %345 : vector<1x128xf32>
    %347 = vector.extract_strided_slice %111 {offsets = [39, 0], sizes = [1, 32], strides = [1, 1]} : vector<49x32xf32> to vector<1x32xf32>
    %348 = arith.truncf %347 : vector<1x32xf32> to vector<1x32xbf16>
    %c39 = arith.constant 39 : index
    %c0_222 = arith.constant 0 : index
    %c0_223 = arith.constant 0 : index
    %349 = vector.load %arg7[%c39, %c0_222, %c0_223] : memref<49x32x128xbf16, #tpu.memory_space<vmem>>, vector<1x32x128xbf16>
    %350 = vector.shape_cast %349 : vector<1x32x128xbf16> to vector<32x128xbf16>
    %cst_224 = arith.constant dense<0.000000e+00> : vector<1x128xf32>
    %351 = tpu.matmul %348, %350, %cst_224 {dimension_numbers = #tpu.dot_dimension_numbers<[1], [0], [0], [1], [0, 0, 1, 1], [], []>} : vector<1x32xbf16>, vector<32x128xbf16>, vector<1x128xf32> -> vector<1x128xf32>
    %352 = arith.addf %346, %351 : vector<1x128xf32>
    %353 = vector.extract_strided_slice %111 {offsets = [40, 0], sizes = [1, 32], strides = [1, 1]} : vector<49x32xf32> to vector<1x32xf32>
    %354 = arith.truncf %353 : vector<1x32xf32> to vector<1x32xbf16>
    %c40 = arith.constant 40 : index
    %c0_225 = arith.constant 0 : index
    %c0_226 = arith.constant 0 : index
    %355 = vector.load %arg7[%c40, %c0_225, %c0_226] : memref<49x32x128xbf16, #tpu.memory_space<vmem>>, vector<1x32x128xbf16>
    %356 = vector.shape_cast %355 : vector<1x32x128xbf16> to vector<32x128xbf16>
    %cst_227 = arith.constant dense<0.000000e+00> : vector<1x128xf32>
    %357 = tpu.matmul %354, %356, %cst_227 {dimension_numbers = #tpu.dot_dimension_numbers<[1], [0], [0], [1], [0, 0, 1, 1], [], []>} : vector<1x32xbf16>, vector<32x128xbf16>, vector<1x128xf32> -> vector<1x128xf32>
    %358 = arith.addf %352, %357 : vector<1x128xf32>
    %359 = vector.extract_strided_slice %111 {offsets = [41, 0], sizes = [1, 32], strides = [1, 1]} : vector<49x32xf32> to vector<1x32xf32>
    %360 = arith.truncf %359 : vector<1x32xf32> to vector<1x32xbf16>
    %c41 = arith.constant 41 : index
    %c0_228 = arith.constant 0 : index
    %c0_229 = arith.constant 0 : index
    %361 = vector.load %arg7[%c41, %c0_228, %c0_229] : memref<49x32x128xbf16, #tpu.memory_space<vmem>>, vector<1x32x128xbf16>
    %362 = vector.shape_cast %361 : vector<1x32x128xbf16> to vector<32x128xbf16>
    %cst_230 = arith.constant dense<0.000000e+00> : vector<1x128xf32>
    %363 = tpu.matmul %360, %362, %cst_230 {dimension_numbers = #tpu.dot_dimension_numbers<[1], [0], [0], [1], [0, 0, 1, 1], [], []>} : vector<1x32xbf16>, vector<32x128xbf16>, vector<1x128xf32> -> vector<1x128xf32>
    %364 = arith.addf %358, %363 : vector<1x128xf32>
    %365 = vector.extract_strided_slice %111 {offsets = [42, 0], sizes = [1, 32], strides = [1, 1]} : vector<49x32xf32> to vector<1x32xf32>
    %366 = arith.truncf %365 : vector<1x32xf32> to vector<1x32xbf16>
    %c42 = arith.constant 42 : index
    %c0_231 = arith.constant 0 : index
    %c0_232 = arith.constant 0 : index
    %367 = vector.load %arg7[%c42, %c0_231, %c0_232] : memref<49x32x128xbf16, #tpu.memory_space<vmem>>, vector<1x32x128xbf16>
    %368 = vector.shape_cast %367 : vector<1x32x128xbf16> to vector<32x128xbf16>
    %cst_233 = arith.constant dense<0.000000e+00> : vector<1x128xf32>
    %369 = tpu.matmul %366, %368, %cst_233 {dimension_numbers = #tpu.dot_dimension_numbers<[1], [0], [0], [1], [0, 0, 1, 1], [], []>} : vector<1x32xbf16>, vector<32x128xbf16>, vector<1x128xf32> -> vector<1x128xf32>
    %370 = arith.addf %364, %369 : vector<1x128xf32>
    %371 = vector.extract_strided_slice %111 {offsets = [43, 0], sizes = [1, 32], strides = [1, 1]} : vector<49x32xf32> to vector<1x32xf32>
    %372 = arith.truncf %371 : vector<1x32xf32> to vector<1x32xbf16>
    %c43 = arith.constant 43 : index
    %c0_234 = arith.constant 0 : index
    %c0_235 = arith.constant 0 : index
    %373 = vector.load %arg7[%c43, %c0_234, %c0_235] : memref<49x32x128xbf16, #tpu.memory_space<vmem>>, vector<1x32x128xbf16>
    %374 = vector.shape_cast %373 : vector<1x32x128xbf16> to vector<32x128xbf16>
    %cst_236 = arith.constant dense<0.000000e+00> : vector<1x128xf32>
    %375 = tpu.matmul %372, %374, %cst_236 {dimension_numbers = #tpu.dot_dimension_numbers<[1], [0], [0], [1], [0, 0, 1, 1], [], []>} : vector<1x32xbf16>, vector<32x128xbf16>, vector<1x128xf32> -> vector<1x128xf32>
    %376 = arith.addf %370, %375 : vector<1x128xf32>
    %377 = vector.extract_strided_slice %111 {offsets = [44, 0], sizes = [1, 32], strides = [1, 1]} : vector<49x32xf32> to vector<1x32xf32>
    %378 = arith.truncf %377 : vector<1x32xf32> to vector<1x32xbf16>
    %c44 = arith.constant 44 : index
    %c0_237 = arith.constant 0 : index
    %c0_238 = arith.constant 0 : index
    %379 = vector.load %arg7[%c44, %c0_237, %c0_238] : memref<49x32x128xbf16, #tpu.memory_space<vmem>>, vector<1x32x128xbf16>
    %380 = vector.shape_cast %379 : vector<1x32x128xbf16> to vector<32x128xbf16>
    %cst_239 = arith.constant dense<0.000000e+00> : vector<1x128xf32>
    %381 = tpu.matmul %378, %380, %cst_239 {dimension_numbers = #tpu.dot_dimension_numbers<[1], [0], [0], [1], [0, 0, 1, 1], [], []>} : vector<1x32xbf16>, vector<32x128xbf16>, vector<1x128xf32> -> vector<1x128xf32>
    %382 = arith.addf %376, %381 : vector<1x128xf32>
    %383 = vector.extract_strided_slice %111 {offsets = [45, 0], sizes = [1, 32], strides = [1, 1]} : vector<49x32xf32> to vector<1x32xf32>
    %384 = arith.truncf %383 : vector<1x32xf32> to vector<1x32xbf16>
    %c45 = arith.constant 45 : index
    %c0_240 = arith.constant 0 : index
    %c0_241 = arith.constant 0 : index
    %385 = vector.load %arg7[%c45, %c0_240, %c0_241] : memref<49x32x128xbf16, #tpu.memory_space<vmem>>, vector<1x32x128xbf16>
    %386 = vector.shape_cast %385 : vector<1x32x128xbf16> to vector<32x128xbf16>
    %cst_242 = arith.constant dense<0.000000e+00> : vector<1x128xf32>
    %387 = tpu.matmul %384, %386, %cst_242 {dimension_numbers = #tpu.dot_dimension_numbers<[1], [0], [0], [1], [0, 0, 1, 1], [], []>} : vector<1x32xbf16>, vector<32x128xbf16>, vector<1x128xf32> -> vector<1x128xf32>
    %388 = arith.addf %382, %387 : vector<1x128xf32>
    %389 = vector.extract_strided_slice %111 {offsets = [46, 0], sizes = [1, 32], strides = [1, 1]} : vector<49x32xf32> to vector<1x32xf32>
    %390 = arith.truncf %389 : vector<1x32xf32> to vector<1x32xbf16>
    %c46 = arith.constant 46 : index
    %c0_243 = arith.constant 0 : index
    %c0_244 = arith.constant 0 : index
    %391 = vector.load %arg7[%c46, %c0_243, %c0_244] : memref<49x32x128xbf16, #tpu.memory_space<vmem>>, vector<1x32x128xbf16>
    %392 = vector.shape_cast %391 : vector<1x32x128xbf16> to vector<32x128xbf16>
    %cst_245 = arith.constant dense<0.000000e+00> : vector<1x128xf32>
    %393 = tpu.matmul %390, %392, %cst_245 {dimension_numbers = #tpu.dot_dimension_numbers<[1], [0], [0], [1], [0, 0, 1, 1], [], []>} : vector<1x32xbf16>, vector<32x128xbf16>, vector<1x128xf32> -> vector<1x128xf32>
    %394 = arith.addf %388, %393 : vector<1x128xf32>
    %395 = vector.extract_strided_slice %111 {offsets = [47, 0], sizes = [1, 32], strides = [1, 1]} : vector<49x32xf32> to vector<1x32xf32>
    %396 = arith.truncf %395 : vector<1x32xf32> to vector<1x32xbf16>
    %c47 = arith.constant 47 : index
    %c0_246 = arith.constant 0 : index
    %c0_247 = arith.constant 0 : index
    %397 = vector.load %arg7[%c47, %c0_246, %c0_247] : memref<49x32x128xbf16, #tpu.memory_space<vmem>>, vector<1x32x128xbf16>
    %398 = vector.shape_cast %397 : vector<1x32x128xbf16> to vector<32x128xbf16>
    %cst_248 = arith.constant dense<0.000000e+00> : vector<1x128xf32>
    %399 = tpu.matmul %396, %398, %cst_248 {dimension_numbers = #tpu.dot_dimension_numbers<[1], [0], [0], [1], [0, 0, 1, 1], [], []>} : vector<1x32xbf16>, vector<32x128xbf16>, vector<1x128xf32> -> vector<1x128xf32>
    %400 = arith.addf %394, %399 : vector<1x128xf32>
    %401 = vector.extract_strided_slice %111 {offsets = [48, 0], sizes = [1, 32], strides = [1, 1]} : vector<49x32xf32> to vector<1x32xf32>
    %402 = arith.truncf %401 : vector<1x32xf32> to vector<1x32xbf16>
    %c48 = arith.constant 48 : index
    %c0_249 = arith.constant 0 : index
    %c0_250 = arith.constant 0 : index
    %403 = vector.load %arg7[%c48, %c0_249, %c0_250] : memref<49x32x128xbf16, #tpu.memory_space<vmem>>, vector<1x32x128xbf16>
    %404 = vector.shape_cast %403 : vector<1x32x128xbf16> to vector<32x128xbf16>
    %cst_251 = arith.constant dense<0.000000e+00> : vector<1x128xf32>
    %405 = tpu.matmul %402, %404, %cst_251 {dimension_numbers = #tpu.dot_dimension_numbers<[1], [0], [0], [1], [0, 0, 1, 1], [], []>} : vector<1x32xbf16>, vector<32x128xbf16>, vector<1x128xf32> -> vector<1x128xf32>
    %406 = arith.addf %400, %405 : vector<1x128xf32>
    %c0_252 = arith.constant 0 : index
    %c0_253 = arith.constant 0 : index
    %c0_254 = arith.constant 0 : index
    %407 = vector.load %arg9[%c0_252, %c0_253, %c0_254] : memref<1x1x128xf32, #tpu.memory_space<vmem>>, vector<1x1x128xf32>
    %408 = vector.shape_cast %407 : vector<1x1x128xf32> to vector<1x128xf32>
    %409 = vector.shape_cast %406 : vector<1x128xf32> to vector<1x1x128xf32>
    tpu.vector_store %arg9[%c0_252, %c0_253, %c0_254], %409 {strides = array<i32>} : memref<1x1x128xf32, #tpu.memory_space<vmem>>, vector<1x1x128xf32>,
    return
  }
  func.func @transform_0(%arg0: i32) -> (i32, i32, i32, i32) {
    %c0_i32 = arith.constant 0 : i32
    %c0_i32_0 = arith.constant 0 : i32
    %c0_i32_1 = arith.constant 0 : i32
    %c0_i32_2 = arith.constant 0 : i32
    return %arg0, %c0_i32, %c0_i32_0, %c0_i32_1 : i32, i32, i32, i32
  }
  func.func @transform_1(%arg0: i32) -> (i32, i32) {
    %c0_i32 = arith.constant 0 : i32
    %c0_i32_0 = arith.constant 0 : i32
    %c0_i32_1 = arith.constant 0 : i32
    return %c0_i32, %c0_i32_0 : i32, i32
  }
  func.func @transform_2(%arg0: i32) -> (i32, i32) {
    %c0_i32 = arith.constant 0 : i32
    %c0_i32_0 = arith.constant 0 : i32
    %c0_i32_1 = arith.constant 0 : i32
    return %c0_i32, %c0_i32_0 : i32, i32
  }
  func.func @transform_3(%arg0: i32) -> (i32, i32, i32) {
    %c0_i32 = arith.constant 0 : i32
    %c0_i32_0 = arith.constant 0 : i32
    %c0_i32_1 = arith.constant 0 : i32
    %c0_i32_2 = arith.constant 0 : i32
    return %c0_i32, %c0_i32_0, %c0_i32_1 : i32, i32, i32
  }
  func.func @transform_4(%arg0: i32) -> (i32, i32, i32) {
    %c0_i32 = arith.constant 0 : i32
    %c0_i32_0 = arith.constant 0 : i32
    %c0_i32_1 = arith.constant 0 : i32
    %c0_i32_2 = arith.constant 0 : i32
    return %c0_i32, %c0_i32_0, %c0_i32_1 : i32, i32, i32
  }
  func.func @transform_5(%arg0: i32) -> (i32, i32) {
    %c0_i32 = arith.constant 0 : i32
    %c0_i32_0 = arith.constant 0 : i32
    %c0_i32_1 = arith.constant 0 : i32
    return %c0_i32, %c0_i32_0 : i32, i32
  }
  func.func @transform_6(%arg0: i32) -> (i32, i32, i32) {
    %c0_i32 = arith.constant 0 : i32
    %c0_i32_0 = arith.constant 0 : i32
    %c0_i32_1 = arith.constant 0 : i32
    %c0_i32_2 = arith.constant 0 : i32
    return %c0_i32, %c0_i32_0, %c0_i32_1 : i32, i32, i32
  }
  func.func @transform_7(%arg0: i32) -> (i32, i32) {
    %c0_i32 = arith.constant 0 : i32
    %c0_i32_0 = arith.constant 0 : i32
    %c0_i32_1 = arith.constant 0 : i32
    return %c0_i32, %c0_i32_0 : i32, i32
  }
  func.func @transform_8(%arg0: i32) -> (i32, i32, i32) {
    %c0_i32 = arith.constant 0 : i32
    %c0_i32_0 = arith.constant 0 : i32
    %c0_i32_1 = arith.constant 0 : i32
    return %arg0, %c0_i32, %c0_i32_0 : i32, i32, i32
  }
}

</mosaic_0001>

<bundles_post_ra>
// kernel: forward.1
= control target key start
LH: loop header
LB: loop body
LE: loop exit
PB: predicated region body
PF: predicated region fallthrough
CT: control target
= control target key end

     0   :  { %13 = vsyncpa [#allocation3], 0  ;;  %s10898_s0 = inlined_call_operand.vmem [shape: bf16[2,4,225,27], index: 0, kind: input, shape index: {}]   ;;  %s10899_s1 = inlined_call_operand.vmem [shape: bf16[27,16], index: 1, kind: input, shape index: {}]   ;;  %s10900_s2 = inlined_call_operand.vmem [shape: f32[1,16], index: 2, kind: input, shape index: {}]   ;;  %s10901_s3 = inlined_call_operand.vmem [shape: bf16[9,49,225], index: 3, kind: input, shape index: {}]   ;;  %s10902_s4 = inlined_call_operand.vmem [shape: bf16[9,16,32], index: 4, kind: input, shape index: {}]   ;;  %s10903_s5 = inlined_call_operand.vmem [shape: f32[1,32], index: 5, kind: input, shape index: {}]   ;;  %s10904_s6 = inlined_call_operand.vmem [shape: bf16[49,32,128], index: 6, kind: input, shape index: {}]   ;;  %s10905_s7 = inlined_call_operand.vmem [shape: f32[1,128], index: 7, kind: input, shape index: {}]   ;;  %s10906_s8 = inlined_call_operand.hbm [shape: f32[2,1,128], index: 8, kind: output, shape index: {}]  }
   0x1   :  { %15 = vsyncpa [#allocation3 + $0x1], 0  ;;  %s9007_s27 = smov 0   ;;  %s9009_s28 = smov 0  }
   0x2   :  { %s9011_s29 = smov 0   ;;  %s9013_s30 = smov 0  }
   0x3 LB: > { %s9028_s9 = sadd.s32 4294967295, %s8955_s30   ;;  %s6801_s10 = sadd.s32 4294967294, %s8955_s30   ;;  %s8955_s30 = sphi %s9013_s30, %s10912_s30   ;;  %s8951_s29 = sphi %s9011_s29, %s10911_s29   ;;  %s8947_s28 = sphi %s9009_s28, %s10910_s28   ;;  %s8943_s27 = sphi %s9007_s27, %s10909_s27  }
   0x4   : > { %s9032_s11 = sadd.s32 1, %s8955_s30   ;;  %s201_s12 = sadd.s32 1, %s8951_s29 }
   0x5   : > { %s198_s13 = ssub.s32 %s8955_s30, %s9032_s11  ;;  %p211_p0 = scmp.ne.s32.totalorder %s8951_s29, %s8947_s28 }
   0x6   : > { %p199_p1 = scmp.eq.s32.totalorder %s198_s13, 0  ;;  %p212_p2 = scmp.eq.s32.totalorder %s9028_s9, 1 }
   0x7   : > { %p217_p3 = scmp.ne.s32.totalorder %s8947_s28, %s8943_s27  ;;  %p218_p4 = scmp.eq.s32.totalorder %s6801_s10, 1 }
   0x8   : > { %s9043_s14 = scalar_select %p199_p1, %s8951_s29, %s201_s12  }
   0x9   : > { %p9045_p5 = por %p212_p2, %p211_p0  ;;  %p9049_p6 = por %p218_p4, %p217_p3 }
   0xa   : > { %p6804_p7 = scmp.ge.s32.totalorder %s8955_s30, 1  ;;  %p265_p8 = scmp.lt.s32.totalorder %s8955_s30, 3 }
   0xc   : > { %p266_p9 = pnand %p6804_p7, %p265_p8 }
   0xd   : > { %p298_p10 = scmp.lt.s32.totalorder (!%p266_p9), %s9028_s9, 1  ;;  %s296_s23 = sand.u32 (!%p266_p9), 1, %s8947_s28  }
   0xe   : > { %269 = sbr.rel (%p266_p9) target bundleno = 2572 (0xa0c), region = 52  ;;  %s7581_s24 = sshll.u32 (!%p266_p9), %s9028_s9, 4 }
   0xf   : > { %s10857_s13 = scalar_lea.hbm (!%p266_p9), %s10906_s8, %s7581_s24  ;;  %s6734_s17 = scalar_lea.sflag (!%p266_p9), [#allocation3], %s296_s23 }
  0x10   : > { %s8961_s18 = smov (!%p266_p9), [#allocation2]  }
  0x11   : > { %s8899_s19 = sshll.u32 (!%p266_p9), %s8961_s18, 4  ;;  %s8900_s19 = int_to_ptr.vmem [resolvable:$false] %s8899_s19 }
  0x12   : > { %s8901_s20 = scalar_lea.vmem (!%p266_p9), %s8900_s19, 32 }
  0x13   : > { %vm474_vm0 = vcmask 1044480   ;;  %v8957_v0 = vmov 0.0   ;;  %v8626_v1 = vld [vmem:[%s10899_s1 + $0x8] sm:$0x3f]   ;;  %vm475_vm1 = vcmask 1045504   ;;  %v8958_v2 = vmov 65535  }
  0x14   : > { %7844 = vmatprep.subr.bf16.mxu0 %v8957_v0  ;;  %7908 = vmatprep.subr.bf16.mxu1 %v8957_v0  ;;  %v476_v3 = vsel %vm474_vm0, 4294967295, %v8958_v2  ;;  %vm8959_vm2 = vmmov 0   ;;  %v8627_v6 = vld [vmem:[%s10899_s1] sm:$0xff]   ;;  %s299_s21 = scalar_select %p298_p10, %s9028_s9, 1  ;;  %vm428_vm3 = vcmask 220160   ;;  %vm1791_vm4 = vcmask 793600  }
  0x15   : > { %v477_v4 = vsel %vm475_vm1, %v476_v3, 0  ;;  %7848 = vmatprep.mubr.msk.bf16.mxu0 %vm8959_vm2, %v8957_v0  ;;  %7912 = vmatprep.mubr.msk.bf16.mxu1 %vm8959_vm2, %v8957_v0  ;;  %v9277_v57 = vld [vmem:[%s10900_s2] ss:$0 sm:$0xff]  ;;  %vm1804_vm5 = vcmask 1040384   ;;  %vm2010_vm6 = vcmask 130048   ;;  %vm3699_vm7 = vcmask 261120  }
  0x16   : > { %v479_v5 = vand.u32 %v8626_v1, %v477_v4  ;;  %s8582_s22 = smul.u32 464, %s299_s21 }
  0x18   : > { %7845 = vmatpush3.bf16.msra.mxu0 %v479_v5  ;;  %7909 = vmatpush3.bf16.msra.mxu1 %v479_v5  ;;  %s9074_s25 = scalar_lea.vmem %s10898_s0, %s8582_s22 }
  0x19   : > { %7846 = vmatprep.subr.bf16.mxu0 %v8957_v0  ;;  %7910 = vmatprep.subr.bf16.mxu1 %v8957_v0  ;;  %v8628_v7 = vld [vmem:[%s9074_s25] sm:$0xff]   ;;  %v8629_v8 = vld [vmem:[%s9074_s25 + $0x74] sm:$0xff]   ;;  %v8630_v9 = vld [vmem:[%s9074_s25 + $0x8] sm:$0xff]  }
  0x1a   : > { %v8631_v10 = vld [vmem:[%s9074_s25 + $0x7c] sm:$0xff]   ;;  %v8632_v11 = vld [vmem:[%s9074_s25 + $0x10] sm:$0xff]   ;;  %v8633_v12 = vld [vmem:[%s9074_s25 + $0x84] sm:$0xff]  }
  0x1b   : > { %v8634_v13 = vld [vmem:[%s9074_s25 + $0x18] sm:$0xff]   ;;  %v8635_v14 = vld [vmem:[%s9074_s25 + $0x8c] sm:$0xff]   ;;  %v8636_v15 = vld [vmem:[%s9074_s25 + $0x20] sm:$0xff]  }
  0x1c   : > { %7847 = vmatpush3.bf16.msra.mxu0 %v8627_v6  ;;  %7911 = vmatpush3.bf16.msra.mxu1 %v8627_v6  ;;  %v8637_v16 = vld [vmem:[%s9074_s25 + $0x94] sm:$0xff]   ;;  %v8638_v17 = vld [vmem:[%s9074_s25 + $0x28] sm:$0xff]   ;;  %v8639_v18 = vld [vmem:[%s9074_s25 + $0x9c] sm:$0xff]  }
  0x1d   : > { %7972 = vmatprep.subr.bf16.mxu0 %v8957_v0  ;;  %8036 = vmatprep.subr.bf16.mxu1 %v8957_v0  ;;  %v8640_v19 = vld [vmem:[%s9074_s25 + $0x30] sm:$0xff]   ;;  %v8641_v20 = vld [vmem:[%s9074_s25 + $0xa4] sm:$0xff]   ;;  %v8642_v21 = vld [vmem:[%s9074_s25 + $0x38] sm:$0xff]  }
  0x1e   : > { %v8643_v22 = vld [vmem:[%s9074_s25 + $0xac] sm:$0xff]   ;;  %v8644_v23 = vld [vmem:[%s9074_s25 + $0x40] sm:$0xff]   ;;  %v8645_v24 = vld [vmem:[%s9074_s25 + $0xb4] sm:$0xff]  }
  0x1f   : > { %7849 = vmatmul.mubr.msk.bf16.vlgmr.msra.gmra.mxu0 %vm428_vm3, %v8628_v7  ;;  %7913 = vmatmul.mubr.msk.bf16.vlgmr.msra.gmra.mxu1 %vm428_vm3, %v8629_v8  ;;  %v8646_v25 = vld [vmem:[%s9074_s25 + $0x48] sm:$0xff]   ;;  %v8647_v26 = vld [vmem:[%s9074_s25 + $0xbc] sm:$0xff]   ;;  %v8648_v27 = vld [vmem:[%s9074_s25 + $0x50] sm:$0xff]  }
  0x20   : > { %7852 = vmatprep.mubr.msk.bf16.mxu0 %vm8959_vm2, %v8957_v0  ;;  %7916 = vmatprep.mubr.msk.bf16.mxu1 %vm8959_vm2, %v8957_v0  ;;  %v8649_v28 = vld [vmem:[%s9074_s25 + $0xc4] sm:$0xff]   ;;  %v8650_v29 = vld [vmem:[%s9074_s25 + $0x58] sm:$0xff]   ;;  %v8651_v30 = vld [vmem:[%s9074_s25 + $0xcc] sm:$0xff]  }
  0x21   : > { %7973 = vmatpush3.bf16.msra.mxu0 %v479_v5  ;;  %8037 = vmatpush3.bf16.msra.mxu1 %v479_v5  ;;  %v8652_v31 = vld [vmem:[%s9074_s25 + $0x60] sm:$0xff]   ;;  %v8653_v32 = vld [vmem:[%s9074_s25 + $0xd4] sm:$0xff]   ;;  %v8654_v33 = vld [vmem:[%s9074_s25 + $0x68] sm:$0xff]  }
  0x22   : > { %7974 = vmatprep.subr.bf16.mxu0 %v8957_v0  ;;  %8038 = vmatprep.subr.bf16.mxu1 %v8957_v0  ;;  %v8655_v34 = vld [vmem:[%s9074_s25 + $0xdc] sm:$0xff]   ;;  %v8656_v35 = vld [vmem:[%s9074_s25 + $0x70] ss:$0 sps:$4 sm:$0x11]   ;;  %v8658_v37 = vld [vmem:[%s9074_s25 + $0xe8] sm:$0xff]  }
  0x23   : > { %v8657_v36 = vld [vmem:[%s9074_s25 + $0xe4] ss:$0 sps:$4 sm:$0x11]   ;;  %v8659_v38 = vld [vmem:[%s9074_s25 + $0x15c] sm:$0xff]   ;;  %v8660_v39 = vld [vmem:[%s9074_s25 + $0xf0] sm:$0xff]  }
  0x24   : > { %v8661_v40 = vld [vmem:[%s9074_s25 + $0x164] sm:$0xff]   ;;  %v8662_v41 = vld [vmem:[%s9074_s25 + $0xf8] sm:$0xff]   ;;  %v8663_v42 = vld [vmem:[%s9074_s25 + $0x16c] sm:$0xff]  }
  0x25   : > { %7975 = vmatpush3.bf16.msra.mxu0 %v8627_v6  ;;  %8039 = vmatpush3.bf16.msra.mxu1 %v8627_v6  ;;  %v8664_v43 = vld [vmem:[%s9074_s25 + $0x100] sm:$0xff]   ;;  %v8665_v44 = vld [vmem:[%s9074_s25 + $0x174] sm:$0xff]   ;;  %v8666_v45 = vld [vmem:[%s9074_s25 + $0x108] sm:$0xff]  }
  0x26   : > { %v8667_v46 = vld [vmem:[%s9074_s25 + $0x17c] sm:$0xff]   ;;  %v8668_v47 = vld [vmem:[%s9074_s25 + $0x110] sm:$0xff]   ;;  %v8669_v48 = vld [vmem:[%s9074_s25 + $0x184] sm:$0xff]  }
  0x27   : > { %7853 = vmatmul.mubr.msk.bf16.gmra.mxu0 %vm428_vm3, %v8630_v9  ;;  %7917 = vmatmul.mubr.msk.bf16.gmra.mxu1 %vm428_vm3, %v8631_v10  ;;  %v8670_v49 = vld [vmem:[%s9074_s25 + $0x118] sm:$0xff]   ;;  %v8671_v50 = vld [vmem:[%s9074_s25 + $0x18c] sm:$0xff]   ;;  %v8672_v51 = vld [vmem:[%s9074_s25 + $0x120] sm:$0xff]  }
  0x28   : > { %7856 = vmatprep.mubr.msk.bf16.mxu0 %vm8959_vm2, %v8957_v0  ;;  %7920 = vmatprep.mubr.msk.bf16.mxu1 %vm8959_vm2, %v8957_v0  ;;  %v8673_v52 = vld [vmem:[%s9074_s25 + $0x194] sm:$0xff]   ;;  %v8674_v53 = vld [vmem:[%s9074_s25 + $0x128] sm:$0xff]   ;;  %v8675_v54 = vld [vmem:[%s9074_s25 + $0x19c] sm:$0xff]  }
  0x29   : > { %v8676_v55 = vld [vmem:[%s9074_s25 + $0x130] sm:$0xff]   ;;  %v8677_v56 = vld [vmem:[%s9074_s25 + $0x1a4] sm:$0xff]   ;;  %v8678_v5 = vld [vmem:[%s9074_s25 + $0x138] sm:$0xff]  }
  0x2a   : > { %v8679_v6 = vld [vmem:[%s9074_s25 + $0x1ac] sm:$0xff]  }
  0x2f   : > { %7857 = vmatmul.mubr.msk.bf16.gmra.mxu0 %vm428_vm3, %v8632_v11  ;;  %7921 = vmatmul.mubr.msk.bf16.gmra.mxu1 %vm428_vm3, %v8633_v12 }
  0x30   : > { %7860 = vmatprep.mubr.msk.bf16.mxu0 %vm8959_vm2, %v8957_v0  ;;  %7924 = vmatprep.mubr.msk.bf16.mxu1 %vm8959_vm2, %v8957_v0 }
  0x37   : > { %7861 = vmatmul.mubr.msk.bf16.gmra.mxu0 %vm428_vm3, %v8634_v13  ;;  %7925 = vmatmul.mubr.msk.bf16.gmra.mxu1 %vm428_vm3, %v8635_v14 }
  0x38   : > { %7864 = vmatprep.mubr.msk.bf16.mxu0 %vm8959_vm2, %v8957_v0  ;;  %7928 = vmatprep.mubr.msk.bf16.mxu1 %vm8959_vm2, %v8957_v0 }
  0x3f   : > { %7865 = vmatmul.mubr.msk.bf16.gmra.mxu0 %vm428_vm3, %v8636_v15  ;;  %7929 = vmatmul.mubr.msk.bf16.gmra.mxu1 %vm428_vm3, %v8637_v16 }
  0x40   : > { %7868 = vmatprep.mubr.msk.bf16.mxu0 %vm8959_vm2, %v8957_v0  ;;  %7932 = vmatprep.mubr.msk.bf16.mxu1 %vm8959_vm2, %v8957_v0 }
  0x47   : > { %7869 = vmatmul.mubr.msk.bf16.gmra.mxu0 %vm428_vm3, %v8638_v17  ;;  %7933 = vmatmul.mubr.msk.bf16.gmra.mxu1 %vm428_vm3, %v8639_v18 }
  0x48   : > { %7872 = vmatprep.mubr.msk.bf16.mxu0 %vm8959_vm2, %v8957_v0  ;;  %7936 = vmatprep.mubr.msk.bf16.mxu1 %vm8959_vm2, %v8957_v0 }
  0x4f   : > { %7873 = vmatmul.mubr.msk.bf16.gmra.mxu0 %vm428_vm3, %v8640_v19  ;;  %7937 = vmatmul.mubr.msk.bf16.gmra.mxu1 %vm428_vm3, %v8641_v20 }
  0x50   : > { %7876 = vmatprep.mubr.msk.bf16.mxu0 %vm8959_vm2, %v8957_v0  ;;  %7940 = vmatprep.mubr.msk.bf16.mxu1 %vm8959_vm2, %v8957_v0 }
  0x57   : > { %7877 = vmatmul.mubr.msk.bf16.gmra.mxu0 %vm428_vm3, %v8642_v21  ;;  %7941 = vmatmul.mubr.msk.bf16.gmra.mxu1 %vm428_vm3, %v8643_v22 }
  0x58   : > { %7880 = vmatprep.mubr.msk.bf16.mxu0 %vm8959_vm2, %v8957_v0  ;;  %7944 = vmatprep.mubr.msk.bf16.mxu1 %vm8959_vm2, %v8957_v0 }
  0x5f   : > { %7881 = vmatmul.mubr.msk.bf16.gmra.mxu0 %vm428_vm3, %v8644_v23  ;;  %7945 = vmatmul.mubr.msk.bf16.gmra.mxu1 %vm428_vm3, %v8645_v24 }
  0x60   : > { %7884 = vmatprep.mubr.msk.bf16.mxu0 %vm8959_vm2, %v8957_v0  ;;  %7948 = vmatprep.mubr.msk.bf16.mxu1 %vm8959_vm2, %v8957_v0 }
  0x67   : > { %7885 = vmatmul.mubr.msk.bf16.gmra.mxu0 %vm428_vm3, %v8646_v25  ;;  %7949 = vmatmul.mubr.msk.bf16.gmra.mxu1 %vm428_vm3, %v8647_v26  ;;  %v8680_v25 = vld [vmem:[%s9074_s25 + $0x140] sm:$0xff]   ;;  %v8681_v26 = vld [vmem:[%s9074_s25 + $0x1b4] sm:$0xff]  }
  0x68   : > { %7888 = vmatprep.mubr.msk.bf16.mxu0 %vm8959_vm2, %v8957_v0  ;;  %7952 = vmatprep.mubr.msk.bf16.mxu1 %vm8959_vm2, %v8957_v0 }
  0x6f   : > { %7889 = vmatmul.mubr.msk.bf16.gmra.mxu0 %vm428_vm3, %v8648_v27  ;;  %7953 = vmatmul.mubr.msk.bf16.gmra.mxu1 %vm428_vm3, %v8649_v28 }
  0x70   : > { %7892 = vmatprep.mubr.msk.bf16.mxu0 %vm8959_vm2, %v8957_v0  ;;  %7956 = vmatprep.mubr.msk.bf16.mxu1 %vm8959_vm2, %v8957_v0 }
  0x77   : > { %7893 = vmatmul.mubr.msk.bf16.gmra.mxu0 %vm428_vm3, %v8650_v29  ;;  %7957 = vmatmul.mubr.msk.bf16.gmra.mxu1 %vm428_vm3, %v8651_v30 }
  0x78   : > { %7896 = vmatprep.mubr.msk.bf16.mxu0 %vm8959_vm2, %v8957_v0  ;;  %7960 = vmatprep.mubr.msk.bf16.mxu1 %vm8959_vm2, %v8957_v0 }
  0x7f   : > { %7897 = vmatmul.mubr.msk.bf16.gmra.mxu0 %vm428_vm3, %v8652_v31  ;;  %7961 = vmatmul.mubr.msk.bf16.gmra.mxu1 %vm428_vm3, %v8653_v32 }
  0x80   : > { %7900 = vmatprep.mubr.msk.bf16.mxu0 %vm8959_vm2, %v8957_v0  ;;  %7964 = vmatprep.mubr.msk.bf16.mxu1 %vm8959_vm2, %v8957_v0 }
  0x87   : > { %7901 = vmatmul.mubr.msk.bf16.gmra.mxu0 %vm428_vm3, %v8654_v33  ;;  %7965 = vmatmul.mubr.msk.bf16.gmra.mxu1 %vm428_vm3, %v8655_v34 }
  0x88   : > { %7904 = vmatprep.mubr.msk.bf16.mxu0 %vm8959_vm2, %v8957_v0  ;;  %7968 = vmatprep.mubr.msk.bf16.mxu1 %vm8959_vm2, %v8957_v0 }
  0x8f   : > { %7905 = vmatmul.mubr.msk.bf16.gmra.mxu0 %vm428_vm3, %v8656_v35  ;;  %7969 = vmatmul.mubr.msk.bf16.gmra.mxu1 %vm428_vm3, %v8657_v36 }
  0x90   : > { %7976 = vmatprep.mubr.msk.bf16.mxu0 %vm8959_vm2, %v8957_v0  ;;  %8040 = vmatprep.mubr.msk.bf16.mxu1 %vm8959_vm2, %v8957_v0 }
  0x97   : > { %7977 = vmatmul.mubr.msk.bf16.vlgmr.msra.gmra.mxu0 %vm428_vm3, %v8658_v37  ;;  %8041 = vmatmul.mubr.msk.bf16.vlgmr.msra.gmra.mxu1 %vm428_vm3, %v8659_v38 }
  0x98   : > { %7980 = vmatprep.mubr.msk.bf16.mxu0 %vm8959_vm2, %v8957_v0  ;;  %8044 = vmatprep.mubr.msk.bf16.mxu1 %vm8959_vm2, %v8957_v0 }
  0x9f   : > { %7981 = vmatmul.mubr.msk.bf16.gmra.mxu0 %vm428_vm3, %v8660_v39  ;;  %8045 = vmatmul.mubr.msk.bf16.gmra.mxu1 %vm428_vm3, %v8661_v40 }
  0xa0   : > { %7984 = vmatprep.mubr.msk.bf16.mxu0 %vm8959_vm2, %v8957_v0  ;;  %8048 = vmatprep.mubr.msk.bf16.mxu1 %vm8959_vm2, %v8957_v0 }
  0xa7   : > { %7985 = vmatmul.mubr.msk.bf16.gmra.mxu0 %vm428_vm3, %v8662_v41  ;;  %8049 = vmatmul.mubr.msk.bf16.gmra.mxu1 %vm428_vm3, %v8663_v42 }
  0xa8   : > { %7988 = vmatprep.mubr.msk.bf16.mxu0 %vm8959_vm2, %v8957_v0  ;;  %8052 = vmatprep.mubr.msk.bf16.mxu1 %vm8959_vm2, %v8957_v0 }
  0xaf   : > { %7989 = vmatmul.mubr.msk.bf16.gmra.mxu0 %vm428_vm3, %v8664_v43  ;;  %8053 = vmatmul.mubr.msk.bf16.gmra.mxu1 %vm428_vm3, %v8665_v44 }
  0xb0   : > { %7992 = vmatprep.mubr.msk.bf16.mxu0 %vm8959_vm2, %v8957_v0  ;;  %8056 = vmatprep.mubr.msk.bf16.mxu1 %vm8959_vm2, %v8957_v0 }
  0xb7   : > { %7993 = vmatmul.mubr.msk.bf16.gmra.mxu0 %vm428_vm3, %v8666_v45  ;;  %8057 = vmatmul.mubr.msk.bf16.gmra.mxu1 %vm428_vm3, %v8667_v46  ;;  %v8682_v45 = vld [vmem:[%s9074_s25 + $0x148] sm:$0xff]   ;;  %v8683_v46 = vld [vmem:[%s9074_s25 + $0x1bc] sm:$0xff]  }
  0xb8   : > { %7996 = vmatprep.mubr.msk.bf16.mxu0 %vm8959_vm2, %v8957_v0  ;;  %8060 = vmatprep.mubr.msk.bf16.mxu1 %vm8959_vm2, %v8957_v0 }
  0xbf   : > { %7997 = vmatmul.mubr.msk.bf16.gmra.mxu0 %vm428_vm3, %v8668_v47  ;;  %8061 = vmatmul.mubr.msk.bf16.gmra.mxu1 %vm428_vm3, %v8669_v48 }
  0xc0   : > { %8000 = vmatprep.mubr.msk.bf16.mxu0 %vm8959_vm2, %v8957_v0  ;;  %8064 = vmatprep.mubr.msk.bf16.mxu1 %vm8959_vm2, %v8957_v0 }
  0xc7   : > { %8001 = vmatmul.mubr.msk.bf16.gmra.mxu0 %vm428_vm3, %v8670_v49  ;;  %8065 = vmatmul.mubr.msk.bf16.gmra.mxu1 %vm428_vm3, %v8671_v50 }
  0xc8   : > { %8004 = vmatprep.mubr.msk.bf16.mxu0 %vm8959_vm2, %v8957_v0  ;;  %8068 = vmatprep.mubr.msk.bf16.mxu1 %vm8959_vm2, %v8957_v0 }
  0xcf   : > { %8005 = vmatmul.mubr.msk.bf16.gmra.mxu0 %vm428_vm3, %v8672_v51  ;;  %8069 = vmatmul.mubr.msk.bf16.gmra.mxu1 %vm428_vm3, %v8673_v52 }
  0xd0   : > { %8008 = vmatprep.mubr.msk.bf16.mxu0 %vm8959_vm2, %v8957_v0  ;;  %8072 = vmatprep.mubr.msk.bf16.mxu1 %vm8959_vm2, %v8957_v0 }
  0xd7   : > { %8009 = vmatmul.mubr.msk.bf16.gmra.mxu0 %vm428_vm3, %v8674_v53  ;;  %8073 = vmatmul.mubr.msk.bf16.gmra.mxu1 %vm428_vm3, %v8675_v54 }
  0xd8   : > { %8012 = vmatprep.mubr.msk.bf16.mxu0 %vm8959_vm2, %v8957_v0  ;;  %8076 = vmatprep.mubr.msk.bf16.mxu1 %vm8959_vm2, %v8957_v0 }
  0xdf   : > { %v515_v58 = vpop.f32.mrf.mxu0  ;;  %v844_v59 = vpop.f32.mrf.mxu1  ;;  %8013 = vmatmul.mubr.msk.bf16.gmra.mxu0 %vm428_vm3, %v8676_v55  ;;  %8077 = vmatmul.mubr.msk.bf16.gmra.mxu1 %vm428_vm3, %v8677_v56 }
  0xe0   : > { %v516_v60 = vadd.f32 %v9277_v57, %v515_v58  ;;  %v845_v61 = vadd.f32 %v9277_v57, %v844_v59  ;;  %8016 = vmatprep.mubr.msk.bf16.mxu0 %vm8959_vm2, %v8957_v0  ;;  %8080 = vmatprep.mubr.msk.bf16.mxu1 %vm8959_vm2, %v8957_v0 }
  0xe1   : > { %v7850_v62 = vpop.f32.mrf.mxu0  ;;  %v7914_v63 = vpop.f32.mrf.mxu1 }
  0xe2   : > { %v633_v1 = vmax.f32 %v516_v60, 0.0  ;;  %v962_v2 = vmax.f32 %v845_v61, 0.0 }
  0xe3   : > { %v518_v3 = vpop.f32.mrf.mxu0  ;;  %v847_v4 = vpop.f32.mrf.mxu1 }
  0xe4   : > { %v9289_v7 = vmax.f32 %v633_v1, %v962_v2  ;;  %v519_v8 = vadd.f32 %v9277_v57, %v518_v3  ;;  %v848_v9 = vadd.f32 %v9277_v57, %v847_v4  ;;  %v8684_v3 = vld [vmem:[%s9074_s25 + $0x150] sm:$0xff]   ;;  %v8685_v4 = vld [vmem:[%s9074_s25 + $0x1c4] sm:$0xff]  }
  0xe5   : > { %v7851_v10 = vpop.f32.mrf.mxu0  ;;  %v7915_v11 = vpop.f32.mrf.mxu1 }
  0xe6   : > { %v634_v12 = vmax.f32 %v519_v8, 0.0  ;;  %v963_v13 = vmax.f32 %v848_v9, 0.0 }
  0xe7   : > { %v523_v14 = vpop.f32.mrf.mxu0  ;;  %v852_v15 = vpop.f32.mrf.mxu1  ;;  %8017 = vmatmul.mubr.msk.bf16.gmra.mxu0 %vm428_vm3, %v8678_v5  ;;  %8081 = vmatmul.mubr.msk.bf16.gmra.mxu1 %vm428_vm3, %v8679_v6 }
  0xe8   : > { %v9295_v16 = vmax.f32 %v634_v12, %v963_v13  ;;  %v524_v17 = vadd.f32 %v9277_v57, %v523_v14  ;;  %v853_v18 = vadd.f32 %v9277_v57, %v852_v15  ;;  %8020 = vmatprep.mubr.msk.bf16.mxu0 %vm8959_vm2, %v8957_v0  ;;  %8084 = vmatprep.mubr.msk.bf16.mxu1 %vm8959_vm2, %v8957_v0 }
  0xe9   : > { %v7854_v19 = vpop.f32.mrf.mxu0  ;;  %v7918_v20 = vpop.f32.mrf.mxu1 }
  0xea   : > { %v635_v21 = vmax.f32 %v524_v17, 0.0  ;;  %v964_v22 = vmax.f32 %v853_v18, 0.0 }
  0xeb   : > { %v526_v23 = vpop.f32.mrf.mxu0  ;;  %v855_v24 = vpop.f32.mrf.mxu1 }
  0xec   : > { %v9305_v27 = vmax.f32 %v635_v21, %v964_v22  ;;  %v527_v28 = vadd.f32 %v9277_v57, %v526_v23  ;;  %v856_v29 = vadd.f32 %v9277_v57, %v855_v24 }
  0xed   : > { %v7855_v30 = vpop.f32.mrf.mxu0  ;;  %v7919_v31 = vpop.f32.mrf.mxu1 }
  0xee   : > { %v636_v32 = vmax.f32 %v527_v28, 0.0  ;;  %v965_v33 = vmax.f32 %v856_v29, 0.0 }
  0xef   : > { %v531_v34 = vpop.f32.mrf.mxu0  ;;  %v860_v35 = vpop.f32.mrf.mxu1  ;;  %8021 = vmatmul.mubr.msk.bf16.gmra.mxu0 %vm428_vm3, %v8680_v25  ;;  %8085 = vmatmul.mubr.msk.bf16.gmra.mxu1 %vm428_vm3, %v8681_v26  ;;  %v8686_v25 = vld [vmem:[%s9074_s25 + $0x158] ss:$0 sps:$4 sm:$0x11]   ;;  %v8687_v26 = vld [vmem:[%s9074_s25 + $0x1cc] ss:$0 sps:$4 sm:$0x11]  }
  0xf0   : > { %v9311_v36 = vmax.f32 %v636_v32, %v965_v33  ;;  %v532_v37 = vadd.f32 %v9277_v57, %v531_v34  ;;  %v861_v38 = vadd.f32 %v9277_v57, %v860_v35  ;;  %8024 = vmatprep.mubr.msk.bf16.mxu0 %vm8959_vm2, %v8957_v0  ;;  %8088 = vmatprep.mubr.msk.bf16.mxu1 %vm8959_vm2, %v8957_v0  ;;  %s297_s25 = scalar_lea.vmem [#allocation2], %s296_s23 }
  0xf1   : > { %v7858_v39 = vpop.f32.mrf.mxu0  ;;  %v7922_v40 = vpop.f32.mrf.mxu1  ;;  %s6746_s26 = sshll.u32 %s297_s25, 4  ;;  %s10859_s26 = int_to_ptr.vmem [resolvable:$true] %s6746_s26 }
  0xf2   : > { %v637_v41 = vmax.f32 %v532_v37, 0.0  ;;  %v966_v42 = vmax.f32 %v861_v38, 0.0  ;;  %s8895_s9 = scalar_lea.vmem %s10859_s26, 16  ;;  %p8902_p0 = scmp.lt.s32.totalorder %s10859_s26, %s8900_s19 }
  0xf3   : > { %v534_v43 = vpop.f32.mrf.mxu0  ;;  %v863_v44 = vpop.f32.mrf.mxu1  ;;  %p8896_p11 = scmp.ne.s32.totalorder %s10859_s26, %s8895_s9  ;;  %p8903_p1 = scmp.lt.s32.totalorder %s8901_s20, %s8895_s9 }
  0xf4   : > { %v9321_v47 = vmax.f32 %v637_v41, %v966_v42  ;;  %v535_v48 = vadd.f32 %v9277_v57, %v534_v43  ;;  %v864_v49 = vadd.f32 %v9277_v57, %v863_v44 }
  0xf5   : > { %v7859_v50 = vpop.f32.mrf.mxu0  ;;  %v7923_v51 = vpop.f32.mrf.mxu1  ;;  %p8897_p12 = pnand %p8896_p11, %p9045_p5  ;;  %p8904_p2 = por %p8903_p1, %p8902_p0 }
  0xf6   : > { %v638_v52 = vmax.f32 %v535_v48, 0.0  ;;  %v967_v53 = vmax.f32 %v864_v49, 0.0 }
  0xf7   : > { %v539_v54 = vpop.f32.mrf.mxu0  ;;  %v868_v55 = vpop.f32.mrf.mxu1  ;;  %8025 = vmatmul.mubr.msk.bf16.gmra.mxu0 %vm428_vm3, %v8682_v45  ;;  %8089 = vmatmul.mubr.msk.bf16.gmra.mxu1 %vm428_vm3, %v8683_v46  ;;  %p8898_p13 = pneg %p8897_p12 }
  0xf8   : > { %v9327_v56 = vmax.f32 %v638_v52, %v967_v53  ;;  %v540_v58 = vadd.f32 %v9277_v57, %v539_v54  ;;  %v869_v59 = vadd.f32 %v9277_v57, %v868_v55  ;;  %8028 = vmatprep.mubr.msk.bf16.mxu0 %vm8959_vm2, %v8957_v0  ;;  %8092 = vmatprep.mubr.msk.bf16.mxu1 %vm8959_vm2, %v8957_v0 }
  0xf9   : > { %v7862_v60 = vpop.f32.mrf.mxu0  ;;  %v7926_v61 = vpop.f32.mrf.mxu1  ;;  %p8905_p3 = pnand %p8904_p2, %p8898_p13 }
  0xfa   : > { %v639_v62 = vmax.f32 %v540_v58, 0.0  ;;  %v968_v63 = vmax.f32 %v869_v59, 0.0 }
  0xfb   : > { %v542_v1 = vpop.f32.mrf.mxu0  ;;  %v871_v2 = vpop.f32.mrf.mxu1 }
  0xfc   : > { %v9337_v5 = vmax.f32 %v639_v62, %v968_v63  ;;  %v543_v6 = vadd.f32 %v9277_v57, %v542_v1  ;;  %v872_v8 = vadd.f32 %v9277_v57, %v871_v2 }
  0xfd   : > { %v7863_v9 = vpop.f32.mrf.mxu0  ;;  %v7927_v10 = vpop.f32.mrf.mxu1 }
  0xfe   : > { %v640_v11 = vmax.f32 %v543_v6, 0.0  ;;  %v969_v12 = vmax.f32 %v872_v8, 0.0 }
  0xff   : > { %v547_v13 = vpop.f32.mrf.mxu0  ;;  %v876_v14 = vpop.f32.mrf.mxu1  ;;  %8029 = vmatmul.mubr.msk.bf16.gmra.mxu0 %vm428_vm3, %v8684_v3  ;;  %8093 = vmatmul.mubr.msk.bf16.gmra.mxu1 %vm428_vm3, %v8685_v4 }
 0x100   : > { %v9343_v15 = vmax.f32 %v640_v11, %v969_v12  ;;  %v548_v17 = vadd.f32 %v9277_v57, %v547_v13  ;;  %v877_v18 = vadd.f32 %v9277_v57, %v876_v14  ;;  %8032 = vmatprep.mubr.msk.bf16.mxu0 %vm8959_vm2, %v8957_v0  ;;  %8096 = vmatprep.mubr.msk.bf16.mxu1 %vm8959_vm2, %v8957_v0 }
 0x101   : > { %v7866_v19 = vpop.f32.mrf.mxu0  ;;  %v7930_v20 = vpop.f32.mrf.mxu1 }
 0x102   : > { %v641_v21 = vmax.f32 %v548_v17, 0.0  ;;  %v970_v22 = vmax.f32 %v877_v18, 0.0 }
 0x103   : > { %v550_v23 = vpop.f32.mrf.mxu0  ;;  %v879_v24 = vpop.f32.mrf.mxu1 }
 0x104   : > { %v9353_v28 = vmax.f32 %v641_v21, %v970_v22  ;;  %v551_v29 = vadd.f32 %v9277_v57, %v550_v23  ;;  %v880_v30 = vadd.f32 %v9277_v57, %v879_v24 }
 0x105   : > { %v7867_v31 = vpop.f32.mrf.mxu0  ;;  %v7931_v32 = vpop.f32.mrf.mxu1 }
 0x106   : > { %v642_v33 = vmax.f32 %v551_v29, 0.0  ;;  %v971_v34 = vmax.f32 %v880_v30, 0.0 }
 0x107   : > { %v555_v35 = vpop.f32.mrf.mxu0  ;;  %v884_v37 = vpop.f32.mrf.mxu1  ;;  %8033 = vmatmul.mubr.msk.bf16.gmra.mxu0 %vm428_vm3, %v8686_v25  ;;  %8097 = vmatmul.mubr.msk.bf16.gmra.mxu1 %vm428_vm3, %v8687_v26 }
 0x108   : > { %v9359_v38 = vmax.f32 %v642_v33, %v971_v34  ;;  %v556_v39 = vadd.f32 %v9277_v57, %v555_v35  ;;  %v885_v40 = vadd.f32 %v9277_v57, %v884_v37  ;;  %v8960_v34 = vmov 0  }
 0x109   : > { %v7870_v41 = vpop.f32.mrf.mxu0  ;;  %v7934_v42 = vpop.f32.mrf.mxu1  ;;  %1810 = vmatprep.subr.bf16.mxu0 %v8960_v34  ;;  %1933 = vmatprep.subr.bf16.mxu1 %v8960_v34 }
 0x10a   : > { %v643_v43 = vmax.f32 %v556_v39, 0.0  ;;  %v972_v44 = vmax.f32 %v885_v40, 0.0 }
 0x10b   : > { %v558_v45 = vpop.f32.mrf.mxu0  ;;  %v887_v46 = vpop.f32.mrf.mxu1 }
 0x10c   : > { %v9363_v48 = vmax.f32 %v643_v43, %v972_v44  ;;  %v559_v49 = vadd.f32 %v9277_v57, %v558_v45  ;;  %v888_v50 = vadd.f32 %v9277_v57, %v887_v46 }
 0x10d   : > { %v7871_v51 = vpop.f32.mrf.mxu0  ;;  %v7935_v52 = vpop.f32.mrf.mxu1 }
 0x10e   : > { %v644_v53 = vmax.f32 %v559_v49, 0.0  ;;  %v973_v54 = vmax.f32 %v888_v50, 0.0 }
 0x10f   : > { %v563_v55 = vpop.f32.mrf.mxu0  ;;  %v892_v58 = vpop.f32.mrf.mxu1 }
 0x110   : > { %v9367_v59 = vmax.f32 %v644_v53, %v973_v54  ;;  %v564_v60 = vadd.f32 %v9277_v57, %v563_v55  ;;  %v893_v61 = vadd.f32 %v9277_v57, %v892_v58 }
 0x111   : > { %v7874_v62 = vpop.f32.mrf.mxu0  ;;  %v7938_v63 = vpop.f32.mrf.mxu1 }
 0x112   : > { %v645_v1 = vmax.f32 %v564_v60, 0.0  ;;  %v974_v2 = vmax.f32 %v893_v61, 0.0 }
 0x113   : > { %v566_v3 = vpop.f32.mrf.mxu0  ;;  %v895_v4 = vpop.f32.mrf.mxu1 }
 0x114   : > { %v9371_v6 = vmax.f32 %v645_v1, %v974_v2  ;;  %v567_v8 = vadd.f32 %v9277_v57, %v566_v3  ;;  %v896_v9 = vadd.f32 %v9277_v57, %v895_v4 }
 0x115   : > { %v7875_v10 = vpop.f32.mrf.mxu0  ;;  %v7939_v11 = vpop.f32.mrf.mxu1 }
 0x116   : > { %v646_v12 = vmax.f32 %v567_v8, 0.0  ;;  %v975_v13 = vmax.f32 %v896_v9, 0.0 }
 0x117   : > { %v571_v14 = vpop.f32.mrf.mxu0  ;;  %v900_v17 = vpop.f32.mrf.mxu1 }
 0x118   : > { %v9375_v18 = vmax.f32 %v646_v12, %v975_v13  ;;  %v572_v19 = vadd.f32 %v9277_v57, %v571_v14  ;;  %v901_v20 = vadd.f32 %v9277_v57, %v900_v17 }
 0x119   : > { %v7878_v21 = vpop.f32.mrf.mxu0  ;;  %v7942_v22 = vpop.f32.mrf.mxu1 }
 0x11a   : > { %v647_v23 = vmax.f32 %v572_v19, 0.0  ;;  %v976_v24 = vmax.f32 %v901_v20, 0.0 }
 0x11b   : > { %v574_v25 = vpop.f32.mrf.mxu0  ;;  %v903_v26 = vpop.f32.mrf.mxu1 }
 0x11c   : > { %v9379_v29 = vmax.f32 %v647_v23, %v976_v24  ;;  %v575_v30 = vadd.f32 %v9277_v57, %v574_v25  ;;  %v904_v31 = vadd.f32 %v9277_v57, %v903_v26 }
 0x11d   : > { %v7879_v32 = vpop.f32.mrf.mxu0  ;;  %v7943_v33 = vpop.f32.mrf.mxu1 }
 0x11e   : > { %v648_v35 = vmax.f32 %v575_v30, 0.0  ;;  %v977_v37 = vmax.f32 %v904_v31, 0.0 }
 0x11f   : > { %v579_v39 = vpop.f32.mrf.mxu0  ;;  %v908_v40 = vpop.f32.mrf.mxu1 }
 0x120   : > { %v9385_v41 = vmax.f32 %v648_v35, %v977_v37  ;;  %v580_v42 = vadd.f32 %v9277_v57, %v579_v39  ;;  %v909_v43 = vadd.f32 %v9277_v57, %v908_v40 }
 0x121   : > { %v7882_v44 = vpop.f32.mrf.mxu0  ;;  %v7946_v45 = vpop.f32.mrf.mxu1 }
 0x122   : > { %v649_v46 = vmax.f32 %v580_v42, 0.0  ;;  %v978_v49 = vmax.f32 %v909_v43, 0.0 }
 0x123   : > { %v582_v50 = vpop.f32.mrf.mxu0  ;;  %v911_v51 = vpop.f32.mrf.mxu1 }
 0x124   : > { %v9389_v52 = vmax.f32 %v649_v46, %v978_v49  ;;  %v583_v53 = vadd.f32 %v9277_v57, %v582_v50  ;;  %v912_v54 = vadd.f32 %v9277_v57, %v911_v51 }
 0x125   : > { %v7883_v55 = vpop.f32.mrf.mxu0  ;;  %v7947_v58 = vpop.f32.mrf.mxu1 }
 0x126   : > { %v650_v60 = vmax.f32 %v583_v53, 0.0  ;;  %v979_v61 = vmax.f32 %v912_v54, 0.0 }
 0x127   : > { %v587_v62 = vpop.f32.mrf.mxu0  ;;  %v916_v63 = vpop.f32.mrf.mxu1 }
 0x128   : > { %v9393_v1 = vmax.f32 %v650_v60, %v979_v61  ;;  %v588_v2 = vadd.f32 %v9277_v57, %v587_v62  ;;  %v917_v3 = vadd.f32 %v9277_v57, %v916_v63 }
 0x129   : > { %v7886_v4 = vpop.f32.mrf.mxu0  ;;  %v7950_v8 = vpop.f32.mrf.mxu1 }
 0x12a   : > { %v651_v9 = vmax.f32 %v588_v2, 0.0  ;;  %v980_v10 = vmax.f32 %v917_v3, 0.0 }
 0x12b   : > { %v590_v11 = vpop.f32.mrf.mxu0  ;;  %v919_v12 = vpop.f32.mrf.mxu1 }
 0x12c   : > { %v9397_v13 = vmax.f32 %v651_v9, %v980_v10  ;;  %v591_v14 = vadd.f32 %v9277_v57, %v590_v11  ;;  %v920_v17 = vadd.f32 %v9277_v57, %v919_v12 }
 0x12d   : > { %v7887_v19 = vpop.f32.mrf.mxu0  ;;  %v7951_v20 = vpop.f32.mrf.mxu1 }
 0x12e   : > { %v652_v21 = vmax.f32 %v591_v14, 0.0  ;;  %v981_v22 = vmax.f32 %v920_v17, 0.0 }
 0x12f   : > { %v595_v23 = vpop.f32.mrf.mxu0  ;;  %v924_v24 = vpop.f32.mrf.mxu1 }
 0x130   : > { %v9401_v25 = vmax.f32 %v652_v21, %v981_v22  ;;  %v596_v26 = vadd.f32 %v9277_v57, %v595_v23  ;;  %v925_v30 = vadd.f32 %v9277_v57, %v924_v24 }
 0x131   : > { %v7890_v31 = vpop.f32.mrf.mxu0  ;;  %v7954_v32 = vpop.f32.mrf.mxu1 }
 0x132   : > { %v653_v33 = vmax.f32 %v596_v26, 0.0  ;;  %v982_v35 = vmax.f32 %v925_v30, 0.0 }
 0x133   : > { %v598_v37 = vpop.f32.mrf.mxu0  ;;  %v927_v39 = vpop.f32.mrf.mxu1 }
 0x134   : > { %v9405_v40 = vmax.f32 %v653_v33, %v982_v35  ;;  %v599_v42 = vadd.f32 %v9277_v57, %v598_v37  ;;  %v928_v43 = vadd.f32 %v9277_v57, %v927_v39 }
 0x135   : > { %v7891_v44 = vpop.f32.mrf.mxu0  ;;  %v7955_v45 = vpop.f32.mrf.mxu1 }
 0x136   : > { %v654_v46 = vmax.f32 %v599_v42, 0.0  ;;  %v983_v49 = vmax.f32 %v928_v43, 0.0 }
 0x137   : > { %v603_v50 = vpop.f32.mrf.mxu0  ;;  %v932_v51 = vpop.f32.mrf.mxu1 }
 0x138   : > { %v9409_v53 = vmax.f32 %v654_v46, %v983_v49  ;;  %v604_v54 = vadd.f32 %v9277_v57, %v603_v50  ;;  %v933_v55 = vadd.f32 %v9277_v57, %v932_v51 }
 0x139   : > { %v7894_v58 = vpop.f32.mrf.mxu0  ;;  %v7958_v60 = vpop.f32.mrf.mxu1 }
 0x13a   : > { %v655_v61 = vmax.f32 %v604_v54, 0.0  ;;  %v984_v62 = vmax.f32 %v933_v55, 0.0 }
 0x13b   : > { %v606_v63 = vpop.f32.mrf.mxu0  ;;  %v935_v2 = vpop.f32.mrf.mxu1 }
 0x13c   : > { %v9413_v3 = vmax.f32 %v655_v61, %v984_v62  ;;  %v607_v4 = vadd.f32 %v9277_v57, %v606_v63  ;;  %v936_v8 = vadd.f32 %v9277_v57, %v935_v2 }
 0x13d   : > { %v7895_v9 = vpop.f32.mrf.mxu0  ;;  %v7959_v10 = vpop.f32.mrf.mxu1 }
 0x13e   : > { %v656_v11 = vmax.f32 %v607_v4, 0.0  ;;  %v985_v12 = vmax.f32 %v936_v8, 0.0 }
 0x13f   : > { %v611_v14 = vpop.f32.mrf.mxu0  ;;  %v940_v17 = vpop.f32.mrf.mxu1 }
 0x140   : > { %v9417_v19 = vmax.f32 %v656_v11, %v985_v12  ;;  %v612_v20 = vadd.f32 %v9277_v57, %v611_v14  ;;  %v941_v21 = vadd.f32 %v9277_v57, %v940_v17 }
 0x141   : > { %v7898_v22 = vpop.f32.mrf.mxu0  ;;  %v7962_v23 = vpop.f32.mrf.mxu1 }
 0x142   : > { %v657_v24 = vmax.f32 %v612_v20, 0.0  ;;  %v986_v26 = vmax.f32 %v941_v21, 0.0 }
 0x143   : > { %v614_v30 = vpop.f32.mrf.mxu0  ;;  %v943_v31 = vpop.f32.mrf.mxu1 }
 0x144   : > { %v9421_v32 = vmax.f32 %v657_v24, %v986_v26  ;;  %v615_v33 = vadd.f32 %v9277_v57, %v614_v30  ;;  %v944_v35 = vadd.f32 %v9277_v57, %v943_v31 }
 0x145   : > { %v7899_v37 = vpop.f32.mrf.mxu0  ;;  %v7963_v39 = vpop.f32.mrf.mxu1 }
 0x146   : > { %v658_v42 = vmax.f32 %v615_v33, 0.0  ;;  %v987_v43 = vmax.f32 %v944_v35, 0.0 }
 0x147   : > { %v619_v44 = vpop.f32.mrf.mxu0  ;;  %v948_v45 = vpop.f32.mrf.mxu1 }
 0x148   : > { %v9425_v46 = vmax.f32 %v658_v42, %v987_v43  ;;  %v620_v49 = vadd.f32 %v9277_v57, %v619_v44  ;;  %v949_v50 = vadd.f32 %v9277_v57, %v948_v45 }
 0x149   : > { %v7902_v51 = vpop.f32.mrf.mxu0  ;;  %v7966_v54 = vpop.f32.mrf.mxu1 }
 0x14a   : > { %v659_v55 = vmax.f32 %v620_v49, 0.0  ;;  %v988_v58 = vmax.f32 %v949_v50, 0.0 }
 0x14b   : > { %v622_v60 = vpop.f32.mrf.mxu0  ;;  %v951_v61 = vpop.f32.mrf.mxu1 }
 0x14c   : > { %v9429_v62 = vmax.f32 %v659_v55, %v988_v58  ;;  %v623_v63 = vadd.f32 %v9277_v57, %v622_v60  ;;  %v952_v2 = vadd.f32 %v9277_v57, %v951_v61 }
 0x14d   : > { %v7903_v4 = vpop.f32.mrf.mxu0  ;;  %v7967_v8 = vpop.f32.mrf.mxu1 }
 0x14e   : > { %v660_v9 = vmax.f32 %v623_v63, 0.0  ;;  %v989_v10 = vmax.f32 %v952_v2, 0.0 }
 0x14f   : > { %v627_v11 = vpop.f32.mrf.mxu0  ;;  %v956_v12 = vpop.f32.mrf.mxu1 }
 0x150   : > { %v9433_v14 = vmax.f32 %v660_v9, %v989_v10  ;;  %v628_v17 = vadd.f32 %v9277_v57, %v627_v11  ;;  %v957_v20 = vadd.f32 %v9277_v57, %v956_v12 }
 0x151   : > { %v7906_v21 = vpop.f32.mrf.mxu0  ;;  %v7970_v22 = vpop.f32.mrf.mxu1 }
 0x152   : > { %v661_v23 = vmax.f32 %v628_v17, 0.0  ;;  %v990_v24 = vmax.f32 %v957_v20, 0.0 }
 0x153   : > { %v630_v26 = vpop.f32.mrf.mxu0  ;;  %v959_v30 = vpop.f32.mrf.mxu1 }
 0x154   : > { %v9437_v31 = vmax.f32 %v661_v23, %v990_v24 }
 0x155   : > { %v7907_v33 = vpop.f32.mrf.mxu0  ;;  %v7971_v35 = vpop.f32.mrf.mxu1 }
 0x157   : > { %v1202_v37 = vpop.f32.mrf.mxu0  ;;  %v1560_v39 = vpop.f32.mrf.mxu1 }
 0x158   : > { %v1203_v42 = vadd.f32 %v9277_v57, %v1202_v37  ;;  %v1561_v43 = vadd.f32 %v9277_v57, %v1560_v39 }
 0x159   : > { %v7978_v44 = vpop.f32.mrf.mxu0  ;;  %v8042_v45 = vpop.f32.mrf.mxu1 }
 0x15a   : > { %v1320_v49 = vmax.f32 %v1203_v42, 0.0  ;;  %v1678_v50 = vmax.f32 %v1561_v43, 0.0 }
 0x15b   : > { %v1205_v51 = vpop.f32.mrf.mxu0  ;;  %v1563_v54 = vpop.f32.mrf.mxu1 }
 0x15c   : > { %v1349_v55 = vmax.f32 %v9289_v7, %v1320_v49  ;;  %v1206_v58 = vadd.f32 %v9277_v57, %v1205_v51  ;;  %v1564_v60 = vadd.f32 %v9277_v57, %v1563_v54 }
 0x15d   : > { %v7979_v61 = vpop.f32.mrf.mxu0  ;;  %v8043_v63 = vpop.f32.mrf.mxu1 }
 0x15e   : > { %v1707_v2 = vmax.f32 %v1349_v55, %v1678_v50  ;;  %v1321_v4 = vmax.f32 %v1206_v58, 0.0  ;;  %v1679_v11 = vmax.f32 %v1564_v60, 0.0 }
 0x15f   : > { %v1210_v8 = vpop.f32.mrf.mxu0  ;;  %v1568_v9 = vpop.f32.mrf.mxu1 }
 0x160   : > { %v1350_v10 = vmax.f32 %v9295_v16, %v1321_v4  ;;  %v1211_v12 = vadd.f32 %v9277_v57, %v1210_v8  ;;  %v1569_v17 = vadd.f32 %v9277_v57, %v1568_v9 }
 0x161   : > { %v7982_v20 = vpop.f32.mrf.mxu0  ;;  %v8046_v21 = vpop.f32.mrf.mxu1 }
 0x162   : > { %v1708_v7 = vmax.f32 %v1350_v10, %v1679_v11  ;;  %v1322_v22 = vmax.f32 %v1211_v12, 0.0  ;;  %v1680_v23 = vmax.f32 %v1569_v17, 0.0  ;;  %v8690_v10 = vld [vmem:[%s10901_s3 + $0x3c] ss:$8 sps:$4 sm:$0xff]  }
 0x163   : > { %v1213_v24 = vpop.f32.mrf.mxu0  ;;  %v1571_v26 = vpop.f32.mrf.mxu1  ;;  %v8696_v11 = vld [vmem:[%s10901_s3 + $0x4] ss:$8 sps:$4 sm:$0xff]   ;;  %7043 = vmatprep.mubr.msk.bf16.mxu1 %vm1791_vm4, %v8690_v10 }
 0x164   : > { %v9447_v30 = vpack.c.bf16 %v1708_v7, %v1707_v2  ;;  %v1351_v33 = vmax.f32 %v9305_v27, %v1322_v22  ;;  %v1214_v35 = vadd.f32 %v9277_v57, %v1213_v24  ;;  %v1572_v16 = vadd.f32 %v9277_v57, %v1571_v26  ;;  %7024 = vmatprep.mubr.msk.bf16.mxu0 %vm1791_vm4, %v8696_v11 }
 0x165   : > { %v7983_v37 = vpop.f32.mrf.mxu0  ;;  %v8047_v39 = vpop.f32.mrf.mxu1 }
 0x166   : > { %v1709_v42 = vmax.f32 %v1351_v33, %v1680_v23  ;;  %v1323_v43 = vmax.f32 %v1214_v35, 0.0  ;;  %v1681_v50 = vmax.f32 %v1572_v16, 0.0 }
 0x167   : > { %v1218_v44 = vpop.f32.mrf.mxu0  ;;  %v1576_v45 = vpop.f32.mrf.mxu1 }
 0x168   : > { %v1352_v49 = vmax.f32 %v9311_v36, %v1323_v43  ;;  %v1219_v51 = vadd.f32 %v9277_v57, %v1218_v44  ;;  %v1577_v54 = vadd.f32 %v9277_v57, %v1576_v45 }
 0x169   : > { %v7986_v55 = vpop.f32.mrf.mxu0  ;;  %v8050_v58 = vpop.f32.mrf.mxu1 }
 0x16a   : > { %v1710_v27 = vmax.f32 %v1352_v49, %v1681_v50  ;;  %v1324_v60 = vmax.f32 %v1219_v51, 0.0  ;;  %v1682_v61 = vmax.f32 %v1577_v54, 0.0 }
 0x16b   : > { %v1221_v63 = vpop.f32.mrf.mxu0  ;;  %v1579_v2 = vpop.f32.mrf.mxu1 }
 0x16c   : > { %v9455_v4 = vpack.c.bf16 %v1710_v27, %v1709_v42  ;;  %v1353_v8 = vmax.f32 %v9321_v47, %v1324_v60  ;;  %v1222_v9 = vadd.f32 %v9277_v57, %v1221_v63  ;;  %v1580_v36 = vadd.f32 %v9277_v57, %v1579_v2 }
 0x16d   : > { %v7987_v12 = vpop.f32.mrf.mxu0  ;;  %v8051_v17 = vpop.f32.mrf.mxu1 }
 0x16e   : > { %v1711_v20 = vmax.f32 %v1353_v8, %v1682_v61  ;;  %v1325_v21 = vmax.f32 %v1222_v9, 0.0  ;;  %v1683_v23 = vmax.f32 %v1580_v36, 0.0 }
 0x16f   : > { %v1226_v47 = vpop.f32.mrf.mxu0  ;;  %v1584_v7 = vpop.f32.mrf.mxu1 }
 0x170   : > { %v1354_v22 = vmax.f32 %v9327_v56, %v1325_v21  ;;  %v1227_v24 = vadd.f32 %v9277_v57, %v1226_v47  ;;  %v1585_v37 = vadd.f32 %v9277_v57, %v1584_v7 }
 0x171   : > { %v7990_v26 = vpop.f32.mrf.mxu0  ;;  %v8054_v33 = vpop.f32.mrf.mxu1 }
 0x172   : > { %v1712_v35 = vmax.f32 %v1354_v22, %v1683_v23  ;;  %v1326_v16 = vmax.f32 %v1227_v24, 0.0  ;;  %v1684_v51 = vmax.f32 %v1585_v37, 0.0 }
 0x173   : > { %v1229_v39 = vpop.f32.mrf.mxu0  ;;  %v1587_v42 = vpop.f32.mrf.mxu1 }
 0x174   : > { %v9471_v43 = vpack.c.bf16 %v1712_v35, %v1711_v20  ;;  %v1230_v44 = vadd.f32 %v9277_v57, %v1229_v39  ;;  %v1588_v45 = vadd.f32 %v9277_v57, %v1587_v42  ;;  %v1355_v56 = vmax.f32 %v9337_v5, %v1326_v16 }
 0x175   : > { %v7991_v49 = vpop.f32.mrf.mxu0  ;;  %v8055_v50 = vpop.f32.mrf.mxu1 }
 0x176   : > { %v1327_v54 = vmax.f32 %v1230_v44, 0.0  ;;  %v1685_v60 = vmax.f32 %v1588_v45, 0.0  ;;  %v1713_v8 = vmax.f32 %v1355_v56, %v1684_v51 }
 0x177   : > { %v1234_v55 = vpop.f32.mrf.mxu0  ;;  %v1592_v58 = vpop.f32.mrf.mxu1 }
 0x178   : > { %v1356_v27 = vmax.f32 %v9343_v15, %v1327_v54  ;;  %v1235_v61 = vadd.f32 %v9277_v57, %v1234_v55  ;;  %v1593_v10 = vadd.f32 %v9277_v57, %v1592_v58 }
 0x179   : > { %v7994_v63 = vpop.f32.mrf.mxu0  ;;  %v8058_v2 = vpop.f32.mrf.mxu1 }
 0x17a   : > { %v1714_v9 = vmax.f32 %v1356_v27, %v1685_v60  ;;  %v1328_v36 = vmax.f32 %v1235_v61, 0.0  ;;  %v1686_v7 = vmax.f32 %v1593_v10, 0.0 }
 0x17b   : > { %v1237_v11 = vpop.f32.mrf.mxu0  ;;  %v1595_v12 = vpop.f32.mrf.mxu1 }
 0x17c   : > { %v9479_v17 = vpack.c.bf16 %v1714_v9, %v1713_v8  ;;  %v1238_v5 = vadd.f32 %v9277_v57, %v1237_v11  ;;  %v1596_v20 = vadd.f32 %v9277_v57, %v1595_v12  ;;  %v1357_v47 = vmax.f32 %v9353_v28, %v1328_v36 }
 0x17d   : > { %v7995_v21 = vpop.f32.mrf.mxu0  ;;  %v8059_v15 = vpop.f32.mrf.mxu1 }
 0x17e   : > { %v1329_v22 = vmax.f32 %v1238_v5, 0.0  ;;  %v1687_v33 = vmax.f32 %v1596_v20, 0.0  ;;  %v1715_v39 = vmax.f32 %v1357_v47, %v1686_v7 }
 0x17f   : > { %v1242_v23 = vpop.f32.mrf.mxu0  ;;  %v1600_v24 = vpop.f32.mrf.mxu1 }
 0x180   : > { %v1358_v26 = vmax.f32 %v9359_v38, %v1329_v22  ;;  %v1243_v35 = vadd.f32 %v9277_v57, %v1242_v23  ;;  %v1601_v45 = vadd.f32 %v9277_v57, %v1600_v24 }
 0x181   : > { %v7998_v16 = vpop.f32.mrf.mxu0  ;;  %v8062_v37 = vpop.f32.mrf.mxu1 }
 0x182   : > { %v1716_v42 = vmax.f32 %v1358_v26, %v1687_v33  ;;  %v1330_v44 = vmax.f32 %v1243_v35, 0.0  ;;  %v1688_v58 = vmax.f32 %v1601_v45, 0.0 }
 0x183   : > { %v1245_v49 = vpop.f32.mrf.mxu0  ;;  %v1603_v50 = vpop.f32.mrf.mxu1 }
 0x184   : > { %v9487_v56 = vpack.c.bf16 %v1716_v42, %v1715_v39  ;;  %v1246_v28 = vadd.f32 %v9277_v57, %v1245_v49  ;;  %v1604_v51 = vadd.f32 %v9277_v57, %v1603_v50  ;;  %v1359_v55 = vmax.f32 %v9363_v48, %v1330_v44 }
 0x185   : > { %v7999_v54 = vpop.f32.mrf.mxu0  ;;  %v8063_v38 = vpop.f32.mrf.mxu1 }
 0x186   : > { %v1331_v27 = vmax.f32 %v1246_v28, 0.0  ;;  %v1689_v2 = vmax.f32 %v1604_v51, 0.0  ;;  %v1717_v10 = vmax.f32 %v1359_v55, %v1688_v58 }
 0x187   : > { %v1250_v60 = vpop.f32.mrf.mxu0  ;;  %v1608_v61 = vpop.f32.mrf.mxu1 }
 0x188   : > { %v1360_v63 = vmax.f32 %v9367_v59, %v1331_v27  ;;  %v1251_v8 = vadd.f32 %v9277_v57, %v1250_v60  ;;  %v1609_v5 = vadd.f32 %v9277_v57, %v1608_v61 }
 0x189   : > { %v8002_v9 = vpop.f32.mrf.mxu0  ;;  %v8066_v36 = vpop.f32.mrf.mxu1 }
 0x18a   : > { %v1718_v11 = vmax.f32 %v1360_v63, %v1689_v2  ;;  %v1332_v12 = vmax.f32 %v1251_v8, 0.0  ;;  %v1690_v23 = vmax.f32 %v1609_v5, 0.0 }
 0x18b   : > { %v1253_v20 = vpop.f32.mrf.mxu0  ;;  %v1611_v21 = vpop.f32.mrf.mxu1 }
 0x18c   : > { %v9495_v15 = vpack.c.bf16 %v1718_v11, %v1717_v10  ;;  %v1254_v48 = vadd.f32 %v9277_v57, %v1253_v20  ;;  %v1612_v47 = vadd.f32 %v9277_v57, %v1611_v21  ;;  %v1361_v22 = vmax.f32 %v9371_v6, %v1332_v12 }
 0x18d   : > { %v8003_v7 = vpop.f32.mrf.mxu0  ;;  %v8067_v59 = vpop.f32.mrf.mxu1 }
 0x18e   : > { %v1333_v24 = vmax.f32 %v1254_v48, 0.0  ;;  %v1691_v16 = vmax.f32 %v1612_v47, 0.0  ;;  %v1719_v44 = vmax.f32 %v1361_v22, %v1690_v23 }
 0x18f   : > { %v1258_v26 = vpop.f32.mrf.mxu0  ;;  %v1616_v33 = vpop.f32.mrf.mxu1 }
 0x190   : > { %v1362_v35 = vmax.f32 %v9375_v18, %v1333_v24  ;;  %v1259_v37 = vadd.f32 %v9277_v57, %v1258_v26  ;;  %v1617_v50 = vadd.f32 %v9277_v57, %v1616_v33 }
 0x191   : > { %v8006_v39 = vpop.f32.mrf.mxu0  ;;  %v8070_v42 = vpop.f32.mrf.mxu1 }
 0x192   : > { %v1720_v45 = vmax.f32 %v1362_v35, %v1691_v16  ;;  %v1334_v49 = vmax.f32 %v1259_v37, 0.0  ;;  %v1692_v27 = vmax.f32 %v1617_v50, 0.0 }
 0x193   : > { %v1261_v28 = vpop.f32.mrf.mxu0  ;;  %v1619_v51 = vpop.f32.mrf.mxu1 }
 0x194   : > { %v9503_v54 = vpack.c.bf16 %v1720_v45, %v1719_v44  ;;  %v1262_v6 = vadd.f32 %v9277_v57, %v1261_v28  ;;  %v1620_v38 = vadd.f32 %v9277_v57, %v1619_v51  ;;  %v1363_v58 = vmax.f32 %v9379_v29, %v1334_v49 }
 0x195   : > { %v8007_v55 = vpop.f32.mrf.mxu0  ;;  %v8071_v18 = vpop.f32.mrf.mxu1 }
 0x196   : > { %v1335_v60 = vmax.f32 %v1262_v6, 0.0  ;;  %v1693_v8 = vmax.f32 %v1620_v38, 0.0  ;;  %v1721_v12 = vmax.f32 %v1363_v58, %v1692_v27 }
 0x197   : > { %v1266_v61 = vpop.f32.mrf.mxu0  ;;  %v1624_v63 = vpop.f32.mrf.mxu1 }
 0x198   : > { %v1364_v2 = vmax.f32 %v9385_v41, %v1335_v60  ;;  %v1267_v9 = vadd.f32 %v9277_v57, %v1266_v61  ;;  %v1625_v36 = vadd.f32 %v9277_v57, %v1624_v63 }
 0x199   : > { %v8010_v10 = vpop.f32.mrf.mxu0  ;;  %v8074_v11 = vpop.f32.mrf.mxu1 }
 0x19a   : > { %v1722_v5 = vmax.f32 %v1364_v2, %v1693_v8  ;;  %v1336_v20 = vmax.f32 %v1267_v9, 0.0  ;;  %v1694_v21 = vmax.f32 %v1625_v36, 0.0 }
 0x19b   : > { %v1269_v48 = vpop.f32.mrf.mxu0  ;;  %v1627_v47 = vpop.f32.mrf.mxu1 }
 0x19c   : > { %v9511_v29 = vpack.c.bf16 %v1722_v5, %v1721_v12  ;;  %v1365_v7 = vmax.f32 %v9389_v52, %v1336_v20  ;;  %v1270_v59 = vadd.f32 %v9277_v57, %v1269_v48  ;;  %v1628_v41 = vadd.f32 %v9277_v57, %v1627_v47 }
 0x19d   : > { %v8011_v22 = vpop.f32.mrf.mxu0  ;;  %v8075_v23 = vpop.f32.mrf.mxu1 }
 0x19e   : > { %v1723_v24 = vmax.f32 %v1365_v7, %v1694_v21  ;;  %v1337_v26 = vmax.f32 %v1270_v59, 0.0  ;;  %1811 = vmatpush1.bf16.msra.mxu0 %v9511_v29  ;;  %1934 = vmatpush1.bf16.msra.mxu1 %v9511_v29  ;;  %v1695_v16 = vmax.f32 %v1628_v41, 0.0 }
 0x19f   : > { %v1274_v33 = vpop.f32.mrf.mxu0  ;;  %v1632_v35 = vpop.f32.mrf.mxu1  ;;  %1812 = vmatprep.subr.bf16.mxu0 %v8960_v34  ;;  %1935 = vmatprep.subr.bf16.mxu1 %v8960_v34 }
 0x1a0   : > { %v1366_v52 = vmax.f32 %v9393_v1, %v1337_v26  ;;  %v1275_v37 = vadd.f32 %v9277_v57, %v1274_v33  ;;  %v1633_v39 = vadd.f32 %v9277_v57, %v1632_v35  ;;  %v9533_v57 = vld [vmem:[%s10900_s2] ss:$0 sm:$0xff] }
 0x1a1   : > { %v8014_v42 = vpop.f32.mrf.mxu0  ;;  %v8078_v44 = vpop.f32.mrf.mxu1 }
 0x1a2   : > { %v1724_v45 = vmax.f32 %v1366_v52, %v1695_v16  ;;  %v1338_v49 = vmax.f32 %v1275_v37, 0.0  ;;  %v1696_v50 = vmax.f32 %v1633_v39, 0.0  ;;  %1813 = vmatpush1.bf16.msra.mxu0 %v9503_v54  ;;  %1936 = vmatpush1.bf16.msra.mxu1 %v9503_v54 }
 0x1a3   : > { %v1277_v28 = vpop.f32.mrf.mxu0  ;;  %v1635_v51 = vpop.f32.mrf.mxu1  ;;  %1814 = vmatprep.subr.bf16.mxu0 %v8960_v34  ;;  %1937 = vmatprep.subr.bf16.mxu1 %v8960_v34 }
 0x1a4   : > { %v9527_v1 = vpack.c.bf16 %v1724_v45, %v1723_v24  ;;  %v1367_v6 = vmax.f32 %v9397_v13, %v1338_v49  ;;  %v1278_v38 = vadd.f32 %v9533_v57, %v1277_v28  ;;  %v1636_v55 = vadd.f32 %v9533_v57, %v1635_v51 }
 0x1a5   : > { %v8015_v18 = vpop.f32.mrf.mxu0  ;;  %v8079_v58 = vpop.f32.mrf.mxu1 }
 0x1a6   : > { %v1725_v27 = vmax.f32 %v1367_v6, %v1696_v50  ;;  %v1339_v60 = vmax.f32 %v1278_v38, 0.0  ;;  %1815 = vmatpush1.bf16.msra.mxu0 %v9495_v15  ;;  %1938 = vmatpush1.bf16.msra.mxu1 %v9495_v15  ;;  %v1697_v2 = vmax.f32 %v1636_v55, 0.0 }
 0x1a7   : > { %v1282_v61 = vpop.f32.mrf.mxu0  ;;  %v1640_v63 = vpop.f32.mrf.mxu1  ;;  %1816 = vmatprep.subr.bf16.mxu0 %v8960_v34  ;;  %1939 = vmatprep.subr.bf16.mxu1 %v8960_v34 }
 0x1a8   : > { %v1368_v13 = vmax.f32 %v9401_v25, %v1339_v60  ;;  %v1283_v8 = vadd.f32 %v9533_v57, %v1282_v61  ;;  %v1641_v12 = vadd.f32 %v9533_v57, %v1640_v63 }
 0x1a9   : > { %v8018_v9 = vpop.f32.mrf.mxu0  ;;  %v8082_v36 = vpop.f32.mrf.mxu1 }
 0x1aa   : > { %v1726_v10 = vmax.f32 %v1368_v13, %v1697_v2  ;;  %v1340_v11 = vmax.f32 %v1283_v8, 0.0  ;;  %1817 = vmatpush1.bf16.msra.mxu0 %v9487_v56  ;;  %1940 = vmatpush1.bf16.msra.mxu1 %v9487_v56  ;;  %v1698_v41 = vmax.f32 %v1641_v12, 0.0 }
 0x1ab   : > { %v1285_v5 = vpop.f32.mrf.mxu0  ;;  %v1643_v20 = vpop.f32.mrf.mxu1  ;;  %1818 = vmatprep.subr.bf16.mxu0 %v8960_v34  ;;  %1941 = vmatprep.subr.bf16.mxu1 %v8960_v34 }
 0x1ac   : > { %v9548_v25 = vpack.c.bf16 %v1726_v10, %v1725_v27  ;;  %v1286_v21 = vadd.f32 %v9533_v57, %v1285_v5  ;;  %v1644_v48 = vadd.f32 %v9533_v57, %v1643_v20  ;;  %v1369_v59 = vmax.f32 %v9405_v40, %v1340_v11 }
 0x1ad   : > { %v8019_v47 = vpop.f32.mrf.mxu0  ;;  %v8083_v7 = vpop.f32.mrf.mxu1 }
 0x1ae   : > { %v1341_v22 = vmax.f32 %v1286_v21, 0.0  ;;  %1819 = vmatpush1.bf16.msra.mxu0 %v9479_v17  ;;  %1942 = vmatpush1.bf16.msra.mxu1 %v9479_v17  ;;  %v1699_v33 = vmax.f32 %v1644_v48, 0.0  ;;  %v1727_v40 = vmax.f32 %v1369_v59, %v1698_v41 }
 0x1af   : > { %v1290_v23 = vpop.f32.mrf.mxu0  ;;  %v1648_v24 = vpop.f32.mrf.mxu1  ;;  %1820 = vmatprep.subr.bf16.mxu0 %v8960_v34  ;;  %1943 = vmatprep.subr.bf16.mxu1 %v8960_v34 }
 0x1b0   : > { %v1370_v26 = vmax.f32 %v9409_v53, %v1341_v22  ;;  %v1291_v35 = vadd.f32 %v9533_v57, %v1290_v23  ;;  %v1649_v42 = vadd.f32 %v9533_v57, %v1648_v24 }
 0x1b1   : > { %v8022_v52 = vpop.f32.mrf.mxu0  ;;  %v8086_v16 = vpop.f32.mrf.mxu1 }
 0x1b2   : > { %v1728_v37 = vmax.f32 %v1370_v26, %v1699_v33  ;;  %v1342_v39 = vmax.f32 %v1291_v35, 0.0  ;;  %1821 = vmatpush1.bf16.msra.mxu0 %v9471_v43  ;;  %1944 = vmatpush1.bf16.msra.mxu1 %v9471_v43  ;;  %v1700_v38 = vmax.f32 %v1649_v42, 0.0 }
 0x1b3   : > { %v1293_v44 = vpop.f32.mrf.mxu0  ;;  %v1651_v45 = vpop.f32.mrf.mxu1  ;;  %1822 = vmatprep.subr.bf16.mxu0 %v8960_v34  ;;  %1945 = vmatprep.subr.bf16.mxu1 %v8960_v34 }
 0x1b4   : > { %v9564_v53 = vpack.c.bf16 %v1728_v37, %v1727_v40  ;;  %v1294_v49 = vadd.f32 %v9533_v57, %v1293_v44  ;;  %v1652_v50 = vadd.f32 %v9533_v57, %v1651_v45  ;;  %v1371_v6 = vmax.f32 %v9413_v3, %v1342_v39 }
 0x1b5   : > { %v8023_v28 = vpop.f32.mrf.mxu0  ;;  %v8087_v51 = vpop.f32.mrf.mxu1 }
 0x1b6   : > { %v1343_v55 = vmax.f32 %v1294_v49, 0.0  ;;  %1823 = vmatpush1.bf16.msra.mxu0 %v9455_v4  ;;  %1946 = vmatpush1.bf16.msra.mxu1 %v9455_v4  ;;  %v1701_v60 = vmax.f32 %v1652_v50, 0.0  ;;  %v1729_v3 = vmax.f32 %v1371_v6, %v1700_v38 }
 0x1b7   : > { %v1298_v18 = vpop.f32.mrf.mxu0  ;;  %v1656_v58 = vpop.f32.mrf.mxu1  ;;  %1824 = vmatprep.subr.bf16.mxu0 %v8960_v34  ;;  %1947 = vmatprep.subr.bf16.mxu1 %v8960_v34 }
 0x1b8   : > { %v1372_v27 = vmax.f32 %v9417_v19, %v1343_v55  ;;  %v1299_v61 = vadd.f32 %v9533_v57, %v1298_v18  ;;  %v1657_v9 = vadd.f32 %v9533_v57, %v1656_v58 }
 0x1b9   : > { %v8026_v63 = vpop.f32.mrf.mxu0  ;;  %v8090_v13 = vpop.f32.mrf.mxu1 }
 0x1ba   : > { %v1730_v2 = vmax.f32 %v1372_v27, %v1701_v60  ;;  %v1344_v8 = vmax.f32 %v1299_v61, 0.0  ;;  %1825 = vmatpush1.bf16.msra.mxu0 %v9447_v30  ;;  %1948 = vmatpush1.bf16.msra.mxu1 %v9447_v30  ;;  %v1702_v48 = vmax.f32 %v1657_v9, 0.0 }
 0x1bb   : > { %v1301_v36 = vpop.f32.mrf.mxu0  ;;  %v1659_v10 = vpop.f32.mrf.mxu1  ;;  %1828 = vmatprep.subr.bf16.mxu0 %v8960_v34  ;;  %1951 = vmatprep.subr.bf16.mxu1 %v8960_v34 }
 0x1bc   : > { %v9580_v19 = vpack.c.bf16 %v1730_v2, %v1729_v3  ;;  %v1302_v11 = vadd.f32 %v9533_v57, %v1301_v36  ;;  %v1660_v12 = vadd.f32 %v9533_v57, %v1659_v10  ;;  %v1373_v21 = vmax.f32 %v9421_v32, %v1344_v8 }
 0x1bd   : > { %v8027_v5 = vpop.f32.mrf.mxu0  ;;  %v8091_v20 = vpop.f32.mrf.mxu1  ;;  %v1806_v10 = vsel %vm1804_vm5, 65535, %v8960_v34 }
 0x1be   : > { %v1345_v47 = vmax.f32 %v1302_v11, 0.0  ;;  %v1703_v22 = vmax.f32 %v1660_v12, 0.0  ;;  %v1731_v33 = vmax.f32 %v1373_v21, %v1702_v48  ;;  %v8694_v12 = vld [vmem:[%s10901_s3] ss:$8 sps:$4 sm:$0xff]   ;;  %v8691_v5 = vld [vmem:[%s10901_s3 + $0x4c] ss:$8 sps:$4 sm:$0xff]  }
 0x1bf   : > { %v1306_v7 = vpop.f32.mrf.mxu0  ;;  %v1664_v59 = vpop.f32.mrf.mxu1  ;;  %v8697_v20 = vld [vmem:[%s10901_s3 + $0x14] ss:$8 sps:$4 sm:$0xff]   ;;  %v8693_v21 = vld [vmem:[%s10901_s3 + $0x48] ss:$8 sps:$4 sm:$0xff]  }
 0x1c0   : > { %v1374_v41 = vmax.f32 %v9425_v46, %v1345_v47  ;;  %v1307_v23 = vadd.f32 %v9533_v57, %v1306_v7  ;;  %v1665_v16 = vadd.f32 %v9533_v57, %v1664_v59  ;;  %v8699_v48 = vld [vmem:[%s10901_s3 + $0x10] ss:$8 sps:$4 sm:$0xff]   ;;  %v8700_v47 = vld [vmem:[%s10901_s3 + $0x5c] ss:$8 sps:$4 sm:$0xff]   ;;  %v7034_v59 = vld [vmem:[%s10901_s3 + $0x68] sm:$0x11] }
 0x1c1   : > { %v8030_v24 = vpop.f32.mrf.mxu0  ;;  %v8094_v26 = vpop.f32.mrf.mxu1  ;;  %v8705_v7 = vld [vmem:[%s10901_s3 + $0x24] ss:$8 sps:$4 sm:$0xff]  }
 0x1c2   : > { %v1732_v35 = vmax.f32 %v1374_v41, %v1703_v22  ;;  %v1346_v52 = vmax.f32 %v1307_v23, 0.0  ;;  %v1704_v49 = vmax.f32 %v1665_v16, 0.0  ;;  %v1757_v41 = vld [vmem:[%s10901_s3 + $0x30] sm:$0x11]  ;;  %v8702_v22 = vld [vmem:[%s10901_s3 + $0x58] ss:$8 sps:$4 sm:$0xff]   ;;  %v7042_v24 = vcombine.high %v7034_v59, %v7034_v59 }
 0x1c3   : > { %v1309_v40 = vpop.f32.mrf.mxu0  ;;  %v1667_v37 = vpop.f32.mrf.mxu1  ;;  %v8707_v23 = vld [vmem:[%s10901_s3 + $0x20] ss:$8 sps:$4 sm:$0xff]   ;;  %v7023_v26 = vcombine.high %v1757_v41, %v1757_v41 }
 0x1c4   : > { %v9588_v39 = vpack.c.bf16 %v1732_v35, %v1731_v33  ;;  %v1310_v32 = vadd.f32 %v9533_v57, %v1309_v40  ;;  %v1668_v42 = vadd.f32 %v9533_v57, %v1667_v37  ;;  %v1375_v45 = vmax.f32 %v9429_v62, %v1346_v52  ;;  %v8710_v52 = vld [vmem:[%s10902_s4 + $0x8] sm:$0xff]   ;;  %v8711_v16 = vld [vmem:[%s10902_s4] sm:$0xff]  }
 0x1c5   : > { %v8031_v44 = vpop.f32.mrf.mxu0  ;;  %v8095_v46 = vpop.f32.mrf.mxu1  ;;  %v7041_v33 = vcombine.low %v7034_v59, %v7034_v59  ;;  %v7022_v35 = vcombine.low %v1757_v41, %v1757_v41 }
 0x1c6   : > { %v1347_v50 = vmax.f32 %v1310_v32, 0.0  ;;  %v1705_v38 = vmax.f32 %v1668_v42, 0.0  ;;  %v1733_v60 = vmax.f32 %v1375_v45, %v1704_v49 }
 0x1c7   : > { %v1314_v28 = vpop.f32.mrf.mxu0  ;;  %v1672_v51 = vpop.f32.mrf.mxu1 }
 0x1c8   : > { %v1376_v6 = vmax.f32 %v9433_v14, %v1347_v50  ;;  %v1315_v55 = vadd.f32 %v9533_v57, %v1314_v28  ;;  %v1673_v18 = vadd.f32 %v9533_v57, %v1672_v51 }
 0x1c9   : > { %v8034_v58 = vpop.f32.mrf.mxu0  ;;  %v8098_v27 = vpop.f32.mrf.mxu1 }
 0x1ca   : > { %v1734_v61 = vmax.f32 %v1376_v6, %v1705_v38  ;;  %v1348_v63 = vmax.f32 %v1315_v55, 0.0  ;;  %v1706_v13 = vmax.f32 %v1673_v18, 0.0 }
 0x1cb   : > { %v1317_v3 = vpop.f32.mrf.mxu0  ;;  %v1675_v2 = vpop.f32.mrf.mxu1 }
 0x1cc   : > { %v9596_v62 = vpack.c.bf16 %v1734_v61, %v1733_v60  ;;  %v1377_v8 = vmax.f32 %v9437_v31, %v1348_v63  ;;  %v8688_v31 = vld [vmem:[%s10901_s3 + $0x38] ss:$8 sps:$4 sm:$0xff]  }
 0x1cd   : > { %v8035_v9 = vpop.f32.mrf.mxu0  ;;  %v8099_v14 = vpop.f32.mrf.mxu1 }
 0x1ce   : > { %v1735_v36 = vmax.f32 %v1377_v8, %v1706_v13 }
 0x1d0   : > { %v1750_v11 = vpack.c.bf16 %v1735_v36, %v1735_v36 }
 0x1d2   : > { %v9600_v57 = vand.u32 %v1806_v10, %v1750_v11 }
 0x1d4   : > { %1829 = vmatpush2.bf16.msra.mxu0 %v9600_v57  ;;  %1952 = vmatpush2.bf16.msra.mxu1 %v9600_v57 }
 0x1d5   : > { %1830 = vmatprep.subr.bf16.mxu0 %v8960_v34  ;;  %1953 = vmatprep.subr.bf16.mxu1 %v8960_v34 }
 0x1d8   : > { %1831 = vmatpush2.bf16.msra.mxu0 %v9596_v62  ;;  %1954 = vmatpush2.bf16.msra.mxu1 %v9596_v62 }
 0x1d9   : > { %1832 = vmatprep.subr.bf16.mxu0 %v8960_v34  ;;  %1955 = vmatprep.subr.bf16.mxu1 %v8960_v34 }
 0x1dc   : > { %1833 = vmatpush2.bf16.msra.mxu0 %v9588_v39  ;;  %1956 = vmatpush2.bf16.msra.mxu1 %v9588_v39 }
 0x1dd   : > { %1834 = vmatprep.subr.bf16.mxu0 %v8960_v34  ;;  %1957 = vmatprep.subr.bf16.mxu1 %v8960_v34 }
 0x1e0   : > { %1835 = vmatpush2.bf16.msra.mxu0 %v9580_v19  ;;  %1958 = vmatpush2.bf16.msra.mxu1 %v9580_v19 }
 0x1e1   : > { %1836 = vmatprep.subr.bf16.mxu0 %v8960_v34  ;;  %1959 = vmatprep.subr.bf16.mxu1 %v8960_v34 }
 0x1e4   : > { %1837 = vmatpush2.bf16.msra.mxu0 %v9564_v53  ;;  %1960 = vmatpush2.bf16.msra.mxu1 %v9564_v53 }
 0x1e5   : > { %1838 = vmatprep.subr.bf16.mxu0 %v8960_v34  ;;  %1961 = vmatprep.subr.bf16.mxu1 %v8960_v34 }
 0x1e8   : > { %1839 = vmatpush2.bf16.msra.mxu0 %v9548_v25  ;;  %1962 = vmatpush2.bf16.msra.mxu1 %v9548_v25 }
 0x1e9   : > { %1840 = vmatprep.subr.bf16.mxu0 %v8960_v34  ;;  %1963 = vmatprep.subr.bf16.mxu1 %v8960_v34 }
 0x1ec   : > { %1841 = vmatpush2.bf16.msra.mxu0 %v9527_v1  ;;  %1964 = vmatpush2.bf16.msra.mxu1 %v9527_v1 }
 0x1ed   : > { %8100 = vmatprep.subr.bf16.mxu0 %v8710_v52  ;;  %8110 = vmatprep.subr.bf16.mxu1 %v8711_v16 }
 0x1ef   : > { %1966 = vmatmul.mubr.bf16.vlgmr.msra.gmra.mxu1 %v8688_v31  ;;  %1843 = vmatmul.mubr.bf16.vlgmr.msra.gmra.mxu0 %v8694_v12 }
 0x1f0   : > { %7044 = vmatprep.mubr.msk.bf16.mxu1 %vm1791_vm4, %v8691_v5  ;;  %7025 = vmatprep.mubr.msk.bf16.mxu0 %vm1791_vm4, %v8697_v20  ;;  %v8714_v5 = vld [vmem:[%s10901_s3 + $0x74] ss:$8 sps:$4 sm:$0xff]  }
 0x1f1   : > { %8101 = vmatpush3.bf16.msra.mxu0 %v8710_v52  ;;  %8111 = vmatpush3.bf16.msra.mxu1 %v8711_v16  ;;  %v7065_v52 = vld [vmem:[%s10901_s3 + $0xa0] sm:$0x11]  ;;  %v8720_v16 = vld [vmem:[%s10901_s3 + $0x90] ss:$8 sps:$4 sm:$0xff]  }
 0x1f2   : > { %2222 = vmatprep.subr.bf16.mxu0 %v8960_v34 }
 0x1f7   : > { %1974 = vmatmul.mubr.bf16.gmra.mxu1 %v8693_v21  ;;  %1851 = vmatmul.mubr.bf16.gmra.mxu0 %v8699_v48 }
 0x1f8   : > { %7045 = vmatprep.mubr.msk.bf16.mxu1 %vm1791_vm4, %v8700_v47  ;;  %7026 = vmatprep.mubr.msk.bf16.mxu0 %vm1791_vm4, %v8705_v7 }
 0x1ff   : > { %1982 = vmatmul.mubr.bf16.gmra.mxu1 %v8702_v22  ;;  %1859 = vmatmul.mubr.bf16.gmra.mxu0 %v8707_v23 }
 0x200   : > { %7046 = vmatprep.mubr.msk.bf16.mxu1 %vm1791_vm4, %v7042_v24  ;;  %7027 = vmatprep.mubr.msk.bf16.mxu0 %vm1791_vm4, %v7023_v26  ;;  %v8712_v24 = vld [vmem:[%s10901_s3 + $0x70] ss:$8 sps:$4 sm:$0xff]   ;;  %v8715_v26 = vld [vmem:[%s10901_s3 + $0x84] ss:$8 sps:$4 sm:$0xff]  }
 0x207   : > { %1990 = vmatmul.mubr.bf16.gmra.mxu1 %v7041_v33  ;;  %1867 = vmatmul.mubr.bf16.gmra.mxu0 %v7022_v35  ;;  %v8717_v33 = vld [vmem:[%s10901_s3 + $0x80] ss:$8 sps:$4 sm:$0xff]   ;;  %v8718_v35 = vld [vmem:[%s10901_s3 + $0x94] ss:$8 sps:$4 sm:$0xff]  }
 0x2af   : > { %v1967_v40 = vpop.f32.mrf.mxu1  ;;  %v1844_v37 = vpop.f32.mrf.mxu0 }
 0x2b1   : > { %v1969_v32 = vpop.f32.mrf.mxu1  ;;  %v1846_v42 = vpop.f32.mrf.mxu0 }
 0x2b2   : > { %v8723_v32 = vld [vmem:[%s10902_s4 + $0x10] sm:$0xff]  }
 0x2b3   : > { %v1970_v44 = vpop.f32.mrf.mxu1  ;;  %v1847_v46 = vpop.f32.mrf.mxu0  ;;  %8120 = vmatprep.subr.bf16.mxu1 %v8723_v32 }
 0x2b4   : > { %v1997_v45 = vpack.c.bf16 %v1970_v44, %v1967_v40  ;;  %v1874_v49 = vpack.c.bf16 %v1847_v46, %v1844_v37  ;;  %v7073_v40 = vcombine.high %v7065_v52, %v7065_v52  ;;  %v7072_v37 = vcombine.low %v7065_v52, %v7065_v52  ;;  %v8727_v52 = vld [vmem:[%s10901_s3 + $0xbc] ss:$8 sps:$4 sm:$0xff]  }
 0x2b5   : > { %v1972_v50 = vpop.f32.mrf.mxu1  ;;  %v1849_v28 = vpop.f32.mrf.mxu0 }
 0x2b6   : > { %8102 = vmatprep.mubr.msk.bf16.mxu0 %vm2010_vm6, %v1997_v45  ;;  %8112 = vmatprep.mubr.msk.bf16.mxu1 %vm2010_vm6, %v1874_v49 }
 0x2b7   : > { %v1975_v51 = vpop.f32.mrf.mxu1  ;;  %v1852_v6 = vpop.f32.mrf.mxu0 }
 0x2b9   : > { %v1977_v38 = vpop.f32.mrf.mxu1  ;;  %v1854_v55 = vpop.f32.mrf.mxu0 }
 0x2bb   : > { %v1978_v18 = vpop.f32.mrf.mxu1  ;;  %v1855_v58 = vpop.f32.mrf.mxu0 }
 0x2bc   : > { %v1998_v27 = vpack.c.bf16 %v1978_v18, %v1975_v51  ;;  %v1875_v60 = vpack.c.bf16 %v1855_v58, %v1852_v6 }
 0x2bd   : > { %v1980_v61 = vpop.f32.mrf.mxu1  ;;  %v1857_v63 = vpop.f32.mrf.mxu0 }
 0x2be   : > { %8103 = vmatmul.mubr.msk.bf16.vlgmr.msra.gmra.mxu0 %vm2010_vm6, %v1998_v27  ;;  %8113 = vmatmul.mubr.msk.bf16.vlgmr.msra.gmra.mxu1 %vm2010_vm6, %v1875_v60 }
 0x2bf   : > { %2223 = vmatpush1.bf16.msra.mxu0 %v9511_v29  ;;  %v1983_v13 = vpop.f32.mrf.mxu1  ;;  %v1860_v3 = vpop.f32.mrf.mxu0  ;;  %8121 = vmatpush3.bf16.msra.mxu1 %v8723_v32  ;;  %v8732_v32 = vld [vmem:[%s10901_s3 + $0xc8] ss:$8 sps:$4 sm:$0xff]  }
 0x2c0   : > { %2224 = vmatprep.subr.bf16.mxu0 %v8960_v34  ;;  %2435 = vmatprep.subr.bf16.mxu1 %v8960_v34 }
 0x2c1   : > { %v1985_v2 = vpop.f32.mrf.mxu1  ;;  %v1862_v8 = vpop.f32.mrf.mxu0 }
 0x2c3   : > { %2225 = vmatpush1.bf16.msra.mxu0 %v9503_v54  ;;  %v1986_v9 = vpop.f32.mrf.mxu1  ;;  %v1863_v14 = vpop.f32.mrf.mxu0 }
 0x2c4   : > { %2226 = vmatprep.subr.bf16.mxu0 %v8960_v34  ;;  %v1999_v36 = vpack.c.bf16 %v1986_v9, %v1983_v13  ;;  %v1876_v10 = vpack.c.bf16 %v1863_v14, %v1860_v3 }
 0x2c5   : > { %v1988_v11 = vpop.f32.mrf.mxu1  ;;  %v1865_v31 = vpop.f32.mrf.mxu0 }
 0x2c6   : > { %8106 = vmatprep.mubr.msk.bf16.mxu0 %vm2010_vm6, %v1999_v36  ;;  %8116 = vmatprep.mubr.msk.bf16.mxu1 %vm2010_vm6, %v1876_v10 }
 0x2c7   : > { %2227 = vmatpush1.bf16.msra.mxu0 %v9495_v15  ;;  %v1991_v12 = vpop.f32.mrf.mxu1  ;;  %v1868_v20 = vpop.f32.mrf.mxu0 }
 0x2c8   : > { %2228 = vmatprep.subr.bf16.mxu0 %v8960_v34  ;;  %v2000_v21 = vpack.c.bf16 %v1991_v12, %v1991_v12  ;;  %v1877_v48 = vpack.c.bf16 %v1868_v20, %v1868_v20 }
 0x2c9   : > { %v1993_v47 = vpop.f32.mrf.mxu1  ;;  %v1870_v7 = vpop.f32.mrf.mxu0 }
 0x2ca   : > { %8107 = vmatmul.mubr.msk.bf16.gmra.mxu0 %vm2010_vm6, %v2000_v21  ;;  %8117 = vmatmul.mubr.msk.bf16.gmra.mxu1 %vm2010_vm6, %v1877_v48 }
 0x2cb   : > { %2229 = vmatpush1.bf16.msra.mxu0 %v9487_v56  ;;  %7074 = vmatprep.mubr.msk.bf16.mxu0 %vm1791_vm4, %v8714_v5  ;;  %v1994_v59 = vpop.f32.mrf.mxu1  ;;  %v1871_v41 = vpop.f32.mrf.mxu0 }
 0x2cc   : > { %2230 = vmatprep.subr.bf16.mxu0 %v8960_v34 }
 0x2cd   : > { %v1995_v22 = vpop.f32.mrf.mxu1  ;;  %v1872_v23 = vpop.f32.mrf.mxu0 }
 0x2ce   : > { %v8726_v22 = vld [vmem:[%s10901_s3 + $0xac] ss:$8 sps:$4 sm:$0xff]  }
 0x2cf   : > { %2231 = vmatpush1.bf16.msra.mxu0 %v9479_v17 }
 0x2d0   : > { %2232 = vmatprep.subr.bf16.mxu0 %v8960_v34 }
 0x2d3   : > { %2233 = vmatpush1.bf16.msra.mxu0 %v9471_v43 }
 0x2d4   : > { %2234 = vmatprep.subr.bf16.mxu0 %v8960_v34 }
 0x2d7   : > { %2235 = vmatpush1.bf16.msra.mxu0 %v9455_v4 }
 0x2d8   : > { %2236 = vmatprep.subr.bf16.mxu0 %v8960_v34 }
 0x2db   : > { %2237 = vmatpush1.bf16.msra.mxu0 %v9447_v30 }
 0x2dc   : > { %2240 = vmatprep.subr.bf16.mxu0 %v8960_v34 }
 0x2df   : > { %2241 = vmatpush2.bf16.msra.mxu0 %v9600_v57 }
 0x2e0   : > { %2242 = vmatprep.subr.bf16.mxu0 %v8960_v34 }
 0x2e3   : > { %2243 = vmatpush2.bf16.msra.mxu0 %v9596_v62 }
 0x2e4   : > { %2244 = vmatprep.subr.bf16.mxu0 %v8960_v34 }
 0x2e7   : > { %2245 = vmatpush2.bf16.msra.mxu0 %v9588_v39 }
 0x2e8   : > { %2246 = vmatprep.subr.bf16.mxu0 %v8960_v34 }
 0x2eb   : > { %2247 = vmatpush2.bf16.msra.mxu0 %v9580_v19 }
 0x2ec   : > { %2248 = vmatprep.subr.bf16.mxu0 %v8960_v34 }
 0x2ef   : > { %2249 = vmatpush2.bf16.msra.mxu0 %v9564_v53 }
 0x2f0   : > { %2250 = vmatprep.subr.bf16.mxu0 %v8960_v34 }
 0x2f3   : > { %2251 = vmatpush2.bf16.msra.mxu0 %v9548_v25 }
 0x2f4   : > { %2252 = vmatprep.subr.bf16.mxu0 %v8960_v34 }
 0x2f7   : > { %2253 = vmatpush2.bf16.msra.mxu0 %v9527_v1 }
 0x2fa   : > { %2255 = vmatmul.mubr.bf16.vlgmr.msra.gmra.mxu0 %v8712_v24 }
 0x2fb   : > { %7075 = vmatprep.mubr.msk.bf16.mxu0 %vm1791_vm4, %v8715_v26 }
 0x302   : > { %2263 = vmatmul.mubr.bf16.gmra.mxu0 %v8717_v33 }
 0x303   : > { %7076 = vmatprep.mubr.msk.bf16.mxu0 %vm1791_vm4, %v8718_v35  ;;  %v8724_v35 = vld [vmem:[%s10901_s3 + $0xa8] ss:$8 sps:$4 sm:$0xff]  }
 0x30a   : > { %2271 = vmatmul.mubr.bf16.gmra.mxu0 %v8720_v16  ;;  %v8729_v16 = vld [vmem:[%s10901_s3 + $0xb8] ss:$8 sps:$4 sm:$0xff]  }
 0x30b   : > { %7077 = vmatprep.mubr.msk.bf16.mxu0 %vm1791_vm4, %v7073_v40  ;;  %v8730_v40 = vld [vmem:[%s10901_s3 + $0xcc] ss:$8 sps:$4 sm:$0xff]  }
 0x312   : > { %2279 = vmatmul.mubr.bf16.gmra.mxu0 %v7072_v37  ;;  %v7091_v37 = vld [vmem:[%s10901_s3 + $0xd8] sm:$0x11] }
 0x37e   : > { %v8104_v42 = vpop.f32.mrf.mxu0  ;;  %v8114_v44 = vpop.f32.mrf.mxu1 }
 0x37f   : > { %v9743_v46 = vadd.f32 %v8114_v44, %v8104_v42  ;;  %v7099_v42 = vcombine.high %v7091_v37, %v7091_v37  ;;  %v7098_v44 = vcombine.low %v7091_v37, %v7091_v37 }
 0x380   : > { %v2057_v45 = vpop.f32.mrf.mxu0  ;;  %v2139_v49 = vpop.f32.mrf.mxu1 }
 0x381   : > { %v9745_v50 = vadd.f32 %v2139_v49, %v2057_v45  ;;  %v8737_v45 = vld [vmem:[%s10901_s3 + $0xe4] ss:$8 sps:$4 sm:$0xff]   ;;  %v8735_v49 = vld [vmem:[%s10901_s3 + $0xe0] ss:$8 sps:$4 sm:$0xff]  }
 0x382   : > { %v8105_v28 = vpop.f32.mrf.mxu0  ;;  %v8115_v51 = vpop.f32.mrf.mxu1 }
 0x383   : > { %v9747_v6 = vadd.f32 %v8115_v51, %v8105_v28  ;;  %v8738_v28 = vld [vmem:[%s10901_s3 + $0xf4] ss:$8 sps:$4 sm:$0xff]   ;;  %v8740_v51 = vld [vmem:[%s10901_s3 + $0xf0] ss:$8 sps:$4 sm:$0xff]  }
 0x384   : > { %v9749_v38 = vpop.f32.mrf.mxu0  ;;  %v9751_v55 = vpop.f32.mrf.mxu1 }
 0x38a   : > { %v8108_v18 = vpop.f32.mrf.mxu0  ;;  %v8118_v58 = vpop.f32.mrf.mxu1 }
 0x38b   : > { %v9753_v27 = vadd.f32 %v8118_v58, %v8108_v18  ;;  %v8741_v18 = vld [vmem:[%s10901_s3 + $0x104] ss:$8 sps:$4 sm:$0xff]   ;;  %v7117_v58 = vld [vmem:[%s10901_s3 + $0x110] sm:$0x11] }
 0x38c   : > { %v2073_v60 = vpop.f32.mrf.mxu0  ;;  %v2155_v61 = vpop.f32.mrf.mxu1 }
 0x38d   : > { %v9755_v63 = vadd.f32 %v2155_v61, %v2073_v60  ;;  %v8743_v60 = vld [vmem:[%s10901_s3 + $0x100] ss:$8 sps:$4 sm:$0xff]   ;;  %v7125_v61 = vcombine.high %v7117_v58, %v7117_v58 }
 0x38e   : > { %v8109_v13 = vpop.f32.mrf.mxu0  ;;  %v8119_v3 = vpop.f32.mrf.mxu1 }
 0x38f   : > { %v8746_v13 = vld [vmem:[%s10902_s4 + $0x18] sm:$0xff]   ;;  %v7124_v3 = vcombine.low %v7117_v58, %v7117_v58 }
 0x390   : > { %v9757_v2 = vpop.f32.mrf.mxu0  ;;  %8130 = vmatprep.subr.bf16.mxu0 %v8746_v13 }
 0x391   : > { %8131 = vmatpush3.bf16.msra.mxu0 %v8746_v13 }
 0x3ba   : > { %v2256_v8 = vpop.f32.mrf.mxu0 }
 0x3bc   : > { %v2258_v9 = vpop.f32.mrf.mxu0 }
 0x3be   : > { %v2259_v14 = vpop.f32.mrf.mxu0 }
 0x3bf   : > { %v2286_v36 = vpack.c.bf16 %v2259_v14, %v2256_v8  ;;  %v9875_v8 = vpop.f32.mrf.mxu1  ;;  %v8747_v14 = vld [vmem:[%s10902_s4 + $0x20] sm:$0xff]  }
 0x3c0   : > { %v2261_v10 = vpop.f32.mrf.mxu0  ;;  %8140 = vmatprep.subr.bf16.mxu0 %v8747_v14 }
 0x3c1   : > { %8122 = vmatprep.mubr.msk.bf16.mxu1 %vm2010_vm6, %v2286_v36 }
 0x3c2   : > { %v2264_v11 = vpop.f32.mrf.mxu0 }
 0x3c4   : > { %v2266_v31 = vpop.f32.mrf.mxu0 }
 0x3c6   : > { %v2267_v12 = vpop.f32.mrf.mxu0 }
 0x3c7   : > { %v2287_v5 = vpack.c.bf16 %v2267_v12, %v2264_v11 }
 0x3c8   : > { %v2269_v20 = vpop.f32.mrf.mxu0 }
 0x3c9   : > { %8123 = vmatmul.mubr.msk.bf16.vlgmr.msra.gmra.mxu1 %vm2010_vm6, %v2287_v5 }
 0x3ca   : > { %2436 = vmatpush1.bf16.msra.mxu1 %v9511_v29  ;;  %v2272_v21 = vpop.f32.mrf.mxu0 }
 0x3cb   : > { %2437 = vmatprep.subr.bf16.mxu1 %v8960_v34 }
 0x3cc   : > { %v2274_v48 = vpop.f32.mrf.mxu0 }
 0x3ce   : > { %2438 = vmatpush1.bf16.msra.mxu1 %v9503_v54  ;;  %v2275_v47 = vpop.f32.mrf.mxu0 }
 0x3cf   : > { %v2288_v7 = vpack.c.bf16 %v2275_v47, %v2272_v21  ;;  %2439 = vmatprep.subr.bf16.mxu1 %v8960_v34 }
 0x3d0   : > { %v2277_v59 = vpop.f32.mrf.mxu0 }
 0x3d1   : > { %8126 = vmatprep.mubr.msk.bf16.mxu1 %vm2010_vm6, %v2288_v7 }
 0x3d2   : > { %2440 = vmatpush1.bf16.msra.mxu1 %v9495_v15  ;;  %v2280_v41 = vpop.f32.mrf.mxu0 }
 0x3d3   : > { %v2289_v23 = vpack.c.bf16 %v2280_v41, %v2280_v41  ;;  %2441 = vmatprep.subr.bf16.mxu1 %v8960_v34 }
 0x3d4   : > { %v2282_v24 = vpop.f32.mrf.mxu0 }
 0x3d5   : > { %8127 = vmatmul.mubr.msk.bf16.gmra.mxu1 %vm2010_vm6, %v2289_v23 }
 0x3d6   : > { %2442 = vmatpush1.bf16.msra.mxu1 %v9487_v56  ;;  %7100 = vmatprep.mubr.msk.bf16.mxu1 %vm1791_vm4, %v8726_v22  ;;  %v2283_v26 = vpop.f32.mrf.mxu0 }
 0x3d7   : > { %2443 = vmatprep.subr.bf16.mxu1 %v8960_v34 }
 0x3d8   : > { %v2284_v33 = vpop.f32.mrf.mxu0 }
 0x3da   : > { %2444 = vmatpush1.bf16.msra.mxu1 %v9479_v17 }
 0x3db   : > { %2445 = vmatprep.subr.bf16.mxu1 %v8960_v34 }
 0x3de   : > { %2446 = vmatpush1.bf16.msra.mxu1 %v9471_v43 }
 0x3df   : > { %2447 = vmatprep.subr.bf16.mxu1 %v8960_v34 }
 0x3e2   : > { %2448 = vmatpush1.bf16.msra.mxu1 %v9455_v4 }
 0x3e3   : > { %2449 = vmatprep.subr.bf16.mxu1 %v8960_v34 }
 0x3e6   : > { %2450 = vmatpush1.bf16.msra.mxu1 %v9447_v30 }
 0x3e7   : > { %2453 = vmatprep.subr.bf16.mxu1 %v8960_v34 }
 0x3ea   : > { %2454 = vmatpush2.bf16.msra.mxu1 %v9600_v57 }
 0x3eb   : > { %2455 = vmatprep.subr.bf16.mxu1 %v8960_v34 }
 0x3ee   : > { %2456 = vmatpush2.bf16.msra.mxu1 %v9596_v62 }
 0x3ef   : > { %2457 = vmatprep.subr.bf16.mxu1 %v8960_v34 }
 0x3f2   : > { %2458 = vmatpush2.bf16.msra.mxu1 %v9588_v39 }
 0x3f3   : > { %2459 = vmatprep.subr.bf16.mxu1 %v8960_v34 }
 0x3f6   : > { %2460 = vmatpush2.bf16.msra.mxu1 %v9580_v19 }
 0x3f7   : > { %2461 = vmatprep.subr.bf16.mxu1 %v8960_v34 }
 0x3fa   : > { %2462 = vmatpush2.bf16.msra.mxu1 %v9564_v53 }
 0x3fb   : > { %2463 = vmatprep.subr.bf16.mxu1 %v8960_v34 }
 0x3fe   : > { %2464 = vmatpush2.bf16.msra.mxu1 %v9548_v25 }
 0x3ff   : > { %2465 = vmatprep.subr.bf16.mxu1 %v8960_v34 }
 0x402   : > { %2466 = vmatpush2.bf16.msra.mxu1 %v9527_v1 }
 0x403   : > { %2648 = vmatprep.subr.bf16.mxu1 %v8960_v34 }
 0x405   : > { %2468 = vmatmul.mubr.bf16.vlgmr.msra.gmra.mxu1 %v8724_v35 }
 0x406   : > { %2649 = vmatpush1.bf16.msra.mxu1 %v9511_v29  ;;  %7101 = vmatprep.mubr.msk.bf16.mxu1 %vm1791_vm4, %v8727_v52 }
 0x407   : > { %2650 = vmatprep.subr.bf16.mxu1 %v8960_v34 }
 0x40a   : > { %2651 = vmatpush1.bf16.msra.mxu1 %v9503_v54 }
 0x40b   : > { %2652 = vmatprep.subr.bf16.mxu1 %v8960_v34 }
 0x40d   : > { %2476 = vmatmul.mubr.bf16.gmra.mxu1 %v8729_v16 }
 0x40e   : > { %2653 = vmatpush1.bf16.msra.mxu1 %v9495_v15  ;;  %7102 = vmatprep.mubr.msk.bf16.mxu1 %vm1791_vm4, %v8730_v40 }
 0x40f   : > { %2654 = vmatprep.subr.bf16.mxu1 %v8960_v34 }
 0x412   : > { %2655 = vmatpush1.bf16.msra.mxu1 %v9487_v56 }
 0x413   : > { %2656 = vmatprep.subr.bf16.mxu1 %v8960_v34 }
 0x415   : > { %2484 = vmatmul.mubr.bf16.gmra.mxu1 %v8732_v32 }
 0x416   : > { %2657 = vmatpush1.bf16.msra.mxu1 %v9479_v17  ;;  %7103 = vmatprep.mubr.msk.bf16.mxu1 %vm1791_vm4, %v7099_v42 }
 0x417   : > { %2658 = vmatprep.subr.bf16.mxu1 %v8960_v34 }
 0x41a   : > { %2659 = vmatpush1.bf16.msra.mxu1 %v9471_v43 }
 0x41b   : > { %2660 = vmatprep.subr.bf16.mxu1 %v8960_v34 }
 0x41d   : > { %2492 = vmatmul.mubr.bf16.gmra.mxu1 %v7098_v44 }
 0x41e   : > { %2661 = vmatpush1.bf16.msra.mxu1 %v9455_v4  ;;  %7126 = vmatprep.mubr.msk.bf16.mxu1 %vm1791_vm4, %v8737_v45 }
 0x41f   : > { %2662 = vmatprep.subr.bf16.mxu1 %v8960_v34 }
 0x422   : > { %2663 = vmatpush1.bf16.msra.mxu1 %v9447_v30 }
 0x423   : > { %2666 = vmatprep.subr.bf16.mxu1 %v8960_v34 }
 0x426   : > { %2667 = vmatpush2.bf16.msra.mxu1 %v9600_v57 }
 0x427   : > { %2668 = vmatprep.subr.bf16.mxu1 %v8960_v34 }
 0x42a   : > { %2669 = vmatpush2.bf16.msra.mxu1 %v9596_v62 }
 0x42b   : > { %2670 = vmatprep.subr.bf16.mxu1 %v8960_v34 }
 0x42e   : > { %2671 = vmatpush2.bf16.msra.mxu1 %v9588_v39 }
 0x42f   : > { %2672 = vmatprep.subr.bf16.mxu1 %v8960_v34 }
 0x432   : > { %2673 = vmatpush2.bf16.msra.mxu1 %v9580_v19 }
 0x433   : > { %2674 = vmatprep.subr.bf16.mxu1 %v8960_v34 }
 0x436   : > { %2675 = vmatpush2.bf16.msra.mxu1 %v9564_v53 }
 0x437   : > { %2676 = vmatprep.subr.bf16.mxu1 %v8960_v34 }
 0x43a   : > { %2677 = vmatpush2.bf16.msra.mxu1 %v9548_v25 }
 0x43b   : > { %2678 = vmatprep.subr.bf16.mxu1 %v8960_v34 }
 0x43e   : > { %2679 = vmatpush2.bf16.msra.mxu1 %v9527_v1 }
 0x441   : > { %2681 = vmatmul.mubr.bf16.vlgmr.msra.gmra.mxu1 %v8735_v49 }
 0x442   : > { %7127 = vmatprep.mubr.msk.bf16.mxu1 %vm1791_vm4, %v8738_v28 }
 0x449   : > { %2689 = vmatmul.mubr.bf16.gmra.mxu1 %v8740_v51 }
 0x44a   : > { %7128 = vmatprep.mubr.msk.bf16.mxu1 %vm1791_vm4, %v8741_v18 }
 0x451   : > { %2697 = vmatmul.mubr.bf16.gmra.mxu1 %v8743_v60 }
 0x452   : > { %7129 = vmatprep.mubr.msk.bf16.mxu1 %vm1791_vm4, %v7125_v61 }
 0x459   : > { %2705 = vmatmul.mubr.bf16.gmra.mxu1 %v7124_v3 }
 0x489   : > { %v8124_v9 = vpop.f32.mrf.mxu1 }
 0x48a   : > { %v9881_v36 = vadd.f32 %v8124_v9, %v9743_v46 }
 0x48b   : > { %v2345_v10 = vpop.f32.mrf.mxu1 }
 0x48c   : > { %v9884_v11 = vadd.f32 %v2345_v10, %v9745_v50 }
 0x48d   : > { %v8125_v31 = vpop.f32.mrf.mxu1 }
 0x48e   : > { %v9887_v12 = vadd.f32 %v8125_v31, %v9747_v6 }
 0x48f   : > { %v9889_v5 = vpop.f32.mrf.mxu1 }
 0x495   : > { %v8128_v20 = vpop.f32.mrf.mxu1 }
 0x496   : > { %v9892_v21 = vadd.f32 %v8128_v20, %v9753_v27 }
 0x497   : > { %v2361_v48 = vpop.f32.mrf.mxu1 }
 0x498   : > { %v9895_v47 = vadd.f32 %v2361_v48, %v9755_v63 }
 0x499   : > { %v8129_v46 = vpop.f32.mrf.mxu1 }
 0x49b   : > { %v9897_v7 = vpop.f32.mrf.mxu1 }
 0x4c5   : > { %v2469_v59 = vpop.f32.mrf.mxu1 }
 0x4c7   : > { %v2471_v50 = vpop.f32.mrf.mxu1 }
 0x4c9   : > { %v2472_v41 = vpop.f32.mrf.mxu1 }
 0x4ca   : > { %v2499_v22 = vpack.c.bf16 %v2472_v41, %v2469_v59  ;;  %v8750_v59 = vld [vmem:[%s10901_s3 + $0x11c] ss:$8 sps:$4 sm:$0xff]  }
 0x4cb   : > { %v2474_v23 = vpop.f32.mrf.mxu1 }
 0x4cc   : > { %8132 = vmatprep.mubr.msk.bf16.mxu0 %vm2010_vm6, %v2499_v22 }
 0x4cd   : > { %v2477_v6 = vpop.f32.mrf.mxu1 }
 0x4cf   : > { %v2479_v24 = vpop.f32.mrf.mxu1 }
 0x4d0   : > { %v8751_v24 = vld [vmem:[%s10901_s3 + $0x12c] ss:$8 sps:$4 sm:$0xff]  }
 0x4d1   : > { %v2480_v26 = vpop.f32.mrf.mxu1 }
 0x4d2   : > { %v2500_v33 = vpack.c.bf16 %v2480_v26, %v2477_v6  ;;  %v8748_v6 = vld [vmem:[%s10901_s3 + $0x118] ss:$8 sps:$4 sm:$0xff]   ;;  %v8753_v26 = vld [vmem:[%s10901_s3 + $0x128] ss:$8 sps:$4 sm:$0xff]  }
 0x4d3   : > { %v2482_v27 = vpop.f32.mrf.mxu1 }
 0x4d4   : > { %8133 = vmatmul.mubr.msk.bf16.vlgmr.msra.gmra.mxu0 %vm2010_vm6, %v2500_v33  ;;  %v8754_v33 = vld [vmem:[%s10901_s3 + $0x13c] ss:$8 sps:$4 sm:$0xff]   ;;  %v7143_v27 = vld [vmem:[%s10901_s3 + $0x148] sm:$0x11] }
 0x4d5   : > { %v2485_v35 = vpop.f32.mrf.mxu1  ;;  %8141 = vmatpush3.bf16.msra.mxu0 %v8747_v14 }
 0x4d6   : > { %2861 = vmatprep.subr.bf16.mxu0 %v8960_v34 }
 0x4d7   : > { %v2487_v63 = vpop.f32.mrf.mxu1 }
 0x4d8   : > { %v7151_v63 = vcombine.high %v7143_v27, %v7143_v27 }
 0x4d9   : > { %v2488_v52 = vpop.f32.mrf.mxu1 }
 0x4da   : > { %v2501_v16 = vpack.c.bf16 %v2488_v52, %v2485_v35  ;;  %v8756_v35 = vld [vmem:[%s10901_s3 + $0x138] ss:$8 sps:$4 sm:$0xff]   ;;  %v7150_v52 = vcombine.low %v7143_v27, %v7143_v27 }
 0x4db   : > { %v2490_v40 = vpop.f32.mrf.mxu1 }
 0x4dc   : > { %8136 = vmatprep.mubr.msk.bf16.mxu0 %vm2010_vm6, %v2501_v16  ;;  %v8761_v16 = vld [vmem:[%s10901_s3 + $0x154] ss:$8 sps:$4 sm:$0xff]   ;;  %v8759_v40 = vld [vmem:[%s10901_s3 + $0x150] ss:$8 sps:$4 sm:$0xff]  }
 0x4dd   : > { %v2493_v37 = vpop.f32.mrf.mxu1 }
 0x4de   : > { %v2502_v32 = vpack.c.bf16 %v2493_v37, %v2493_v37  ;;  %v8762_v37 = vld [vmem:[%s10901_s3 + $0x164] ss:$8 sps:$4 sm:$0xff]  }
 0x4df   : > { %v2495_v42 = vpop.f32.mrf.mxu1 }
 0x4e0   : > { %8137 = vmatmul.mubr.msk.bf16.gmra.mxu0 %vm2010_vm6, %v2502_v32  ;;  %v8764_v32 = vld [vmem:[%s10901_s3 + $0x160] ss:$8 sps:$4 sm:$0xff]   ;;  %v8765_v42 = vld [vmem:[%s10901_s3 + $0x174] ss:$8 sps:$4 sm:$0xff]  }
 0x4e1   : > { %v2496_v44 = vpop.f32.mrf.mxu1 }
 0x4e2   : > { %v7169_v44 = vld [vmem:[%s10901_s3 + $0x180] sm:$0x11] }
 0x4e3   : > { %v2497_v45 = vpop.f32.mrf.mxu1 }
 0x501   : > { %v2682_v49 = vpop.f32.mrf.mxu1 }
 0x503   : > { %v2684_v28 = vpop.f32.mrf.mxu1 }
 0x505   : > { %v2685_v51 = vpop.f32.mrf.mxu1 }
 0x506   : > { %v2712_v18 = vpack.c.bf16 %v2685_v51, %v2682_v49  ;;  %v8767_v49 = vld [vmem:[%s10901_s3 + $0x170] ss:$8 sps:$4 sm:$0xff]   ;;  %v7177_v51 = vcombine.high %v7169_v44, %v7169_v44 }
 0x507   : > { %v2687_v58 = vpop.f32.mrf.mxu1 }
 0x508   : > { %8142 = vmatprep.mubr.msk.bf16.mxu0 %vm2010_vm6, %v2712_v18  ;;  %v8770_v18 = vld [vmem:[%s10902_s4 + $0x28] sm:$0xff]  }
 0x509   : > { %v2690_v60 = vpop.f32.mrf.mxu1  ;;  %8150 = vmatprep.subr.bf16.mxu1 %v8770_v18 }
 0x50a   : > { %8151 = vmatpush3.bf16.msra.mxu1 %v8770_v18 }
 0x50b   : > { %v2692_v61 = vpop.f32.mrf.mxu1 }
 0x50d   : > { %v2693_v13 = vpop.f32.mrf.mxu1 }
 0x50e   : > { %v2713_v3 = vpack.c.bf16 %v2693_v13, %v2690_v60 }
 0x50f   : > { %v2695_v9 = vpop.f32.mrf.mxu1 }
 0x510   : > { %8143 = vmatmul.mubr.msk.bf16.vlgmr.msra.gmra.mxu0 %vm2010_vm6, %v2713_v3  ;;  %v7176_v3 = vcombine.low %v7169_v44, %v7169_v44 }
 0x511   : > { %2862 = vmatpush1.bf16.msra.mxu0 %v9511_v29  ;;  %v2698_v14 = vpop.f32.mrf.mxu1 }
 0x512   : > { %2863 = vmatprep.subr.bf16.mxu0 %v8960_v34 }
 0x513   : > { %v2700_v10 = vpop.f32.mrf.mxu1 }
 0x515   : > { %2864 = vmatpush1.bf16.msra.mxu0 %v9503_v54  ;;  %v2701_v31 = vpop.f32.mrf.mxu1 }
 0x516   : > { %v2714_v20 = vpack.c.bf16 %v2701_v31, %v2698_v14  ;;  %2865 = vmatprep.subr.bf16.mxu0 %v8960_v34 }
 0x517   : > { %v2703_v48 = vpop.f32.mrf.mxu1 }
 0x518   : > { %8146 = vmatprep.mubr.msk.bf16.mxu0 %vm2010_vm6, %v2714_v20 }
 0x519   : > { %2866 = vmatpush1.bf16.msra.mxu0 %v9495_v15  ;;  %v2706_v46 = vpop.f32.mrf.mxu1 }
 0x51a   : > { %v2715_v50 = vpack.c.bf16 %v2706_v46, %v2706_v46  ;;  %2867 = vmatprep.subr.bf16.mxu0 %v8960_v34 }
 0x51b   : > { %v2708_v41 = vpop.f32.mrf.mxu1 }
 0x51c   : > { %8147 = vmatmul.mubr.msk.bf16.gmra.mxu0 %vm2010_vm6, %v2715_v50 }
 0x51d   : > { %2868 = vmatpush1.bf16.msra.mxu0 %v9487_v56  ;;  %7152 = vmatprep.mubr.msk.bf16.mxu0 %vm1791_vm4, %v8750_v59  ;;  %v2709_v22 = vpop.f32.mrf.mxu1 }
 0x51e   : > { %2869 = vmatprep.subr.bf16.mxu0 %v8960_v34 }
 0x51f   : > { %v2710_v23 = vpop.f32.mrf.mxu1 }
 0x521   : > { %2870 = vmatpush1.bf16.msra.mxu0 %v9479_v17 }
 0x522   : > { %2871 = vmatprep.subr.bf16.mxu0 %v8960_v34 }
 0x525   : > { %2872 = vmatpush1.bf16.msra.mxu0 %v9471_v43 }
 0x526   : > { %2873 = vmatprep.subr.bf16.mxu0 %v8960_v34 }
 0x529   : > { %2874 = vmatpush1.bf16.msra.mxu0 %v9455_v4 }
 0x52a   : > { %2875 = vmatprep.subr.bf16.mxu0 %v8960_v34 }
 0x52d   : > { %2876 = vmatpush1.bf16.msra.mxu0 %v9447_v30 }
 0x52e   : > { %2879 = vmatprep.subr.bf16.mxu0 %v8960_v34 }
 0x531   : > { %2880 = vmatpush2.bf16.msra.mxu0 %v9600_v57 }
 0x532   : > { %2881 = vmatprep.subr.bf16.mxu0 %v8960_v34 }
 0x535   : > { %2882 = vmatpush2.bf16.msra.mxu0 %v9596_v62 }
 0x536   : > { %2883 = vmatprep.subr.bf16.mxu0 %v8960_v34 }
 0x539   : > { %2884 = vmatpush2.bf16.msra.mxu0 %v9588_v39 }
 0x53a   : > { %2885 = vmatprep.subr.bf16.mxu0 %v8960_v34 }
 0x53d   : > { %2886 = vmatpush2.bf16.msra.mxu0 %v9580_v19 }
 0x53e   : > { %2887 = vmatprep.subr.bf16.mxu0 %v8960_v34 }
 0x541   : > { %2888 = vmatpush2.bf16.msra.mxu0 %v9564_v53 }
 0x542   : > { %2889 = vmatprep.subr.bf16.mxu0 %v8960_v34 }
 0x545   : > { %2890 = vmatpush2.bf16.msra.mxu0 %v9548_v25 }
 0x546   : > { %2891 = vmatprep.subr.bf16.mxu0 %v8960_v34 }
 0x549   : > { %2892 = vmatpush2.bf16.msra.mxu0 %v9527_v1 }
 0x54a   : > { %3074 = vmatprep.subr.bf16.mxu0 %v8960_v34 }
 0x54c   : > { %2894 = vmatmul.mubr.bf16.vlgmr.msra.gmra.mxu0 %v8748_v6 }
 0x54d   : > { %3075 = vmatpush1.bf16.msra.mxu0 %v9511_v29  ;;  %7153 = vmatprep.mubr.msk.bf16.mxu0 %vm1791_vm4, %v8751_v24 }
 0x54e   : > { %3076 = vmatprep.subr.bf16.mxu0 %v8960_v34 }
 0x551   : > { %3077 = vmatpush1.bf16.msra.mxu0 %v9503_v54 }
 0x552   : > { %3078 = vmatprep.subr.bf16.mxu0 %v8960_v34 }
 0x554   : > { %2902 = vmatmul.mubr.bf16.gmra.mxu0 %v8753_v26 }
 0x555   : > { %3079 = vmatpush1.bf16.msra.mxu0 %v9495_v15  ;;  %7154 = vmatprep.mubr.msk.bf16.mxu0 %vm1791_vm4, %v8754_v33 }
 0x556   : > { %3080 = vmatprep.subr.bf16.mxu0 %v8960_v34 }
 0x559   : > { %3081 = vmatpush1.bf16.msra.mxu0 %v9487_v56 }
 0x55a   : > { %3082 = vmatprep.subr.bf16.mxu0 %v8960_v34 }
 0x55c   : > { %2910 = vmatmul.mubr.bf16.gmra.mxu0 %v8756_v35 }
 0x55d   : > { %3083 = vmatpush1.bf16.msra.mxu0 %v9479_v17  ;;  %7155 = vmatprep.mubr.msk.bf16.mxu0 %vm1791_vm4, %v7151_v63 }
 0x55e   : > { %3084 = vmatprep.subr.bf16.mxu0 %v8960_v34 }
 0x561   : > { %3085 = vmatpush1.bf16.msra.mxu0 %v9471_v43 }
 0x562   : > { %3086 = vmatprep.subr.bf16.mxu0 %v8960_v34 }
 0x564   : > { %2918 = vmatmul.mubr.bf16.gmra.mxu0 %v7150_v52 }
 0x565   : > { %3087 = vmatpush1.bf16.msra.mxu0 %v9455_v4  ;;  %7178 = vmatprep.mubr.msk.bf16.mxu0 %vm1791_vm4, %v8761_v16 }
 0x566   : > { %3088 = vmatprep.subr.bf16.mxu0 %v8960_v34 }
 0x569   : > { %3089 = vmatpush1.bf16.msra.mxu0 %v9447_v30 }
 0x56a   : > { %3092 = vmatprep.subr.bf16.mxu0 %v8960_v34 }
 0x56d   : > { %3093 = vmatpush2.bf16.msra.mxu0 %v9600_v57 }
 0x56e   : > { %3094 = vmatprep.subr.bf16.mxu0 %v8960_v34 }
 0x571   : > { %3095 = vmatpush2.bf16.msra.mxu0 %v9596_v62 }
 0x572   : > { %3096 = vmatprep.subr.bf16.mxu0 %v8960_v34 }
 0x575   : > { %3097 = vmatpush2.bf16.msra.mxu0 %v9588_v39 }
 0x576   : > { %3098 = vmatprep.subr.bf16.mxu0 %v8960_v34 }
 0x579   : > { %3099 = vmatpush2.bf16.msra.mxu0 %v9580_v19 }
 0x57a   : > { %3100 = vmatprep.subr.bf16.mxu0 %v8960_v34 }
 0x57d   : > { %3101 = vmatpush2.bf16.msra.mxu0 %v9564_v53 }
 0x57e   : > { %3102 = vmatprep.subr.bf16.mxu0 %v8960_v34 }
 0x581   : > { %3103 = vmatpush2.bf16.msra.mxu0 %v9548_v25 }
 0x582   : > { %3104 = vmatprep.subr.bf16.mxu0 %v8960_v34 }
 0x585   : > { %3105 = vmatpush2.bf16.msra.mxu0 %v9527_v1 }
 0x588   : > { %3107 = vmatmul.mubr.bf16.vlgmr.msra.gmra.mxu0 %v8759_v40 }
 0x589   : > { %7179 = vmatprep.mubr.msk.bf16.mxu0 %vm1791_vm4, %v8762_v37 }
 0x590   : > { %3115 = vmatmul.mubr.bf16.gmra.mxu0 %v8764_v32 }
 0x591   : > { %7180 = vmatprep.mubr.msk.bf16.mxu0 %vm1791_vm4, %v8765_v42 }
 0x594   : > { %v8134_v45 = vpop.f32.mrf.mxu0 }
 0x595   : > { %v2590_v28 = vadd.f32 %v8134_v45, %v9881_v36 }
 0x596   : > { %v2558_v58 = vpop.f32.mrf.mxu0 }
 0x597   : > { %v2588_v60 = vadd.f32 %v2558_v58, %v9884_v11 }
 0x598   : > { %3123 = vmatmul.mubr.bf16.gmra.mxu0 %v8767_v49  ;;  %v8135_v61 = vpop.f32.mrf.mxu0 }
 0x599   : > { %v2591_v13 = vadd.f32 %v8135_v61, %v9887_v12  ;;  %7181 = vmatprep.mubr.msk.bf16.mxu0 %vm1791_vm4, %v7177_v51  ;;  %v8771_v12 = vld [vmem:[%s10902_s4 + $0x30] sm:$0xff]  }
 0x59a   : > { %v10023_v9 = vpop.f32.mrf.mxu0  ;;  %8160 = vmatprep.subr.bf16.mxu1 %v8771_v12 }
 0x5a0   : > { %3131 = vmatmul.mubr.bf16.gmra.mxu0 %v7176_v3  ;;  %v8138_v36 = vpop.f32.mrf.mxu0 }
 0x5a1   : > { %v2594_v14 = vadd.f32 %v8138_v36, %v9892_v21 }
 0x5a2   : > { %v2574_v10 = vpop.f32.mrf.mxu0 }
 0x5a3   : > { %v2592_v31 = vadd.f32 %v2574_v10, %v9895_v47 }
 0x5a4   : > { %v8139_v20 = vpop.f32.mrf.mxu0 }
 0x5a6   : > { %v10027_v11 = vpop.f32.mrf.mxu0 }
 0x5d0   : > { %v8144_v48 = vpop.f32.mrf.mxu0 }
 0x5d1   : > { %v10032_v46 = vadd.f32 %v8144_v48, %v2590_v28 }
 0x5d2   : > { %v2771_v59 = vpop.f32.mrf.mxu0 }
 0x5d3   : > { %v10034_v50 = vadd.f32 %v2771_v59, %v2588_v60 }
 0x5d4   : > { %v8145_v41 = vpop.f32.mrf.mxu0 }
 0x5d5   : > { %v10036_v22 = vadd.f32 %v8145_v41, %v2591_v13 }
 0x5d6   : > { %v10038_v21 = vpop.f32.mrf.mxu0 }
 0x5dc   : > { %v8148_v47 = vpop.f32.mrf.mxu0 }
 0x5dd   : > { %v10040_v23 = vadd.f32 %v8148_v47, %v2594_v14 }
 0x5de   : > { %v2787_v6 = vpop.f32.mrf.mxu0 }
 0x5df   : > { %v10042_v24 = vadd.f32 %v2787_v6, %v2592_v31 }
 0x5e0   : > { %v8149_v26 = vpop.f32.mrf.mxu0 }
 0x5e2   : > { %v10044_v33 = vpop.f32.mrf.mxu0 }
 0x60c   : > { %v2895_v27 = vpop.f32.mrf.mxu0 }
 0x60e   : > { %v2897_v35 = vpop.f32.mrf.mxu0 }
 0x610   : > { %v2898_v63 = vpop.f32.mrf.mxu0 }
 0x611   : > { %v2925_v52 = vpack.c.bf16 %v2898_v63, %v2895_v27 }
 0x612   : > { %v2900_v16 = vpop.f32.mrf.mxu0 }
 0x613   : > { %8152 = vmatprep.mubr.msk.bf16.mxu1 %vm2010_vm6, %v2925_v52  ;;  %v8774_v16 = vld [vmem:[%s10901_s3 + $0x18c] ss:$8 sps:$4 sm:$0xff]  }
 0x614   : > { %v2903_v40 = vpop.f32.mrf.mxu0 }
 0x616   : > { %v2905_v37 = vpop.f32.mrf.mxu0 }
 0x618   : > { %v2906_v32 = vpop.f32.mrf.mxu0 }
 0x619   : > { %v2926_v42 = vpack.c.bf16 %v2906_v32, %v2903_v40 }
 0x61a   : > { %v2908_v44 = vpop.f32.mrf.mxu0 }
 0x61b   : > { %8153 = vmatmul.mubr.msk.bf16.vlgmr.msra.gmra.mxu1 %vm2010_vm6, %v2926_v42  ;;  %v8772_v44 = vld [vmem:[%s10901_s3 + $0x188] ss:$8 sps:$4 sm:$0xff]  }
 0x61c   : > { %v2911_v45 = vpop.f32.mrf.mxu0  ;;  %8161 = vmatpush3.bf16.msra.mxu1 %v8771_v12 }
 0x61d   : > { %3287 = vmatprep.subr.bf16.mxu1 %v8960_v34 }
 0x61e   : > { %v2913_v49 = vpop.f32.mrf.mxu0 }
 0x61f   : > { %v8777_v49 = vld [vmem:[%s10901_s3 + $0x198] ss:$8 sps:$4 sm:$0xff]  }
 0x620   : > { %v2914_v28 = vpop.f32.mrf.mxu0 }
 0x621   : > { %v2927_v51 = vpack.c.bf16 %v2914_v28, %v2911_v45  ;;  %v8775_v45 = vld [vmem:[%s10901_s3 + $0x19c] ss:$8 sps:$4 sm:$0xff]   ;;  %v8778_v28 = vld [vmem:[%s10901_s3 + $0x1ac] ss:$8 sps:$4 sm:$0xff]  }
 0x622   : > { %v2916_v18 = vpop.f32.mrf.mxu0 }
 0x623   : > { %8156 = vmatprep.mubr.msk.bf16.mxu1 %vm2010_vm6, %v2927_v51  ;;  %v8785_v18 = vld [vmem:[%s10901_s3 + $0x1c4] ss:$8 sps:$4 sm:$0xff]  }
 0x624   : > { %v2919_v58 = vpop.f32.mrf.mxu0 }
 0x625   : > { %v2928_v60 = vpack.c.bf16 %v2919_v58, %v2919_v58 }
 0x626   : > { %v2921_v61 = vpop.f32.mrf.mxu0 }
 0x627   : > { %8157 = vmatmul.mubr.msk.bf16.gmra.mxu1 %vm2010_vm6, %v2928_v60 }
 0x628   : > { %v2922_v13 = vpop.f32.mrf.mxu0 }
 0x62a   : > { %v2923_v3 = vpop.f32.mrf.mxu0 }
 0x648   : > { %v3108_v36 = vpop.f32.mrf.mxu0 }
 0x64a   : > { %v3110_v14 = vpop.f32.mrf.mxu0 }
 0x64c   : > { %v3111_v10 = vpop.f32.mrf.mxu0 }
 0x64d   : > { %v3138_v31 = vpack.c.bf16 %v3111_v10, %v3108_v36 }
 0x64e   : > { %v3113_v20 = vpop.f32.mrf.mxu0 }
 0x64f   : > { %8162 = vmatprep.mubr.msk.bf16.mxu1 %vm2010_vm6, %v3138_v31  ;;  %v8795_v31 = vld [vmem:[%s10902_s4 + $0x40] sm:$0xff]  }
 0x650   : > { %v3116_v48 = vpop.f32.mrf.mxu0 }
 0x652   : > { %v3118_v12 = vpop.f32.mrf.mxu0 }
 0x654   : > { %v3119_v59 = vpop.f32.mrf.mxu0 }
 0x655   : > { %v3139_v41 = vpack.c.bf16 %v3119_v59, %v3116_v48 }
 0x656   : > { %v3121_v47 = vpop.f32.mrf.mxu0 }
 0x657   : > { %8163 = vmatmul.mubr.msk.bf16.vlgmr.msra.gmra.mxu1 %vm2010_vm6, %v3139_v41 }
 0x658   : > { %3288 = vmatpush1.bf16.msra.mxu1 %v9511_v29  ;;  %v3124_v6 = vpop.f32.mrf.mxu0 }
 0x659   : > { %3289 = vmatprep.subr.bf16.mxu1 %v8960_v34 }
 0x65a   : > { %v3126_v26 = vpop.f32.mrf.mxu0 }
 0x65c   : > { %3290 = vmatpush1.bf16.msra.mxu1 %v9503_v54  ;;  %v3127_v27 = vpop.f32.mrf.mxu0 }
 0x65d   : > { %v3140_v35 = vpack.c.bf16 %v3127_v27, %v3124_v6  ;;  %3291 = vmatprep.subr.bf16.mxu1 %v8960_v34 }
 0x65e   : > { %v3129_v63 = vpop.f32.mrf.mxu0 }
 0x65f   : > { %8166 = vmatprep.mubr.msk.bf16.mxu1 %vm2010_vm6, %v3140_v35 }
 0x660   : > { %3292 = vmatpush1.bf16.msra.mxu1 %v9495_v15  ;;  %v3132_v52 = vpop.f32.mrf.mxu0 }
 0x661   : > { %v3141_v40 = vpack.c.bf16 %v3132_v52, %v3132_v52  ;;  %3293 = vmatprep.subr.bf16.mxu1 %v8960_v34 }
 0x662   : > { %v3134_v37 = vpop.f32.mrf.mxu0 }
 0x663   : > { %8167 = vmatmul.mubr.msk.bf16.gmra.mxu1 %vm2010_vm6, %v3141_v40 }
 0x664   : > { %3294 = vmatpush1.bf16.msra.mxu1 %v9487_v56  ;;  %7204 = vmatprep.mubr.msk.bf16.mxu1 %vm1791_vm4, %v8774_v16  ;;  %v3135_v32 = vpop.f32.mrf.mxu0 }
 0x665   : > { %3295 = vmatprep.subr.bf16.mxu1 %v8960_v34 }
 0x666   : > { %v3136_v42 = vpop.f32.mrf.mxu0 }
 0x668   : > { %3296 = vmatpush1.bf16.msra.mxu1 %v9479_v17 }
 0x669   : > { %3297 = vmatprep.subr.bf16.mxu1 %v8960_v34 }
 0x66c   : > { %3298 = vmatpush1.bf16.msra.mxu1 %v9471_v43 }
 0x66d   : > { %3299 = vmatprep.subr.bf16.mxu1 %v8960_v34 }
 0x670   : > { %3300 = vmatpush1.bf16.msra.mxu1 %v9455_v4 }
 0x671   : > { %3301 = vmatprep.subr.bf16.mxu1 %v8960_v34 }
 0x674   : > { %3302 = vmatpush1.bf16.msra.mxu1 %v9447_v30 }
 0x675   : > { %3305 = vmatprep.subr.bf16.mxu1 %v8960_v34 }
 0x678   : > { %3306 = vmatpush2.bf16.msra.mxu1 %v9600_v57 }
 0x679   : > { %3307 = vmatprep.subr.bf16.mxu1 %v8960_v34 }
 0x67c   : > { %3308 = vmatpush2.bf16.msra.mxu1 %v9596_v62 }
 0x67d   : > { %3309 = vmatprep.subr.bf16.mxu1 %v8960_v34 }
 0x680   : > { %3310 = vmatpush2.bf16.msra.mxu1 %v9588_v39 }
 0x681   : > { %3311 = vmatprep.subr.bf16.mxu1 %v8960_v34 }
 0x684   : > { %3312 = vmatpush2.bf16.msra.mxu1 %v9580_v19 }
 0x685   : > { %3313 = vmatprep.subr.bf16.mxu1 %v8960_v34 }
 0x688   : > { %3314 = vmatpush2.bf16.msra.mxu1 %v9564_v53 }
 0x689   : > { %3315 = vmatprep.subr.bf16.mxu1 %v8960_v34 }
 0x68c   : > { %3316 = vmatpush2.bf16.msra.mxu1 %v9548_v25 }
 0x68d   : > { %3317 = vmatprep.subr.bf16.mxu1 %v8960_v34 }
 0x690   : > { %3318 = vmatpush2.bf16.msra.mxu1 %v9527_v1 }
 0x691   : > { %3500 = vmatprep.subr.bf16.mxu1 %v8960_v34 }
 0x693   : > { %3320 = vmatmul.mubr.bf16.vlgmr.msra.gmra.mxu1 %v8772_v44 }
 0x694   : > { %3501 = vmatpush1.bf16.msra.mxu1 %v9511_v29  ;;  %7205 = vmatprep.mubr.msk.bf16.mxu1 %vm1791_vm4, %v8775_v45  ;;  %v7195_v29 = vld [vmem:[%s10901_s3 + $0x1b8] sm:$0x11] }
 0x695   : > { %3502 = vmatprep.subr.bf16.mxu1 %v8960_v34  ;;  %v7203_v51 = vcombine.high %v7195_v29, %v7195_v29 }
 0x698   : > { %3503 = vmatpush1.bf16.msra.mxu1 %v9503_v54  ;;  %v8780_v54 = vld [vmem:[%s10901_s3 + $0x1a8] ss:$8 sps:$4 sm:$0xff]  }
 0x699   : > { %3504 = vmatprep.subr.bf16.mxu1 %v8960_v34 }
 0x69b   : > { %3328 = vmatmul.mubr.bf16.gmra.mxu1 %v8777_v49 }
 0x69c   : > { %3505 = vmatpush1.bf16.msra.mxu1 %v9495_v15  ;;  %7206 = vmatprep.mubr.msk.bf16.mxu1 %vm1791_vm4, %v8778_v28  ;;  %v7202_v15 = vcombine.low %v7195_v29, %v7195_v29 }
 0x69d   : > { %3506 = vmatprep.subr.bf16.mxu1 %v8960_v34 }
 0x6a0   : > { %3507 = vmatpush1.bf16.msra.mxu1 %v9487_v56 }
 0x6a1   : > { %3508 = vmatprep.subr.bf16.mxu1 %v8960_v34 }
 0x6a3   : > { %3336 = vmatmul.mubr.bf16.gmra.mxu1 %v8780_v54 }
 0x6a4   : > { %3509 = vmatpush1.bf16.msra.mxu1 %v9479_v17  ;;  %7207 = vmatprep.mubr.msk.bf16.mxu1 %vm1791_vm4, %v7203_v51  ;;  %v7221_v17 = vld [vmem:[%s10901_s3 + $0x1f0] sm:$0x11] }
 0x6a5   : > { %3510 = vmatprep.subr.bf16.mxu1 %v8960_v34  ;;  %v7228_v60 = vcombine.low %v7221_v17, %v7221_v17 }
 0x6a8   : > { %3511 = vmatpush1.bf16.msra.mxu1 %v9471_v43  ;;  %v8788_v43 = vld [vmem:[%s10901_s3 + $0x1d0] ss:$8 sps:$4 sm:$0xff]  }
 0x6a9   : > { %3512 = vmatprep.subr.bf16.mxu1 %v8960_v34 }
 0x6ab   : > { %3344 = vmatmul.mubr.bf16.gmra.mxu1 %v7202_v15 }
 0x6ac   : > { %3513 = vmatpush1.bf16.msra.mxu1 %v9455_v4  ;;  %7230 = vmatprep.mubr.msk.bf16.mxu1 %vm1791_vm4, %v8785_v18  ;;  %v8786_v4 = vld [vmem:[%s10901_s3 + $0x1d4] ss:$8 sps:$4 sm:$0xff]  }
 0x6ad   : > { %3514 = vmatprep.subr.bf16.mxu1 %v8960_v34 }
 0x6b0   : > { %3515 = vmatpush1.bf16.msra.mxu1 %v9447_v30  ;;  %v8783_v30 = vld [vmem:[%s10901_s3 + $0x1c0] ss:$8 sps:$4 sm:$0xff]  }
 0x6b1   : > { %3518 = vmatprep.subr.bf16.mxu1 %v8960_v34 }
 0x6b4   : > { %3519 = vmatpush2.bf16.msra.mxu1 %v9600_v57 }
 0x6b5   : > { %3520 = vmatprep.subr.bf16.mxu1 %v8960_v34 }
 0x6b8   : > { %3521 = vmatpush2.bf16.msra.mxu1 %v9596_v62 }
 0x6b9   : > { %3522 = vmatprep.subr.bf16.mxu1 %v8960_v34 }
 0x6bc   : > { %3523 = vmatpush2.bf16.msra.mxu1 %v9588_v39 }
 0x6bd   : > { %3524 = vmatprep.subr.bf16.mxu1 %v8960_v34 }
 0x6c0   : > { %3525 = vmatpush2.bf16.msra.mxu1 %v9580_v19  ;;  %v8794_v19 = vld [vmem:[%s10902_s4 + $0x38] sm:$0xff]  }
 0x6c1   : > { %3526 = vmatprep.subr.bf16.mxu1 %v8960_v34  ;;  %8170 = vmatprep.subr.bf16.mxu0 %v8794_v19 }
 0x6c2   : > { %8171 = vmatpush3.bf16.msra.mxu0 %v8794_v19 }
 0x6c3   : > { %8180 = vmatprep.subr.bf16.mxu0 %v8795_v31 }
 0x6c4   : > { %3527 = vmatpush2.bf16.msra.mxu1 %v9564_v53  ;;  %v7229_v53 = vcombine.high %v7221_v17, %v7221_v17 }
 0x6c5   : > { %3528 = vmatprep.subr.bf16.mxu1 %v8960_v34 }
 0x6c8   : > { %3529 = vmatpush2.bf16.msra.mxu1 %v9548_v25 }
 0x6c9   : > { %3530 = vmatprep.subr.bf16.mxu1 %v8960_v34  ;;  %v8789_v34 = vld [vmem:[%s10901_s3 + $0x1e4] ss:$8 sps:$4 sm:$0xff]  }
 0x6cc   : > { %3531 = vmatpush2.bf16.msra.mxu1 %v9527_v1  ;;  %v8791_v1 = vld [vmem:[%s10901_s3 + $0x1e0] ss:$8 sps:$4 sm:$0xff]  }
 0x6cd   : > { %8238 = vmatprep.subr.bf16.mxu1 %v8957_v0 }
 0x6cf   : > { %3533 = vmatmul.mubr.bf16.vlgmr.msra.gmra.mxu1 %v8783_v30 }
 0x6d0   : > { %7231 = vmatprep.mubr.msk.bf16.mxu1 %vm1791_vm4, %v8786_v4 }
 0x6d7   : > { %3541 = vmatmul.mubr.bf16.gmra.mxu1 %v8788_v43 }
 0x6d8   : > { %7232 = vmatprep.mubr.msk.bf16.mxu1 %vm1791_vm4, %v8789_v34 }
 0x6db   : > { %v8154_v56 = vpop.f32.mrf.mxu1 }
 0x6dc   : > { %v3016_v25 = vadd.f32 %v8154_v56, %v10032_v46 }
 0x6dd   : > { %v2984_v39 = vpop.f32.mrf.mxu1 }
 0x6de   : > { %v3014_v62 = vadd.f32 %v2984_v39, %v10034_v50 }
 0x6df   : > { %3549 = vmatmul.mubr.bf16.gmra.mxu1 %v8791_v1  ;;  %v8155_v57 = vpop.f32.mrf.mxu1 }
 0x6e0   : > { %v3017_v58 = vadd.f32 %v8155_v57, %v10036_v22  ;;  %7233 = vmatprep.mubr.msk.bf16.mxu1 %vm1791_vm4, %v7229_v53 }
 0x6e1   : > { %v10171_v61 = vpop.f32.mrf.mxu1 }
 0x6e7   : > { %3557 = vmatmul.mubr.bf16.gmra.mxu1 %v7228_v60  ;;  %v8158_v46 = vpop.f32.mrf.mxu1 }
 0x6e8   : > { %v3020_v13 = vadd.f32 %v8158_v46, %v10040_v23  ;;  %8242 = vmatprep.mubr.msk.bf16.mxu1 %vm8959_vm2, %v8957_v0 }
 0x6e9   : > { %v3000_v3 = vpop.f32.mrf.mxu1 }
 0x6ea   : > { %v3018_v50 = vadd.f32 %v3000_v3, %v10042_v24 }
 0x6eb   : > { %v8159_v36 = vpop.f32.mrf.mxu1 }
 0x6ed   : > { %v10177_v14 = vpop.f32.mrf.mxu1 }
 0x717   : > { %v8164_v10 = vpop.f32.mrf.mxu1 }
 0x718   : > { %v10179_v22 = vadd.f32 %v8164_v10, %v3016_v25 }
 0x719   : > { %v3197_v20 = vpop.f32.mrf.mxu1 }
 0x71a   : > { %v10184_v48 = vadd.f32 %v3197_v20, %v3014_v62 }
 0x71b   : > { %v8165_v23 = vpop.f32.mrf.mxu1 }
 0x71c   : > { %v10186_v12 = vadd.f32 %v8165_v23, %v3017_v58  ;;  %v8796_v23 = vld [vmem:[%s10904_s6 + $0x8] sm:$0xff]  }
 0x71d   : > { %v10188_v59 = vpop.f32.mrf.mxu1 }
 0x723   : > { %v8168_v24 = vpop.f32.mrf.mxu1 }
 0x724   : > { %v10190_v41 = vadd.f32 %v8168_v24, %v3020_v13  ;;  %v8797_v24 = vld [vmem:[%s10904_s6 + $0x68] sm:$0xff]  }
 0x725   : > { %v3213_v47 = vpop.f32.mrf.mxu1  ;;  %8239 = vmatpush3.bf16.msra.mxu1 %v8797_v24 }
 0x726   : > { %v10192_v6 = vadd.f32 %v3213_v47, %v3018_v50  ;;  %v8798_v47 = vld [vmem:[%s10904_s6] sm:$0xff]   ;;  %8240 = vmatprep.subr.bf16.mxu1 %v8957_v0 }
 0x727   : > { %v8169_v26 = vpop.f32.mrf.mxu1 }
 0x728   : > { %v8799_v26 = vld [vmem:[%s10904_s6 + $0x60] sm:$0xff]  }
 0x729   : > { %v10194_v27 = vpop.f32.mrf.mxu1  ;;  %8241 = vmatpush3.bf16.msra.mxu1 %v8799_v26 }
 0x72a   : > { %8254 = vmatprep.subr.bf16.mxu1 %v8957_v0 }
 0x753   : > { %v3321_v35 = vpop.f32.mrf.mxu1 }
 0x755   : > { %v3323_v63 = vpop.f32.mrf.mxu1 }
 0x757   : > { %v3324_v52 = vpop.f32.mrf.mxu1 }
 0x758   : > { %v3351_v16 = vpack.c.bf16 %v3324_v52, %v3321_v35 }
 0x759   : > { %v3326_v40 = vpop.f32.mrf.mxu1 }
 0x75a   : > { %8172 = vmatprep.mubr.msk.bf16.mxu0 %vm2010_vm6, %v3351_v16 }
 0x75b   : > { %v3329_v37 = vpop.f32.mrf.mxu1 }
 0x75d   : > { %v3331_v32 = vpop.f32.mrf.mxu1 }
 0x75f   : > { %v3332_v42 = vpop.f32.mrf.mxu1 }
 0x760   : > { %v3352_v44 = vpack.c.bf16 %v3332_v42, %v3329_v37 }
 0x761   : > { %v3334_v45 = vpop.f32.mrf.mxu1 }
 0x762   : > { %8173 = vmatmul.mubr.msk.bf16.vlgmr.msra.gmra.mxu0 %vm2010_vm6, %v3352_v44 }
 0x763   : > { %v3337_v49 = vpop.f32.mrf.mxu1  ;;  %8181 = vmatpush3.bf16.msra.mxu0 %v8795_v31 }
 0x764   : > { %8190 = vmatprep.subr.bf16.mxu0 %v8957_v0 }
 0x765   : > { %v3339_v28 = vpop.f32.mrf.mxu1 }
 0x766   : > { %v2143_v28 = vadd.f32 %v9751_v55, %v9749_v38  ;;  %v10244_v38 = vld [vmem:[%s10903_s5] ss:$0 sm:$0xff] }
 0x767   : > { %v3340_v29 = vpop.f32.mrf.mxu1 }
 0x768   : > { %v3353_v54 = vpack.c.bf16 %v3340_v29, %v3337_v49  ;;  %v2376_v29 = vadd.f32 %v9889_v5, %v2143_v28 }
 0x769   : > { %v3342_v51 = vpop.f32.mrf.mxu1 }
 0x76a   : > { %8176 = vmatprep.mubr.msk.bf16.mxu0 %vm2010_vm6, %v3353_v54 }
 0x76b   : > { %v3345_v15 = vpop.f32.mrf.mxu1 }
 0x76c   : > { %v3354_v18 = vpack.c.bf16 %v3345_v15, %v3345_v15 }
 0x76d   : > { %v3347_v30 = vpop.f32.mrf.mxu1 }
 0x76e   : > { %8177 = vmatmul.mubr.msk.bf16.gmra.mxu0 %vm2010_vm6, %v3354_v18 }
 0x76f   : > { %v3348_v4 = vpop.f32.mrf.mxu1 }
 0x771   : > { %v3349_v43 = vpop.f32.mrf.mxu1 }
 0x78f   : > { %v3534_v34 = vpop.f32.mrf.mxu1 }
 0x791   : > { %v3536_v17 = vpop.f32.mrf.mxu1 }
 0x792   : > { %v8801_v17 = vld [vmem:[%s10904_s6 + $0x88] sm:$0xff]  }
 0x793   : > { %v3537_v56 = vpop.f32.mrf.mxu1 }
 0x794   : > { %v3564_v1 = vpack.c.bf16 %v3537_v56, %v3534_v34 }
 0x795   : > { %v3539_v25 = vpop.f32.mrf.mxu1 }
 0x796   : > { %8182 = vmatprep.mubr.msk.bf16.mxu0 %vm2010_vm6, %v3564_v1 }
 0x797   : > { %v3542_v53 = vpop.f32.mrf.mxu1 }
 0x799   : > { %v3544_v19 = vpop.f32.mrf.mxu1 }
 0x79a   : > { %v8802_v19 = vld [vmem:[%s10904_s6 + $0x10] sm:$0xff]  }
 0x79b   : > { %v3545_v39 = vpop.f32.mrf.mxu1 }
 0x79c   : > { %v3565_v62 = vpack.c.bf16 %v3545_v39, %v3542_v53 }
 0x79d   : > { %v3547_v57 = vpop.f32.mrf.mxu1 }
 0x79e   : > { %8183 = vmatmul.mubr.msk.bf16.vlgmr.msra.gmra.mxu0 %vm2010_vm6, %v3565_v62  ;;  %v8803_v62 = vld [vmem:[%s10904_s6 + $0x80] sm:$0xff]  }
 0x79f   : > { %v3550_v58 = vpop.f32.mrf.mxu1  ;;  %8191 = vmatpush3.bf16.msra.mxu0 %v8796_v23  ;;  %v8808_v23 = vld [vmem:[%s10904_s6 + $0x38] sm:$0xff]  }
 0x7a0   : > { %8192 = vmatprep.subr.bf16.mxu0 %v8957_v0 }
 0x7a1   : > { %v3552_v60 = vpop.f32.mrf.mxu1 }
 0x7a3   : > { %v3553_v46 = vpop.f32.mrf.mxu1  ;;  %8193 = vmatpush3.bf16.msra.mxu0 %v8798_v47  ;;  %v8809_v47 = vld [vmem:[%s10904_s6 + $0xc8] sm:$0xff]  }
 0x7a4   : > { %v3566_v13 = vpack.c.bf16 %v3553_v46, %v3550_v58  ;;  %8198 = vmatprep.subr.bf16.mxu0 %v8957_v0 }
 0x7a5   : > { %v3555_v3 = vpop.f32.mrf.mxu1 }
 0x7a6   : > { %8186 = vmatprep.mubr.msk.bf16.mxu0 %vm2010_vm6, %v3566_v13  ;;  %v8804_v13 = vld [vmem:[%s10904_s6 + $0x28] sm:$0xff]  }
 0x7a7   : > { %v3558_v50 = vpop.f32.mrf.mxu1 }
 0x7a8   : > { %v3567_v36 = vpack.c.bf16 %v3558_v50, %v3558_v50 }
 0x7a9   : > { %v3560_v10 = vpop.f32.mrf.mxu1 }
 0x7aa   : > { %8187 = vmatmul.mubr.msk.bf16.gmra.mxu0 %vm2010_vm6, %v3567_v36  ;;  %v8805_v36 = vld [vmem:[%s10904_s6 + $0xa8] sm:$0xff]  }
 0x7ab   : > { %v3561_v31 = vpop.f32.mrf.mxu1  ;;  %8194 = vmatprep.mubr.msk.bf16.mxu0 %vm8959_vm2, %v8957_v0 }
 0x7ac   : > { %v8806_v31 = vld [vmem:[%s10904_s6 + $0x20] sm:$0xff]  }
 0x7ad   : > { %v3562_v20 = vpop.f32.mrf.mxu1 }
 0x7ae   : > { %v8807_v20 = vld [vmem:[%s10904_s6 + $0xa0] sm:$0xff]  }
 0x822   : > { %v8174_v35 = vpop.f32.mrf.mxu0 }
 0x823   : > { %v10224_v63 = vadd.f32 %v8174_v35, %v10179_v22  ;;  %v2589_v22 = vadd.f32 %v10023_v9, %v2376_v29  ;;  %v8810_v35 = vld [vmem:[%s10904_s6 + $0x30] sm:$0xff]   ;;  %v8817_v29 = vld [vmem:[%s10904_s6 + $0x108] sm:$0xff]  }
 0x824   : > { %v3410_v52 = vpop.f32.mrf.mxu0 }
 0x825   : > { %v2802_v51 = vadd.f32 %v10038_v21, %v2589_v22  ;;  %v3440_v15 = vadd.f32 %v3410_v52, %v10184_v48  ;;  %v8811_v52 = vld [vmem:[%s10904_s6 + $0xc0] sm:$0xff]  }
 0x826   : > { %v8175_v16 = vpop.f32.mrf.mxu0 }
 0x827   : > { %v3443_v40 = vadd.f32 %v8175_v16, %v10186_v12  ;;  %v8812_v16 = vld [vmem:[%s10904_s6 + $0x48] sm:$0xff]  }
 0x828   : > { %v3413_v37 = vpop.f32.mrf.mxu0 }
 0x82e   : > { %v8178_v32 = vpop.f32.mrf.mxu0 }
 0x82f   : > { %v3446_v42 = vadd.f32 %v8178_v32, %v10190_v41  ;;  %v3015_v41 = vadd.f32 %v10171_v61, %v2802_v51  ;;  %v8818_v51 = vld [vmem:[%s10904_s6 + $0x50] sm:$0xff]  }
 0x830   : > { %v3426_v44 = vpop.f32.mrf.mxu0 }
 0x831   : > { %v3444_v45 = vadd.f32 %v3426_v44, %v10192_v6  ;;  %v3228_v30 = vadd.f32 %v10188_v59, %v3015_v41  ;;  %v8800_v59 = vld [vmem:[%s10904_s6 + $0x18] sm:$0xff]   ;;  %v8815_v44 = vld [vmem:[%s10904_s6 + $0xe0] sm:$0xff]  }
 0x832   : > { %v8179_v49 = vpop.f32.mrf.mxu0  ;;  %v8820_v41 = vld [vmem:[%s10904_s6 + $0x78] sm:$0xff]  }
 0x833   : > { %v3441_v21 = vadd.f32 %v3413_v37, %v3228_v30  ;;  %v8813_v37 = vld [vmem:[%s10904_s6 + $0xe8] sm:$0xff]   ;;  %v8816_v49 = vld [vmem:[%s10904_s6 + $0x58] sm:$0xff]  }
 0x834   : > { %v10233_v54 = vpop.f32.mrf.mxu0 }
 0x85e   : > { %v10236_v12 = vpop.f32.mrf.mxu0 }
 0x860   : > { %v3623_v18 = vpop.f32.mrf.mxu0 }
 0x861   : > { %v3653_v6 = vadd.f32 %v3623_v18, %v3440_v15 }
 0x862   : > { %v8185_v55 = vpop.f32.mrf.mxu0 }
 0x863   : > { %v3667_v5 = vadd.f32 %v10244_v38, %v3653_v6  ;;  %v3656_v9 = vadd.f32 %v8185_v55, %v3443_v40  ;;  %v8821_v6 = vld [vmem:[%s10904_s6 + $0x128] sm:$0xff]   ;;  %v8822_v55 = vld [vmem:[%s10904_s6 + $0x70] sm:$0xff]  }
 0x864   : > { %v3626_v4 = vpop.f32.mrf.mxu0 }
 0x865   : > { %v3674_v43 = vmax.f32 %v3667_v5, 0.0  ;;  %v10248_v48 = vadd.f32 %v10244_v38, %v3656_v9  ;;  %v3654_v61 = vadd.f32 %v3626_v4, %v3441_v21  ;;  %v8823_v5 = vld [vmem:[%s10904_s6 + $0x120] sm:$0xff]   ;;  %v8824_v9 = vld [vmem:[%s10904_s6 + $0x98] sm:$0xff]   ;;  %v8825_v4 = vld [vmem:[%s10904_s6 + $0x148] sm:$0xff]  }
 0x867   : > { %v10253_v34 = vpack.c.bf16 %v3674_v43, %v3674_v43  ;;  %v3668_v1 = vadd.f32 %v10244_v38, %v3654_v61  ;;  %v8826_v61 = vld [vmem:[%s10904_s6 + $0x90] sm:$0xff]  }
 0x869   : > { %v4061_v56 = vrot.slane %v10253_v34, 3  ;;  %8195 = vmatmul.mubr.msk.bf16.vlgmr.msra.gmra.mxu0 %vm3699_vm7, %v10253_v34  ;;  %v3675_v57 = vmax.f32 %v3668_v1, 0.0  ;;  %v10282_v3 = vshrl.u32 %v10253_v34, 16  ;;  %v3813_v24 = vrot.slane %v10253_v34, 1 }
 0x86a   : > { %v8188_v25 = vpop.f32.mrf.mxu0  ;;  %8199 = vmatpush3.bf16.msra.mxu0 %v8800_v59  ;;  %8202 = vmatprep.mubr.msk.bf16.mxu0 %vm8959_vm2, %v8957_v0  ;;  %v3937_v28 = vrot.slane %v10253_v34, 2  ;;  %v8827_v59 = vld [vmem:[%s10904_s6 + $0x140] sm:$0xff]   ;;  %v8828_v34 = vld [vmem:[%s10904_s6 + $0xb8] sm:$0xff]  }
 0x86b   : > { %v3659_v53 = vadd.f32 %v8188_v25, %v3446_v42  ;;  %8243 = vmatmul.mubr.msk.bf16.vlgmr.msra.gmra.mxu1 %vm3699_vm7, %v4061_v56  ;;  %8200 = vmatprep.subr.bf16.mxu0 %v8957_v0  ;;  %v10291_v10 = vpack.c.bf16 %v3675_v57, %v3675_v57  ;;  %v3875_v40 = vrot.slane %v10282_v3, 1  ;;  %v8814_v42 = vld [vmem:[%s10904_s6 + $0x40] sm:$0xff]   ;;  %v3999_v18 = vrot.slane %v10282_v3, 2  ;;  %v8829_v56 = vld [vmem:[%s10904_s6 + $0x168] sm:$0xff]   ;;  %v8830_v25 = vld [vmem:[%s10904_s6 + $0xb0] sm:$0xff]  }
 0x86c   : > { %v3639_v39 = vpop.f32.mrf.mxu0  ;;  %8255 = vmatpush3.bf16.msra.mxu1 %v8801_v17  ;;  %8258 = vmatprep.mubr.msk.bf16.mxu1 %vm8959_vm2, %v8957_v0  ;;  %v4123_v21 = vrot.slane %v10282_v3, 3 }
 0x86d   : > { %v10275_v58 = vadd.f32 %v10244_v38, %v3659_v53  ;;  %v3657_v60 = vadd.f32 %v3639_v39, %v3444_v45  ;;  %8256 = vmatprep.subr.bf16.mxu1 %v8957_v0  ;;  %v4311_v26 = vrot.slane %v10291_v10, 1  ;;  %v4435_v32 = vrot.slane %v10291_v10, 2  ;;  %v8831_v53 = vld [vmem:[%s10904_s6 + $0x160] sm:$0xff]  }
 0x86e   : > { %v8189_v46 = vpop.f32.mrf.mxu0  ;;  %8201 = vmatpush3.bf16.msra.mxu0 %v8802_v19  ;;  %v3655_v45 = vadd.f32 %v10236_v12, %v10224_v63  ;;  %v4559_v63 = vrot.slane %v10291_v10, 3  ;;  %v8819_v12 = vld [vmem:[%s10904_s6 + $0x100] sm:$0xff]   ;;  %v4247_v17 = vshrl.u32 %v10291_v10, 16  ;;  %v8832_v19 = vld [vmem:[%s10904_s6 + $0xd8] sm:$0xff]  }
 0x86f   : > { %8206 = vmatprep.subr.bf16.mxu0 %v8957_v0  ;;  %v10286_v50 = vadd.f32 %v10244_v38, %v3657_v60  ;;  %v8834_v60 = vld [vmem:[%s10904_s6 + $0xd0] sm:$0xff]   ;;  %v8835_v46 = vld [vmem:[%s10904_s6 + $0x180] sm:$0xff]  }
 0x870   : > { %8257 = vmatpush3.bf16.msra.mxu1 %v8803_v62  ;;  %v3669_v22 = vadd.f32 %v10244_v38, %v3655_v45  ;;  %v4373_v39 = vrot.slane %v4247_v17, 1  ;;  %v8833_v62 = vld [vmem:[%s10904_s6 + $0x188] sm:$0xff]   ;;  %v8848_v45 = vld [vmem:[%s10904_s6 + $0x158] sm:$0xff]  }
 0x871   : > { %8203 = vmatmul.mubr.msk.bf16.vlgmr.msra.gmra.mxu0 %vm3699_vm7, %v10282_v3  ;;  %8270 = vmatprep.subr.bf16.mxu1 %v8957_v0  ;;  %v8836_v3 = vld [vmem:[%s10904_s6 + $0xf8] sm:$0xff]  }
 0x872   : > { %8207 = vmatpush3.bf16.msra.mxu0 %v8804_v13  ;;  %8210 = vmatprep.mubr.msk.bf16.mxu0 %vm8959_vm2, %v8957_v0  ;;  %v3676_v15 = vmax.f32 %v3669_v22, 0.0  ;;  %v3677_v13 = vmax.f32 %v10248_v48, 0.0  ;;  %v8838_v48 = vld [vmem:[%s10904_s6 + $0xf0] sm:$0xff]  }
 0x873   : > { %8259 = vmatmul.mubr.msk.bf16.vlgmr.msra.gmra.mxu1 %vm3699_vm7, %v10291_v10  ;;  %8208 = vmatprep.subr.bf16.mxu0 %v8957_v0  ;;  %v8837_v10 = vld [vmem:[%s10904_s6 + $0x1a8] sm:$0xff]   ;;  %v8850_v22 = vld [vmem:[%s10904_s6 + $0x150] sm:$0xff]  }
 0x874   : > { %8271 = vmatpush3.bf16.msra.mxu1 %v8805_v36  ;;  %8274 = vmatprep.mubr.msk.bf16.mxu1 %vm8959_vm2, %v8957_v0  ;;  %v10393_v30 = vpack.c.bf16 %v3676_v15, %v3676_v15  ;;  %v4497_v36 = vrot.slane %v4247_v17, 2 }
 0x875   : > { %8272 = vmatprep.subr.bf16.mxu1 %v8957_v0 }
 0x876   : > { %8209 = vmatpush3.bf16.msra.mxu0 %v8806_v31  ;;  %v4809_v43 = vrot.slane %v10393_v30, 1  ;;  %v4933_v1 = vrot.slane %v10393_v30, 2  ;;  %v5057_v57 = vrot.slane %v10393_v30, 3  ;;  %v10490_v31 = vpack.c.bf16 %v3677_v13, %v3677_v13 }
 0x877   : > { %8214 = vmatprep.subr.bf16.mxu0 %v8957_v0 }
 0x878   : > { %8273 = vmatpush3.bf16.msra.mxu1 %v8807_v20  ;;  %v8839_v20 = vld [vmem:[%s10904_s6 + $0x1a0] sm:$0xff]  }
 0x879   : > { %8211 = vmatmul.mubr.msk.bf16.vlgmr.msra.gmra.mxu0 %vm3699_vm7, %v3813_v24  ;;  %8286 = vmatprep.subr.bf16.mxu1 %v8957_v0  ;;  %v4621_v24 = vrot.slane %v4247_v17, 3 }
 0x87a   : > { %8215 = vmatpush3.bf16.msra.mxu0 %v8808_v23  ;;  %8218 = vmatprep.mubr.msk.bf16.mxu0 %vm8959_vm2, %v8957_v0  ;;  %v8840_v23 = vld [vmem:[%s10904_s6 + $0x118] sm:$0xff]  }
 0x87b   : > { %8275 = vmatmul.mubr.msk.bf16.vlgmr.msra.gmra.mxu1 %vm3699_vm7, %v4311_v26  ;;  %8216 = vmatprep.subr.bf16.mxu0 %v8957_v0  ;;  %v5307_v26 = vrot.slane %v10490_v31, 1 }
 0x87c   : > { %8287 = vmatpush3.bf16.msra.mxu1 %v8809_v47  ;;  %8290 = vmatprep.mubr.msk.bf16.mxu1 %vm8959_vm2, %v8957_v0  ;;  %v8841_v47 = vld [vmem:[%s10904_s6 + $0x1c8] sm:$0xff]  }
 0x87d   : > { %8288 = vmatprep.subr.bf16.mxu1 %v8957_v0 }
 0x87e   : > { %8217 = vmatpush3.bf16.msra.mxu0 %v8810_v35  ;;  %v8842_v35 = vld [vmem:[%s10904_s6 + $0x110] sm:$0xff]  }
 0x87f   : > { %8222 = vmatprep.subr.bf16.mxu0 %v8957_v0 }
 0x880   : > { %8289 = vmatpush3.bf16.msra.mxu1 %v8811_v52  ;;  %v8843_v52 = vld [vmem:[%s10904_s6 + $0x1c0] sm:$0xff]  }
 0x881   : > { %8219 = vmatmul.mubr.msk.bf16.vlgmr.msra.gmra.mxu0 %vm3699_vm7, %v3875_v40  ;;  %8302 = vmatprep.subr.bf16.mxu1 %v8957_v0  ;;  %v10535_v40 = vshrl.u32 %v10393_v30, 16 }
 0x882   : > { %8223 = vmatpush3.bf16.msra.mxu0 %v8812_v16  ;;  %8226 = vmatprep.mubr.msk.bf16.mxu0 %vm8959_vm2, %v8957_v0  ;;  %v8844_v16 = vld [vmem:[%s10904_s6 + $0x138] sm:$0xff]  }
 0x883   : > { %8291 = vmatmul.mubr.msk.bf16.vlgmr.msra.gmra.mxu1 %vm3699_vm7, %v4435_v32  ;;  %8224 = vmatprep.subr.bf16.mxu0 %v8957_v0  ;;  %v5431_v32 = vrot.slane %v10490_v31, 2  ;;  %v4995_v15 = vrot.slane %v10535_v40, 2 }
 0x884   : > { %8303 = vmatpush3.bf16.msra.mxu1 %v8813_v37  ;;  %8306 = vmatprep.mubr.msk.bf16.mxu1 %vm8959_vm2, %v8957_v0  ;;  %v8845_v37 = vld [vmem:[%s10904_s6 + $0x1e8] sm:$0xff]  }
 0x885   : > { %8304 = vmatprep.subr.bf16.mxu1 %v8957_v0 }
 0x886   : > { %8225 = vmatpush3.bf16.msra.mxu0 %v8814_v42  ;;  %v8846_v42 = vld [vmem:[%s10904_s6 + $0x130] sm:$0xff]  }
 0x887   : > { %8230 = vmatprep.subr.bf16.mxu0 %v8957_v0 }
 0x888   : > { %8305 = vmatpush3.bf16.msra.mxu1 %v8815_v44  ;;  %v8847_v44 = vld [vmem:[%s10904_s6 + $0x1e0] sm:$0xff]  }
 0x889   : > { %8227 = vmatmul.mubr.msk.bf16.vlgmr.msra.gmra.mxu0 %vm3699_vm7, %v3937_v28  ;;  %8318 = vmatprep.subr.bf16.mxu1 %v8957_v0  ;;  %v8849_v28 = vld [vmem:[%s10904_s6 + $0x208] sm:$0xff]  }
 0x88a   : > { %8231 = vmatpush3.bf16.msra.mxu0 %v8816_v49  ;;  %8234 = vmatprep.mubr.msk.bf16.mxu0 %vm8959_vm2, %v8957_v0  ;;  %v4871_v49 = vrot.slane %v10535_v40, 1 }
 0x88b   : > { %8307 = vmatmul.mubr.msk.bf16.vlgmr.msra.gmra.mxu1 %vm3699_vm7, %v4559_v63  ;;  %8232 = vmatprep.subr.bf16.mxu0 %v8957_v0  ;;  %v8851_v63 = vld [vmem:[%s10904_s6 + $0x200] sm:$0xff]  }
 0x88c   : > { %8319 = vmatpush3.bf16.msra.mxu1 %v8817_v29  ;;  %8322 = vmatprep.mubr.msk.bf16.mxu1 %vm8959_vm2, %v8957_v0  ;;  %v5555_v29 = vrot.slane %v10490_v31, 3 }
 0x88d   : > { %8320 = vmatprep.subr.bf16.mxu1 %v8957_v0 }
 0x88e   : > { %8233 = vmatpush3.bf16.msra.mxu0 %v8818_v51  ;;  %v3678_v51 = vmax.f32 %v10286_v50, 0.0  ;;  %v8854_v50 = vld [vmem:[%s10904_s6 + $0x170] sm:$0xff]  }
 0x88f   : > { %8246 = vmatprep.subr.bf16.mxu0 %v8957_v0 }
 0x890   : > { %8321 = vmatpush3.bf16.msra.mxu1 %v8819_v12  ;;  %v8852_v12 = vld [vmem:[%s10904_s6 + $0x178] sm:$0xff]  }
 0x891   : > { %8235 = vmatmul.mubr.msk.bf16.vlgmr.msra.gmra.mxu0 %vm3699_vm7, %v3999_v18  ;;  %8334 = vmatprep.subr.bf16.mxu1 %v8957_v0  ;;  %v10591_v18 = vpack.c.bf16 %v3678_v51, %v3678_v51 }
 0x892   : > { %8247 = vmatpush3.bf16.msra.mxu0 %v8820_v41  ;;  %8250 = vmatprep.mubr.msk.bf16.mxu0 %vm8959_vm2, %v8957_v0  ;;  %v8853_v41 = vld [vmem:[%s10904_s6 + $0x228] sm:$0xff]  }
 0x893   : > { %8323 = vmatmul.mubr.msk.bf16.vlgmr.msra.gmra.mxu1 %vm3699_vm7, %v10393_v30  ;;  %8248 = vmatprep.subr.bf16.mxu0 %v8957_v0  ;;  %v8856_v30 = vld [vmem:[%s10904_s6 + $0x198] sm:$0xff]  }
 0x894   : > { %8335 = vmatpush3.bf16.msra.mxu1 %v8821_v6  ;;  %8338 = vmatprep.mubr.msk.bf16.mxu1 %vm8959_vm2, %v8957_v0  ;;  %v8855_v6 = vld [vmem:[%s10904_s6 + $0x220] sm:$0xff]  }
 0x895   : > { %8336 = vmatprep.subr.bf16.mxu1 %v8957_v0 }
 0x896   : > { %8249 = vmatpush3.bf16.msra.mxu0 %v8822_v55  ;;  %v2159_v55 = vadd.f32 %v9875_v8, %v9757_v2  ;;  %v8858_v2 = vld [vmem:[%s10904_s6 + $0x190] sm:$0xff]  }
 0x897   : > { %8262 = vmatprep.subr.bf16.mxu0 %v8957_v0 }
 0x898   : > { %8337 = vmatpush3.bf16.msra.mxu1 %v8823_v5  ;;  %v5119_v5 = vrot.slane %v10535_v40, 3 }
 0x899   : > { %8251 = vmatmul.mubr.msk.bf16.vlgmr.msra.gmra.mxu0 %vm3699_vm7, %v4123_v21  ;;  %8350 = vmatprep.subr.bf16.mxu1 %v8957_v0  ;;  %v2380_v21 = vadd.f32 %v9897_v7, %v2159_v55  ;;  %v8859_v7 = vld [vmem:[%s10904_s6 + $0x240] sm:$0xff]   ;;  %v8890_v55 = vld [vmem:[%s10904_s6 + $0x2d8] sm:$0xff]  }
 0x89a   : > { %8263 = vmatpush3.bf16.msra.mxu0 %v8824_v9  ;;  %8266 = vmatprep.mubr.msk.bf16.mxu0 %vm8959_vm2, %v8957_v0  ;;  %v8857_v9 = vld [vmem:[%s10904_s6 + $0x248] sm:$0xff]  }
 0x89b   : > { %8339 = vmatmul.mubr.msk.bf16.vlgmr.msra.gmra.mxu1 %vm3699_vm7, %v4809_v43  ;;  %8264 = vmatprep.subr.bf16.mxu0 %v8957_v0  ;;  %v2593_v8 = vadd.f32 %v10027_v11, %v2380_v21  ;;  %v8860_v11 = vld [vmem:[%s10904_s6 + $0x1b8] sm:$0xff]   ;;  %v8891_v21 = vld [vmem:[%s10904_s6 + $0x2d0] sm:$0xff]  }
 0x89c   : > { %8351 = vmatpush3.bf16.msra.mxu1 %v8825_v4  ;;  %8354 = vmatprep.mubr.msk.bf16.mxu1 %vm8959_vm2, %v8957_v0  ;;  %v5805_v4 = vrot.slane %v10591_v18, 1 }
 0x89d   : > { %8352 = vmatprep.subr.bf16.mxu1 %v8957_v0  ;;  %v2806_v43 = vadd.f32 %v10044_v33, %v2593_v8  ;;  %v3681_v8 = vld [vmem:[%s10905_s7] sm:$0x1] }
 0x89e   : > { %8265 = vmatpush3.bf16.msra.mxu0 %v8826_v61 }
 0x89f   : > { %8278 = vmatprep.subr.bf16.mxu0 %v8957_v0  ;;  %v3019_v61 = vadd.f32 %v10177_v14, %v2806_v43  ;;  %v3642_v14 = vpop.f32.mrf.mxu0 }
 0x8a0   : > { %8353 = vmatpush3.bf16.msra.mxu1 %v8827_v59  ;;  %v10643_v59 = vshrl.u32 %v10490_v31, 16 }
 0x8a1   : > { %8267 = vmatmul.mubr.msk.bf16.vlgmr.msra.gmra.mxu0 %vm3699_vm7, %v4247_v17  ;;  %8366 = vmatprep.subr.bf16.mxu1 %v8957_v0  ;;  %v3232_v33 = vadd.f32 %v10194_v27, %v3019_v61  ;;  %v5929_v17 = vrot.slane %v10591_v18, 2  ;;  %v8863_v27 = vld [vmem:[%s10904_s6 + $0x260] sm:$0xff]  }
 0x8a2   : > { %8279 = vmatpush3.bf16.msra.mxu0 %v8828_v34  ;;  %8282 = vmatprep.mubr.msk.bf16.mxu0 %vm8959_vm2, %v8957_v0  ;;  %v8861_v34 = vld [vmem:[%s10904_s6 + $0x268] sm:$0xff]   ;;  %v5493_v13 = vrot.slane %v10643_v59, 2 }
 0x8a3   : > { %8355 = vmatmul.mubr.msk.bf16.vlgmr.msra.gmra.mxu1 %vm3699_vm7, %v4933_v1  ;;  %8280 = vmatprep.subr.bf16.mxu0 %v8957_v0  ;;  %v3445_v1 = vadd.f32 %v10233_v54, %v3232_v33  ;;  %v8864_v54 = vld [vmem:[%s10904_s6 + $0x1d8] sm:$0xff]  }
 0x8a4   : > { %8367 = vmatpush3.bf16.msra.mxu1 %v8829_v56  ;;  %8370 = vmatprep.mubr.msk.bf16.mxu1 %vm8959_vm2, %v8957_v0  ;;  %v8862_v56 = vld [vmem:[%s10904_s6 + $0x1b0] sm:$0xff]  }
 0x8a5   : > { %8368 = vmatprep.subr.bf16.mxu1 %v8957_v0 }
 0x8a6   : > { %8281 = vmatpush3.bf16.msra.mxu0 %v8830_v25  ;;  %v3658_v25 = vadd.f32 %v3642_v14, %v3445_v1  ;;  %v8893_v1 = vld [vmem:[%s10904_s6 + $0x2f0] sm:$0xff]  }
 0x8a7   : > { %8294 = vmatprep.subr.bf16.mxu0 %v8957_v0 }
 0x8a8   : > { %8369 = vmatpush3.bf16.msra.mxu1 %v8831_v53  ;;  %v5369_v53 = vrot.slane %v10643_v59, 1 }
 0x8a9   : > { %8283 = vmatmul.mubr.msk.bf16.vlgmr.msra.gmra.mxu0 %vm3699_vm7, %v4373_v39  ;;  %8382 = vmatprep.subr.bf16.mxu1 %v8957_v0  ;;  %v6053_v39 = vrot.slane %v10591_v18, 3 }
 0x8aa   : > { %8295 = vmatpush3.bf16.msra.mxu0 %v8832_v19  ;;  %8298 = vmatprep.mubr.msk.bf16.mxu0 %vm8959_vm2, %v8957_v0  ;;  %v8865_v19 = vld [vmem:[%s10904_s6 + $0x288] sm:$0xff]  }
 0x8ab   : > { %8371 = vmatmul.mubr.msk.bf16.vlgmr.msra.gmra.mxu1 %vm3699_vm7, %v5057_v57  ;;  %8296 = vmatprep.subr.bf16.mxu0 %v8957_v0  ;;  %v8866_v57 = vld [vmem:[%s10904_s6 + $0x1d0] sm:$0xff]  }
 0x8ac   : > { %8383 = vmatpush3.bf16.msra.mxu1 %v8833_v62  ;;  %8386 = vmatprep.mubr.msk.bf16.mxu1 %vm8959_vm2, %v8957_v0  ;;  %v3672_v62 = vadd.f32 %v10244_v38, %v3658_v25  ;;  %v8867_v38 = vld [vmem:[%s10904_s6 + $0x280] sm:$0xff]  }
 0x8ad   : > { %8384 = vmatprep.subr.bf16.mxu1 %v8957_v0 }
 0x8ae   : > { %8297 = vmatpush3.bf16.msra.mxu0 %v8834_v60  ;;  %v3679_v60 = vmax.f32 %v3672_v62, 0.0 }
 0x8af   : > { %8310 = vmatprep.subr.bf16.mxu0 %v8957_v0 }
 0x8b0   : > { %8385 = vmatpush3.bf16.msra.mxu1 %v8835_v46  ;;  %v8868_v46 = vld [vmem:[%s10904_s6 + $0x1f8] sm:$0xff]  }
 0x8b1   : > { %8299 = vmatmul.mubr.msk.bf16.vlgmr.msra.gmra.mxu0 %vm3699_vm7, %v4497_v36  ;;  %8398 = vmatprep.subr.bf16.mxu1 %v8957_v0  ;;  %v10701_v36 = vpack.c.bf16 %v3679_v60, %v3679_v60 }
 0x8b2   : > { %8311 = vmatpush3.bf16.msra.mxu0 %v8836_v3  ;;  %8314 = vmatprep.mubr.msk.bf16.mxu0 %vm8959_vm2, %v8957_v0  ;;  %v8869_v3 = vld [vmem:[%s10904_s6 + $0x2a8] sm:$0xff]  }
 0x8b3   : > { %8387 = vmatmul.mubr.msk.bf16.vlgmr.msra.gmra.mxu1 %vm3699_vm7, %v10490_v31  ;;  %8312 = vmatprep.subr.bf16.mxu0 %v8957_v0  ;;  %v8871_v31 = vld [vmem:[%s10904_s6 + $0x2a0] sm:$0xff]  }
 0x8b4   : > { %8399 = vmatpush3.bf16.msra.mxu1 %v8837_v10  ;;  %8402 = vmatprep.mubr.msk.bf16.mxu1 %vm8959_vm2, %v8957_v0  ;;  %v8870_v10 = vld [vmem:[%s10904_s6 + $0x1f0] sm:$0xff]  }
 0x8b5   : > { %8400 = vmatprep.subr.bf16.mxu1 %v8957_v0 }
 0x8b6   : > { %8313 = vmatpush3.bf16.msra.mxu0 %v8838_v48  ;;  %v8872_v48 = vld [vmem:[%s10904_s6 + $0x218] sm:$0xff]  }
 0x8b7   : > { %8326 = vmatprep.subr.bf16.mxu0 %v8957_v0 }
 0x8b8   : > { %8401 = vmatpush3.bf16.msra.mxu1 %v8839_v20  ;;  %v5617_v20 = vrot.slane %v10643_v59, 3 }
 0x8b9   : > { %8315 = vmatmul.mubr.msk.bf16.vlgmr.msra.gmra.mxu0 %vm3699_vm7, %v4621_v24  ;;  %8414 = vmatprep.subr.bf16.mxu1 %v8957_v0  ;;  %v6303_v24 = vrot.slane %v10701_v36, 1 }
 0x8ba   : > { %8327 = vmatpush3.bf16.msra.mxu0 %v8840_v23  ;;  %8330 = vmatprep.mubr.msk.bf16.mxu0 %vm8959_vm2, %v8957_v0  ;;  %v8873_v23 = vld [vmem:[%s10904_s6 + $0x2c8] sm:$0xff]  }
 0x8bb   : > { %8403 = vmatmul.mubr.msk.bf16.vlgmr.msra.gmra.mxu1 %vm3699_vm7, %v5307_v26  ;;  %8328 = vmatprep.subr.bf16.mxu0 %v8957_v0  ;;  %v8875_v26 = vld [vmem:[%s10904_s6 + $0x2c0] sm:$0xff]  }
 0x8bc   : > { %8415 = vmatpush3.bf16.msra.mxu1 %v8841_v47  ;;  %8418 = vmatprep.mubr.msk.bf16.mxu1 %vm8959_vm2, %v8957_v0  ;;  %v8874_v47 = vld [vmem:[%s10904_s6 + $0x210] sm:$0xff]  }
 0x8bd   : > { %8416 = vmatprep.subr.bf16.mxu1 %v8957_v0 }
 0x8be   : > { %8329 = vmatpush3.bf16.msra.mxu0 %v8842_v35  ;;  %v8876_v35 = vld [vmem:[%s10904_s6 + $0x238] sm:$0xff]  }
 0x8bf   : > { %8342 = vmatprep.subr.bf16.mxu0 %v8957_v0 }
 0x8c0   : > { %8417 = vmatpush3.bf16.msra.mxu1 %v8843_v52  ;;  %v5741_v52 = vshrl.u32 %v10591_v18, 16 }
 0x8c1   : > { %8331 = vmatmul.mubr.msk.bf16.vlgmr.msra.gmra.mxu0 %vm3699_vm7, %v10535_v40  ;;  %8430 = vmatprep.subr.bf16.mxu1 %v8957_v0  ;;  %v6427_v40 = vrot.slane %v10701_v36, 2 }
 0x8c2   : > { %8343 = vmatpush3.bf16.msra.mxu0 %v8844_v16  ;;  %8346 = vmatprep.mubr.msk.bf16.mxu0 %vm8959_vm2, %v8957_v0  ;;  %v8877_v16 = vld [vmem:[%s10904_s6 + $0x2e8] sm:$0xff]   ;;  %v5991_v51 = vrot.slane %v5741_v52, 2 }
 0x8c3   : > { %8419 = vmatmul.mubr.msk.bf16.vlgmr.msra.gmra.mxu1 %vm3699_vm7, %v5431_v32  ;;  %8344 = vmatprep.subr.bf16.mxu0 %v8957_v0  ;;  %v8879_v32 = vld [vmem:[%s10904_s6 + $0x2e0] sm:$0xff]  }
 0x8c4   : > { %8431 = vmatpush3.bf16.msra.mxu1 %v8845_v37  ;;  %8434 = vmatprep.mubr.msk.bf16.mxu1 %vm8959_vm2, %v8957_v0  ;;  %v8878_v37 = vld [vmem:[%s10904_s6 + $0x230] sm:$0xff]  }
 0x8c5   : > { %8432 = vmatprep.subr.bf16.mxu1 %v8957_v0 }
 0x8c6   : > { %8345 = vmatpush3.bf16.msra.mxu0 %v8846_v42  ;;  %v8880_v42 = vld [vmem:[%s10904_s6 + $0x258] sm:$0xff]  }
 0x8c7   : > { %8358 = vmatprep.subr.bf16.mxu0 %v8957_v0 }
 0x8c8   : > { %8433 = vmatpush3.bf16.msra.mxu1 %v8847_v44  ;;  %v5867_v44 = vrot.slane %v5741_v52, 1 }
 0x8c9   : > { %8347 = vmatmul.mubr.msk.bf16.vlgmr.msra.gmra.mxu0 %vm3699_vm7, %v4871_v49  ;;  %8446 = vmatprep.subr.bf16.mxu1 %v8957_v0  ;;  %v6551_v49 = vrot.slane %v10701_v36, 3 }
 0x8ca   : > { %8359 = vmatpush3.bf16.msra.mxu0 %v8848_v45  ;;  %8362 = vmatprep.mubr.msk.bf16.mxu0 %vm8959_vm2, %v8957_v0  ;;  %v8881_v45 = vld [vmem:[%s10904_s6 + $0x308] sm:$0xff]  }
 0x8cb   : > { %8435 = vmatmul.mubr.msk.bf16.vlgmr.msra.gmra.mxu1 %vm3699_vm7, %v5555_v29  ;;  %8360 = vmatprep.subr.bf16.mxu0 %v8957_v0  ;;  %v8883_v29 = vld [vmem:[%s10904_s6 + $0x300] sm:$0xff]  }
 0x8cc   : > { %8447 = vmatpush3.bf16.msra.mxu1 %v8849_v28  ;;  %8450 = vmatprep.mubr.msk.bf16.mxu1 %vm8959_vm2, %v8957_v0  ;;  %v8882_v28 = vld [vmem:[%s10904_s6 + $0x250] sm:$0xff]  }
 0x8cd   : > { %8448 = vmatprep.subr.bf16.mxu1 %v8957_v0 }
 0x8ce   : > { %8361 = vmatpush3.bf16.msra.mxu0 %v8850_v22  ;;  %v3680_v22 = vmax.f32 %v10275_v58, 0.0  ;;  %v8886_v58 = vld [vmem:[%s10904_s6 + $0x298] sm:$0xff]  }
 0x8cf   : > { %8374 = vmatprep.subr.bf16.mxu0 %v8957_v0 }
 0x8d0   : > { %8449 = vmatpush3.bf16.msra.mxu1 %v8851_v63  ;;  %v8884_v63 = vld [vmem:[%s10904_s6 + $0x278] sm:$0xff]  }
 0x8d1   : > { %8363 = vmatmul.mubr.msk.bf16.vlgmr.msra.gmra.mxu0 %vm3699_vm7, %v4995_v15  ;;  %8462 = vmatprep.subr.bf16.mxu1 %v8957_v0  ;;  %v8885_v15 = vld [vmem:[%s10904_s6 + $0x270] sm:$0xff]  }
 0x8d2   : > { %8375 = vmatpush3.bf16.msra.mxu0 %v8852_v12  ;;  %8378 = vmatprep.mubr.msk.bf16.mxu0 %vm8959_vm2, %v8957_v0  ;;  %v6670_v12 = vpack.c.bf16 %v3680_v22, %v3680_v22 }
 0x8d3   : > { %8451 = vmatmul.mubr.msk.bf16.vlgmr.msra.gmra.mxu1 %vm3699_vm7, %v10591_v18  ;;  %8376 = vmatprep.subr.bf16.mxu0 %v8957_v0  ;;  %v8887_v18 = vld [vmem:[%s10904_s6 + $0x290] sm:$0xff]  }
 0x8d4   : > { %8463 = vmatpush3.bf16.msra.mxu1 %v8853_v41  ;;  %8466 = vmatprep.mubr.msk.bf16.mxu1 %vm8959_vm2, %v8957_v0  ;;  %v6115_v41 = vrot.slane %v5741_v52, 3 }
 0x8d5   : > { %8464 = vmatprep.subr.bf16.mxu1 %v8957_v0 }
 0x8d6   : > { %8377 = vmatpush3.bf16.msra.mxu0 %v8854_v50  ;;  %v8888_v50 = vld [vmem:[%s10904_s6 + $0x2b8] sm:$0xff]  }
 0x8d7   : > { %8390 = vmatprep.subr.bf16.mxu0 %v8957_v0 }
 0x8d8   : > { %8465 = vmatpush3.bf16.msra.mxu1 %v8855_v6  ;;  %v6239_v6 = vshrl.u32 %v10701_v36, 16 }
 0x8d9   : > { %8379 = vmatmul.mubr.msk.bf16.vlgmr.msra.gmra.mxu0 %vm3699_vm7, %v5119_v5  ;;  %8478 = vmatprep.subr.bf16.mxu1 %v8957_v0 }
 0x8da   : > { %8391 = vmatpush3.bf16.msra.mxu0 %v8856_v30  ;;  %8394 = vmatprep.mubr.msk.bf16.mxu0 %vm8959_vm2, %v8957_v0  ;;  %v8889_v30 = vld [vmem:[%s10904_s6 + $0x2b0] sm:$0xff]   ;;  %v6365_v5 = vrot.slane %v6239_v6, 1  ;;  %v6613_v62 = vrot.slane %v6239_v6, 3 }
 0x8db   : > { %8467 = vmatmul.mubr.msk.bf16.vlgmr.msra.gmra.mxu1 %vm3699_vm7, %v5805_v4  ;;  %8392 = vmatprep.subr.bf16.mxu0 %v8957_v0 }
 0x8dc   : > { %8479 = vmatpush3.bf16.msra.mxu1 %v8857_v9  ;;  %8482 = vmatprep.mubr.msk.bf16.mxu1 %vm8959_vm2, %v8957_v0 }
 0x8dd   : > { %8480 = vmatprep.subr.bf16.mxu1 %v8957_v0 }
 0x8de   : > { %8393 = vmatpush3.bf16.msra.mxu0 %v8858_v2 }
 0x8df   : > { %8406 = vmatprep.subr.bf16.mxu0 %v8957_v0 }
 0x8e0   : > { %8481 = vmatpush3.bf16.msra.mxu1 %v8859_v7 }
 0x8e1   : > { %8395 = vmatmul.mubr.msk.bf16.vlgmr.msra.gmra.mxu0 %vm3699_vm7, %v10643_v59  ;;  %8494 = vmatprep.subr.bf16.mxu1 %v8957_v0 }
 0x8e2   : > { %8407 = vmatpush3.bf16.msra.mxu0 %v8860_v11  ;;  %8410 = vmatprep.mubr.msk.bf16.mxu0 %vm8959_vm2, %v8957_v0  ;;  %v8892_v11 = vld [vmem:[%s10904_s6 + $0x2f8] sm:$0xff]  }
 0x8e3   : > { %8483 = vmatmul.mubr.msk.bf16.vlgmr.msra.gmra.mxu1 %vm3699_vm7, %v5929_v17  ;;  %8408 = vmatprep.subr.bf16.mxu0 %v8957_v0 }
 0x8e4   : > { %8495 = vmatpush3.bf16.msra.mxu1 %v8861_v34  ;;  %8498 = vmatprep.mubr.msk.bf16.mxu1 %vm8959_vm2, %v8957_v0  ;;  %v6489_v34 = vrot.slane %v6239_v6, 2 }
 0x8e5   : > { %8496 = vmatprep.subr.bf16.mxu1 %v8957_v0 }
 0x8e6   : > { %8409 = vmatpush3.bf16.msra.mxu0 %v8862_v56 }
 0x8e7   : > { %8422 = vmatprep.subr.bf16.mxu0 %v8957_v0 }
 0x8e8   : > { %8497 = vmatpush3.bf16.msra.mxu1 %v8863_v27 }
 0x8e9   : > { %8411 = vmatmul.mubr.msk.bf16.vlgmr.msra.gmra.mxu0 %vm3699_vm7, %v5369_v53  ;;  %8510 = vmatprep.subr.bf16.mxu1 %v8957_v0 }
 0x8ea   : > { %8423 = vmatpush3.bf16.msra.mxu0 %v8864_v54  ;;  %8426 = vmatprep.mubr.msk.bf16.mxu0 %vm8959_vm2, %v8957_v0 }
 0x8eb   : > { %8499 = vmatmul.mubr.msk.bf16.vlgmr.msra.gmra.mxu1 %vm3699_vm7, %v6053_v39  ;;  %8424 = vmatprep.subr.bf16.mxu0 %v8957_v0 }
 0x8ec   : > { %8511 = vmatpush3.bf16.msra.mxu1 %v8865_v19  ;;  %8514 = vmatprep.mubr.msk.bf16.mxu1 %vm8959_vm2, %v8957_v0 }
 0x8ed   : > { %8512 = vmatprep.subr.bf16.mxu1 %v8957_v0 }
 0x8ee   : > { %8425 = vmatpush3.bf16.msra.mxu0 %v8866_v57 }
 0x8ef   : > { %8438 = vmatprep.subr.bf16.mxu0 %v8957_v0 }
 0x8f0   : > { %8513 = vmatpush3.bf16.msra.mxu1 %v8867_v38 }
 0x8f1   : > { %8427 = vmatmul.mubr.msk.bf16.vlgmr.msra.gmra.mxu0 %vm3699_vm7, %v5493_v13  ;;  %8526 = vmatprep.subr.bf16.mxu1 %v8957_v0 }
 0x8f2   : > { %8439 = vmatpush3.bf16.msra.mxu0 %v8868_v46  ;;  %8442 = vmatprep.mubr.msk.bf16.mxu0 %vm8959_vm2, %v8957_v0 }
 0x8f3   : > { %8515 = vmatmul.mubr.msk.bf16.vlgmr.msra.gmra.mxu1 %vm3699_vm7, %v10701_v36  ;;  %8440 = vmatprep.subr.bf16.mxu0 %v8957_v0 }
 0x8f4   : > { %8527 = vmatpush3.bf16.msra.mxu1 %v8869_v3  ;;  %8530 = vmatprep.mubr.msk.bf16.mxu1 %vm8959_vm2, %v8957_v0 }
 0x8f5   : > { %8528 = vmatprep.subr.bf16.mxu1 %v8957_v0 }
 0x8f6   : > { %8441 = vmatpush3.bf16.msra.mxu0 %v8870_v10 }
 0x8f7   : > { %8454 = vmatprep.subr.bf16.mxu0 %v8957_v0 }
 0x8f8   : > { %8529 = vmatpush3.bf16.msra.mxu1 %v8871_v31 }
 0x8f9   : > { %8443 = vmatmul.mubr.msk.bf16.vlgmr.msra.gmra.mxu0 %vm3699_vm7, %v5617_v20  ;;  %8542 = vmatprep.subr.bf16.mxu1 %v8957_v0 }
 0x8fa   : > { %8455 = vmatpush3.bf16.msra.mxu0 %v8872_v48  ;;  %8458 = vmatprep.mubr.msk.bf16.mxu0 %vm8959_vm2, %v8957_v0 }
 0x8fb   : > { %8531 = vmatmul.mubr.msk.bf16.vlgmr.msra.gmra.mxu1 %vm3699_vm7, %v6303_v24  ;;  %8456 = vmatprep.subr.bf16.mxu0 %v8957_v0 }
 0x8fc   : > { %8543 = vmatpush3.bf16.msra.mxu1 %v8873_v23  ;;  %8546 = vmatprep.mubr.msk.bf16.mxu1 %vm8959_vm2, %v8957_v0 }
 0x8fd   : > { %8544 = vmatprep.subr.bf16.mxu1 %v8957_v0 }
 0x8fe   : > { %8457 = vmatpush3.bf16.msra.mxu0 %v8874_v47 }
 0x8ff   : > { %8470 = vmatprep.subr.bf16.mxu0 %v8957_v0 }
 0x900   : > { %8545 = vmatpush3.bf16.msra.mxu1 %v8875_v26 }
 0x901   : > { %8459 = vmatmul.mubr.msk.bf16.vlgmr.msra.gmra.mxu0 %vm3699_vm7, %v5741_v52  ;;  %8558 = vmatprep.subr.bf16.mxu1 %v8957_v0 }
 0x902   : > { %8471 = vmatpush3.bf16.msra.mxu0 %v8876_v35  ;;  %8474 = vmatprep.mubr.msk.bf16.mxu0 %vm8959_vm2, %v8957_v0 }
 0x903   : > { %8547 = vmatmul.mubr.msk.bf16.vlgmr.msra.gmra.mxu1 %vm3699_vm7, %v6427_v40  ;;  %8472 = vmatprep.subr.bf16.mxu0 %v8957_v0 }
 0x904   : > { %8559 = vmatpush3.bf16.msra.mxu1 %v8877_v16  ;;  %8562 = vmatprep.mubr.msk.bf16.mxu1 %vm8959_vm2, %v8957_v0 }
 0x905   : > { %8560 = vmatprep.subr.bf16.mxu1 %v8957_v0 }
 0x906   : > { %8473 = vmatpush3.bf16.msra.mxu0 %v8878_v37 }
 0x907   : > { %8486 = vmatprep.subr.bf16.mxu0 %v8957_v0 }
 0x908   : > { %8561 = vmatpush3.bf16.msra.mxu1 %v8879_v32 }
 0x909   : > { %8475 = vmatmul.mubr.msk.bf16.vlgmr.msra.gmra.mxu0 %vm3699_vm7, %v5867_v44  ;;  %8574 = vmatprep.subr.bf16.mxu1 %v8957_v0 }
 0x90a   : > { %8487 = vmatpush3.bf16.msra.mxu0 %v8880_v42  ;;  %8490 = vmatprep.mubr.msk.bf16.mxu0 %vm8959_vm2, %v8957_v0 }
 0x90b   : > { %8563 = vmatmul.mubr.msk.bf16.vlgmr.msra.gmra.mxu1 %vm3699_vm7, %v6551_v49  ;;  %8488 = vmatprep.subr.bf16.mxu0 %v8957_v0 }
 0x90c   : > { %8575 = vmatpush3.bf16.msra.mxu1 %v8881_v45  ;;  %8578 = vmatprep.mubr.msk.bf16.mxu1 %vm8959_vm2, %v8957_v0 }
 0x90d   : > { %8576 = vmatprep.subr.bf16.mxu1 %v8957_v0 }
 0x90e   : > { %8489 = vmatpush3.bf16.msra.mxu0 %v8882_v28 }
 0x90f   : > { %8502 = vmatprep.subr.bf16.mxu0 %v8957_v0 }
 0x910   : > { %8577 = vmatpush3.bf16.msra.mxu1 %v8883_v29 }
 0x911   : > { %8491 = vmatmul.mubr.msk.bf16.vlgmr.msra.gmra.mxu0 %vm3699_vm7, %v5991_v51 }
 0x912   : > { %8503 = vmatpush3.bf16.msra.mxu0 %v8884_v63  ;;  %8506 = vmatprep.mubr.msk.bf16.mxu0 %vm8959_vm2, %v8957_v0 }
 0x913   : > { %8579 = vmatmul.mubr.msk.bf16.vlgmr.msra.gmra.mxu1 %vm3699_vm7, %v6670_v12  ;;  %8504 = vmatprep.subr.bf16.mxu0 %v8957_v0 }
 0x916   : > { %8505 = vmatpush3.bf16.msra.mxu0 %v8885_v15 }
 0x917   : > { %8518 = vmatprep.subr.bf16.mxu0 %v8957_v0 }
 0x919   : > { %8507 = vmatmul.mubr.msk.bf16.vlgmr.msra.gmra.mxu0 %vm3699_vm7, %v6115_v41 }
 0x91a   : > { %8519 = vmatpush3.bf16.msra.mxu0 %v8886_v58  ;;  %8522 = vmatprep.mubr.msk.bf16.mxu0 %vm8959_vm2, %v8957_v0 }
 0x91b   : > { %8520 = vmatprep.subr.bf16.mxu0 %v8957_v0 }
 0x91e   : > { %8521 = vmatpush3.bf16.msra.mxu0 %v8887_v18 }
 0x91f   : > { %8534 = vmatprep.subr.bf16.mxu0 %v8957_v0 }
 0x921   : > { %8523 = vmatmul.mubr.msk.bf16.vlgmr.msra.gmra.mxu0 %vm3699_vm7, %v6239_v6 }
 0x922   : > { %8535 = vmatpush3.bf16.msra.mxu0 %v8888_v50  ;;  %8538 = vmatprep.mubr.msk.bf16.mxu0 %vm8959_vm2, %v8957_v0 }
 0x923   : > { %8536 = vmatprep.subr.bf16.mxu0 %v8957_v0 }
 0x926   : > { %8537 = vmatpush3.bf16.msra.mxu0 %v8889_v30 }
 0x927   : > { %8550 = vmatprep.subr.bf16.mxu0 %v8957_v0 }
 0x929   : > { %v3737_v9 = vpop.f32.mrf.mxu0  ;;  %8539 = vmatmul.mubr.msk.bf16.vlgmr.msra.gmra.mxu0 %vm3699_vm7, %v6365_v5 }
 0x92a   : > { %8551 = vmatpush3.bf16.msra.mxu0 %v8890_v55  ;;  %8554 = vmatprep.mubr.msk.bf16.mxu0 %vm8959_vm2, %v8957_v0  ;;  %v3743_v33 = vadd.f32 %v3737_v9, %v3681_v8 }
 0x92b   : > { %v8196_v4 = vpop.f32.mrf.mxu0  ;;  %v4111_v2 = vpop.f32.mrf.mxu1  ;;  %8552 = vmatprep.subr.bf16.mxu0 %v8957_v0 }
 0x92d   : > { %v3740_v7 = vpop.f32.mrf.mxu0  ;;  %v8244_v43 = vpop.f32.mrf.mxu1 }
 0x92e   : > { %8553 = vmatpush3.bf16.msra.mxu0 %v8891_v21 }
 0x92f   : > { %v8197_v61 = vpop.f32.mrf.mxu0  ;;  %v4114_v59 = vpop.f32.mrf.mxu1  ;;  %8566 = vmatprep.subr.bf16.mxu0 %v8957_v0 }
 0x931   : > { %v3800_v17 = vpop.f32.mrf.mxu0  ;;  %v8245_v14 = vpop.f32.mrf.mxu1  ;;  %8555 = vmatmul.mubr.msk.bf16.vlgmr.msra.gmra.mxu0 %vm3699_vm7, %v6489_v34 }
 0x932   : > { %v3806_v56 = vadd.f32 %v3800_v17, %v3743_v33  ;;  %8567 = vmatpush3.bf16.msra.mxu0 %v8892_v11  ;;  %8570 = vmatprep.mubr.msk.bf16.mxu0 %vm8959_vm2, %v8957_v0 }
 0x933   : > { %v8204_v27 = vpop.f32.mrf.mxu0  ;;  %v4235_v25 = vpop.f32.mrf.mxu1  ;;  %8568 = vmatprep.subr.bf16.mxu0 %v8957_v0 }
 0x935   : > { %v3803_v54 = vpop.f32.mrf.mxu0  ;;  %v8260_v53 = vpop.f32.mrf.mxu1 }
 0x936   : > { %8569 = vmatpush3.bf16.msra.mxu0 %v8893_v1 }
 0x937   : > { %v8205_v19 = vpop.f32.mrf.mxu0  ;;  %v4238_v39 = vpop.f32.mrf.mxu1 }
 0x939   : > { %v3863_v57 = vpop.f32.mrf.mxu0  ;;  %v8261_v38 = vpop.f32.mrf.mxu1  ;;  %8571 = vmatmul.mubr.msk.bf16.vlgmr.msra.gmra.mxu0 %vm3699_vm7, %v6613_v62 }
 0x93a   : > { %v3869_v60 = vadd.f32 %v3863_v57, %v3806_v56 }
 0x93b   : > { %v8212_v46 = vpop.f32.mrf.mxu0  ;;  %v4361_v13 = vpop.f32.mrf.mxu1 }
 0x93d   : > { %v3866_v3 = vpop.f32.mrf.mxu0  ;;  %v8276_v36 = vpop.f32.mrf.mxu1 }
 0x93f   : > { %v8213_v10 = vpop.f32.mrf.mxu0  ;;  %v4364_v31 = vpop.f32.mrf.mxu1 }
 0x941   : > { %v3925_v48 = vpop.f32.mrf.mxu0  ;;  %v8277_v20 = vpop.f32.mrf.mxu1 }
 0x942   : > { %v3931_v0 = vadd.f32 %v3925_v48, %v3869_v60 }
 0x943   : > { %v8220_v23 = vpop.f32.mrf.mxu0  ;;  %v4485_v24 = vpop.f32.mrf.mxu1 }
 0x945   : > { %v3928_v47 = vpop.f32.mrf.mxu0  ;;  %v8292_v26 = vpop.f32.mrf.mxu1 }
 0x947   : > { %v8221_v35 = vpop.f32.mrf.mxu0  ;;  %v4488_v52 = vpop.f32.mrf.mxu1 }
 0x949   : > { %v3987_v16 = vpop.f32.mrf.mxu0  ;;  %v8293_v40 = vpop.f32.mrf.mxu1 }
 0x94a   : > { %v3993_v37 = vadd.f32 %v3987_v16, %v3931_v0 }
 0x94b   : > { %v8228_v32 = vpop.f32.mrf.mxu0  ;;  %v4609_v42 = vpop.f32.mrf.mxu1 }
 0x94d   : > { %v3990_v44 = vpop.f32.mrf.mxu0  ;;  %v8308_v45 = vpop.f32.mrf.mxu1 }
 0x94f   : > { %v8229_v49 = vpop.f32.mrf.mxu0  ;;  %v4612_v28 = vpop.f32.mrf.mxu1 }
 0x951   : > { %v4049_v29 = vpop.f32.mrf.mxu0  ;;  %v8309_v22 = vpop.f32.mrf.mxu1 }
 0x952   : > { %v4055_v63 = vadd.f32 %v4049_v29, %v3993_v37 }
 0x953   : > { %v8236_v51 = vpop.f32.mrf.mxu0  ;;  %v4733_v12 = vpop.f32.mrf.mxu1 }
 0x954   : > { %v4117_v15 = vadd.f32 %v4111_v2, %v4055_v63 }
 0x955   : > { %v4052_v58 = vpop.f32.mrf.mxu0  ;;  %v8324_v41 = vpop.f32.mrf.mxu1 }
 0x957   : > { %v8237_v18 = vpop.f32.mrf.mxu0  ;;  %v4736_v50 = vpop.f32.mrf.mxu1 }
 0x959   : > { %v4173_v6 = vpop.f32.mrf.mxu0  ;;  %v8325_v30 = vpop.f32.mrf.mxu1 }
 0x95a   : > { %v4179_v55 = vadd.f32 %v4173_v6, %v4117_v15 }
 0x95b   : > { %v8252_v5 = vpop.f32.mrf.mxu0  ;;  %v4859_v9 = vpop.f32.mrf.mxu1 }
 0x95c   : > { %v4241_v21 = vadd.f32 %v4235_v25, %v4179_v55 }
 0x95d   : > { %v4176_v4 = vpop.f32.mrf.mxu0  ;;  %v8340_v8 = vpop.f32.mrf.mxu1 }
 0x95f   : > { %v8253_v7 = vpop.f32.mrf.mxu0  ;;  %v4862_v43 = vpop.f32.mrf.mxu1 }
 0x961   : > { %v4298_v11 = vpop.f32.mrf.mxu0  ;;  %v8341_v61 = vpop.f32.mrf.mxu1 }
 0x962   : > { %v4304_v59 = vadd.f32 %v4298_v11, %v4241_v21 }
 0x963   : > { %v8268_v34 = vpop.f32.mrf.mxu0  ;;  %v4983_v33 = vpop.f32.mrf.mxu1 }
 0x964   : > { %v4367_v2 = vadd.f32 %v4361_v13, %v4304_v59 }
 0x965   : > { %v4301_v17 = vpop.f32.mrf.mxu0  ;;  %v8356_v14 = vpop.f32.mrf.mxu1 }
 0x967   : > { %v8269_v56 = vpop.f32.mrf.mxu0  ;;  %v4986_v1 = vpop.f32.mrf.mxu1 }
 0x969   : > { %v4423_v27 = vpop.f32.mrf.mxu0  ;;  %v8357_v54 = vpop.f32.mrf.mxu1 }
 0x96a   : > { %v4429_v53 = vadd.f32 %v4423_v27, %v4367_v2 }
 0x96b   : > { %v8284_v19 = vpop.f32.mrf.mxu0  ;;  %v5107_v39 = vpop.f32.mrf.mxu1 }
 0x96c   : > { %v4491_v25 = vadd.f32 %v4485_v24, %v4429_v53 }
 0x96d   : > { %v4426_v62 = vpop.f32.mrf.mxu0  ;;  %v8372_v57 = vpop.f32.mrf.mxu1 }
 0x96f   : > { %v8285_v38 = vpop.f32.mrf.mxu0  ;;  %v5110_v60 = vpop.f32.mrf.mxu1 }
 0x971   : > { %v4547_v46 = vpop.f32.mrf.mxu0  ;;  %v8373_v3 = vpop.f32.mrf.mxu1 }
 0x972   : > { %v4553_v36 = vadd.f32 %v4547_v46, %v4491_v25 }
 0x973   : > { %v8300_v10 = vpop.f32.mrf.mxu0  ;;  %v5231_v31 = vpop.f32.mrf.mxu1 }
 0x974   : > { %v4615_v13 = vadd.f32 %v4609_v42, %v4553_v36 }
 0x975   : > { %v4550_v48 = vpop.f32.mrf.mxu0  ;;  %v8388_v20 = vpop.f32.mrf.mxu1 }
 0x977   : > { %v8301_v0 = vpop.f32.mrf.mxu0  ;;  %v5234_v23 = vpop.f32.mrf.mxu1 }
 0x979   : > { %v4671_v47 = vpop.f32.mrf.mxu0  ;;  %v8389_v26 = vpop.f32.mrf.mxu1 }
 0x97a   : > { %v4677_v35 = vadd.f32 %v4671_v47, %v4615_v13 }
 0x97b   : > { %v8316_v52 = vpop.f32.mrf.mxu0  ;;  %v5357_v16 = vpop.f32.mrf.mxu1 }
 0x97c   : > { %v4739_v24 = vadd.f32 %v4733_v12, %v4677_v35 }
 0x97d   : > { %v4674_v40 = vpop.f32.mrf.mxu0  ;;  %v8404_v37 = vpop.f32.mrf.mxu1 }
 0x97f   : > { %v8317_v32 = vpop.f32.mrf.mxu0  ;;  %v5360_v44 = vpop.f32.mrf.mxu1 }
 0x981   : > { %v4796_v45 = vpop.f32.mrf.mxu0  ;;  %v8405_v49 = vpop.f32.mrf.mxu1 }
 0x982   : > { %v4802_v28 = vadd.f32 %v4796_v45, %v4739_v24 }
 0x983   : > { %v8332_v29 = vpop.f32.mrf.mxu0  ;;  %v5481_v22 = vpop.f32.mrf.mxu1 }
 0x984   : > { %v4865_v42 = vadd.f32 %v4859_v9, %v4802_v28 }
 0x985   : > { %v4799_v63 = vpop.f32.mrf.mxu0  ;;  %v8420_v51 = vpop.f32.mrf.mxu1 }
 0x987   : > { %v8333_v15 = vpop.f32.mrf.mxu0  ;;  %v5484_v58 = vpop.f32.mrf.mxu1 }
 0x989   : > { %v4921_v41 = vpop.f32.mrf.mxu0  ;;  %v8421_v18 = vpop.f32.mrf.mxu1 }
 0x98a   : > { %v4927_v50 = vadd.f32 %v4921_v41, %v4865_v42 }
 0x98b   : > { %v8348_v6 = vpop.f32.mrf.mxu0  ;;  %v5605_v30 = vpop.f32.mrf.mxu1 }
 0x98c   : > { %v4989_v12 = vadd.f32 %v4983_v33, %v4927_v50 }
 0x98d   : > { %v4924_v55 = vpop.f32.mrf.mxu0  ;;  %v8436_v5 = vpop.f32.mrf.mxu1 }
 0x98f   : > { %v8349_v21 = vpop.f32.mrf.mxu0  ;;  %v5608_v4 = vpop.f32.mrf.mxu1 }
 0x991   : > { %v5045_v8 = vpop.f32.mrf.mxu0  ;;  %v8437_v7 = vpop.f32.mrf.mxu1 }
 0x992   : > { %v5051_v43 = vadd.f32 %v5045_v8, %v4989_v12 }
 0x993   : > { %v8364_v11 = vpop.f32.mrf.mxu0  ;;  %v5729_v61 = vpop.f32.mrf.mxu1 }
 0x994   : > { %v5113_v9 = vadd.f32 %v5107_v39, %v5051_v43 }
 0x995   : > { %v5048_v59 = vpop.f32.mrf.mxu0  ;;  %v8452_v34 = vpop.f32.mrf.mxu1 }
 0x997   : > { %v8365_v2 = vpop.f32.mrf.mxu0  ;;  %v5732_v17 = vpop.f32.mrf.mxu1 }
 0x999   : > { %v5169_v14 = vpop.f32.mrf.mxu0  ;;  %v8453_v56 = vpop.f32.mrf.mxu1 }
 0x99a   : > { %v5175_v1 = vadd.f32 %v5169_v14, %v5113_v9 }
 0x99b   : > { %v8380_v27 = vpop.f32.mrf.mxu0  ;;  %v5855_v54 = vpop.f32.mrf.mxu1 }
 0x99c   : > { %v5237_v33 = vadd.f32 %v5231_v31, %v5175_v1 }
 0x99d   : > { %v5172_v53 = vpop.f32.mrf.mxu0  ;;  %v8468_v19 = vpop.f32.mrf.mxu1 }
 0x99f   : > { %v8381_v25 = vpop.f32.mrf.mxu0  ;;  %v5858_v62 = vpop.f32.mrf.mxu1 }
 0x9a1   : > { %v5294_v57 = vpop.f32.mrf.mxu0  ;;  %v8469_v38 = vpop.f32.mrf.mxu1 }
 0x9a2   : > { %v5300_v60 = vadd.f32 %v5294_v57, %v5237_v33 }
 0x9a3   : > { %v8396_v46 = vpop.f32.mrf.mxu0  ;;  %v5979_v3 = vpop.f32.mrf.mxu1 }
 0x9a4   : > { %v5363_v39 = vadd.f32 %v5357_v16, %v5300_v60 }
 0x9a5   : > { %v5297_v36 = vpop.f32.mrf.mxu0  ;;  %v8484_v10 = vpop.f32.mrf.mxu1 }
 0x9a7   : > { %v8397_v13 = vpop.f32.mrf.mxu0  ;;  %v5982_v48 = vpop.f32.mrf.mxu1 }
 0x9a9   : > { %v5419_v20 = vpop.f32.mrf.mxu0  ;;  %v8485_v0 = vpop.f32.mrf.mxu1 }
 0x9aa   : > { %v5425_v23 = vadd.f32 %v5419_v20, %v5363_v39 }
 0x9ab   : > { %v8412_v47 = vpop.f32.mrf.mxu0  ;;  %v6103_v26 = vpop.f32.mrf.mxu1 }
 0x9ac   : > { %v5487_v31 = vadd.f32 %v5481_v22, %v5425_v23 }
 0x9ad   : > { %v5422_v35 = vpop.f32.mrf.mxu0  ;;  %v8500_v52 = vpop.f32.mrf.mxu1 }
 0x9af   : > { %v8413_v24 = vpop.f32.mrf.mxu0  ;;  %v6106_v40 = vpop.f32.mrf.mxu1 }
 0x9b1   : > { %v5543_v37 = vpop.f32.mrf.mxu0  ;;  %v8501_v32 = vpop.f32.mrf.mxu1 }
 0x9b2   : > { %v5549_v44 = vadd.f32 %v5543_v37, %v5487_v31 }
 0x9b3   : > { %v8428_v45 = vpop.f32.mrf.mxu0  ;;  %v6227_v49 = vpop.f32.mrf.mxu1 }
 0x9b4   : > { %v5611_v16 = vadd.f32 %v5605_v30, %v5549_v44 }
 0x9b5   : > { %v5546_v28 = vpop.f32.mrf.mxu0  ;;  %v8516_v29 = vpop.f32.mrf.mxu1 }
 0x9b7   : > { %v8429_v42 = vpop.f32.mrf.mxu0  ;;  %v6230_v63 = vpop.f32.mrf.mxu1 }
 0x9b9   : > { %v5667_v51 = vpop.f32.mrf.mxu0  ;;  %v8517_v15 = vpop.f32.mrf.mxu1 }
 0x9ba   : > { %v5673_v58 = vadd.f32 %v5667_v51, %v5611_v16 }
 0x9bb   : > { %v8444_v41 = vpop.f32.mrf.mxu0  ;;  %v6353_v18 = vpop.f32.mrf.mxu1 }
 0x9bc   : > { %v5735_v22 = vadd.f32 %v5729_v61, %v5673_v58 }
 0x9bd   : > { %v5670_v50 = vpop.f32.mrf.mxu0  ;;  %v8532_v6 = vpop.f32.mrf.mxu1 }
 0x9bf   : > { %v8445_v12 = vpop.f32.mrf.mxu0  ;;  %v6356_v55 = vpop.f32.mrf.mxu1 }
 0x9c1   : > { %v5792_v5 = vpop.f32.mrf.mxu0  ;;  %v8533_v21 = vpop.f32.mrf.mxu1 }
 0x9c2   : > { %v5798_v4 = vadd.f32 %v5792_v5, %v5735_v22 }
 0x9c3   : > { %v8460_v8 = vpop.f32.mrf.mxu0  ;;  %v6477_v7 = vpop.f32.mrf.mxu1 }
 0x9c4   : > { %v5861_v30 = vadd.f32 %v5855_v54, %v5798_v4 }
 0x9c5   : > { %v5795_v43 = vpop.f32.mrf.mxu0  ;;  %v8548_v11 = vpop.f32.mrf.mxu1 }
 0x9c7   : > { %v8461_v9 = vpop.f32.mrf.mxu0  ;;  %v6480_v59 = vpop.f32.mrf.mxu1 }
 0x9c9   : > { %v5917_v34 = vpop.f32.mrf.mxu0  ;;  %v8549_v2 = vpop.f32.mrf.mxu1 }
 0x9ca   : > { %v5923_v17 = vadd.f32 %v5917_v34, %v5861_v30 }
 0x9cb   : > { %v8476_v14 = vpop.f32.mrf.mxu0  ;;  %v6601_v56 = vpop.f32.mrf.mxu1 }
 0x9cc   : > { %v5985_v61 = vadd.f32 %v5979_v3, %v5923_v17 }
 0x9cd   : > { %v5920_v1 = vpop.f32.mrf.mxu0  ;;  %v8564_v27 = vpop.f32.mrf.mxu1 }
 0x9cf   : > { %v8477_v33 = vpop.f32.mrf.mxu0  ;;  %v6604_v53 = vpop.f32.mrf.mxu1 }
 0x9d1   : > { %v6041_v19 = vpop.f32.mrf.mxu0  ;;  %v8565_v25 = vpop.f32.mrf.mxu1 }
 0x9d2   : > { %v6047_v13 = vadd.f32 %v6041_v19, %v5985_v61 }
 0x9d3   : > { %v8492_v62 = vpop.f32.mrf.mxu0  ;;  %v6725_v57 = vpop.f32.mrf.mxu1 }
 0x9d4   : > { %v6109_v0 = vadd.f32 %v6103_v26, %v6047_v13 }
 0x9d5   : > { %v6044_v38 = vpop.f32.mrf.mxu0  ;;  %v8580_v54 = vpop.f32.mrf.mxu1 }
 0x9d7   : > { %v8493_v60 = vpop.f32.mrf.mxu0  ;;  %v6728_v46 = vpop.f32.mrf.mxu1 }
 0x9d9   : > { %v6165_v39 = vpop.f32.mrf.mxu0  ;;  %v8581_v36 = vpop.f32.mrf.mxu1 }
 0x9da   : > { %v6171_v23 = vadd.f32 %v6165_v39, %v6109_v0 }
 0x9db   : > { %v8508_v10 = vpop.f32.mrf.mxu0 }
 0x9dc   : > { %v6233_v35 = vadd.f32 %v6227_v49, %v6171_v23 }
 0x9dd   : > { %v6168_v48 = vpop.f32.mrf.mxu0 }
 0x9df   : > { %v8509_v20 = vpop.f32.mrf.mxu0 }
 0x9e1   : > { %v6290_v3 = vpop.f32.mrf.mxu0 }
 0x9e2   : > { %v6296_v24 = vadd.f32 %v6290_v3, %v6233_v35 }
 0x9e3   : > { %v8524_v47 = vpop.f32.mrf.mxu0 }
 0x9e4   : > { %v6359_v32 = vadd.f32 %v6353_v18, %v6296_v24 }
 0x9e5   : > { %v6293_v31 = vpop.f32.mrf.mxu0 }
 0x9e7   : > { %v8525_v52 = vpop.f32.mrf.mxu0 }
 0x9e9   : > { %v6415_v40 = vpop.f32.mrf.mxu0 }
 0x9ea   : > { %v6421_v45 = vadd.f32 %v6415_v40, %v6359_v32 }
 0x9eb   : > { %v8540_v37 = vpop.f32.mrf.mxu0 }
 0x9ec   : > { %v6483_v29 = vadd.f32 %v6477_v7, %v6421_v45 }
 0x9ed   : > { %v6418_v44 = vpop.f32.mrf.mxu0 }
 0x9ef   : > { %v8541_v16 = vpop.f32.mrf.mxu0 }
 0x9f1   : > { %v6539_v28 = vpop.f32.mrf.mxu0 }
 0x9f2   : > { %v6545_v26 = vadd.f32 %v6539_v28, %v6483_v29 }
 0x9f3   : > { %v8556_v42 = vpop.f32.mrf.mxu0 }
 0x9f4   : > { %v6607_v15 = vadd.f32 %v6601_v56, %v6545_v26 }
 0x9f5   : > { %v6542_v63 = vpop.f32.mrf.mxu0 }
 0x9f7   : > { %v8557_v51 = vpop.f32.mrf.mxu0 }
 0x9f9   : > { %v6663_v58 = vpop.f32.mrf.mxu0 }
 0x9fa   : > { %v6669_v49 = vadd.f32 %v6663_v58, %v6607_v15 }
 0x9fb   : > { %v8572_v41 = vpop.f32.mrf.mxu0 }
 0x9fc   : > { %v6731_v22 = vadd.f32 %v6725_v57, %v6669_v49 }
 0x9fd   : > { %v6666_v18 = vpop.f32.mrf.mxu0 }
 0x9fe   : > { %6732 = vst [vmem:[%s297_s25] sm:$0x1] %v6731_v22 }
 0x9ff   : > { %v8573_v50 = vpop.f32.mrf.mxu0 }
 0xa00   : > { %8908 = shalt.err (!%p8905_p3)
}
 0xa01   : > { %s8909_s21 = scalar_lea.hbm %s10857_s13, 16  ;;  %s8913_s24 = scalar_lea.hbm %s10906_s8, 32 }
 0xa02   : > { %p8910_p4 = scmp.ne.s32.totalorder %s10857_s13, %s8909_s21  ;;  %p8914_p9 = scmp.lt.s32.totalorder %s10857_s13, %s10906_s8 }
 0xa03   : > { %p8915_p10 = scmp.lt.s32.totalorder %s8913_s24, %s8909_s21 }
 0xa04   : > { %p8911_p7 = pnand %p8910_p4, %p9045_p5 }
 0xa05   : > { %p8916_p11 = por %p8915_p10, %p8914_p9 }
 0xa06   : > { %p8912_p8 = pneg %p8911_p7 }
 0xa08   : > { %p8917_p12 = pnand %p8916_p11, %p8912_p8 }
 0xa0a   : > { %8920 = shalt.err (!%p8917_p12)
}
 0xa0b   : > { %8583 = dma.vmem_to_hbm [thread:$0]  (%p9045_p5), %s10859_s26, 16, %s10857_s13, %s6734_s17  }
 0xa0c PF: > { %p8589_p13 = scmp.ge.s32.totalorder %s8955_s30, 2  ;;  %s6758_s12 = sand.u32 1, %s8943_s27  }
 0xa0d   : > { %s6759_s9 = scalar_lea.sflag [#allocation3], %s6758_s12 }
 0xa0e   : > { %p8586_p0 = pnand %p8589_p13, %p9049_p6 }
 0xa10   : > { %p8587_p1 = pneg %p8586_p0 }
 0xa12   : > { %8938 = dma.done.wait (%p8587_p1), %s6759_s9, 16  }
 0xa13   : > { %8940 = vsyncadd (%p8587_p1), %s6759_s9, 4294967280  ;;  %p18_p2 = scmp.ge.s32.totalorder %s9032_s11, 4   ;;  %s10909_s27 = smov %s8947_s28 }
 0xa14   : > { %s10910_s28 = smov %s8951_s29  ;;  %s10911_s29 = smov %s9043_s14 }
 0xa15   : > { %s10912_s30 = smov %s9032_s11  ;;  %20 = sbr.rel (!%p18_p2) target bundleno = 3 (0x3), region = 154 }
 0xa1a   :  { %6763 = vsyncpa [#allocation3], 1 }
 0xa1b   :  { %6765 = vsyncpa [#allocation3 + $0x1], 1 }

</bundles_post_ra>
